<compile_context>
chip_gen: v7x
topology: tpu7x:2x2x1
jax: 0.10.0
libtpu: 0.0.40
codegen_flags: <defaults>
</compile_context>

<pallas_src>
import jax
import jax.numpy as jnp
from jax.experimental import pallas as pl
from jax.experimental.pallas import tpu as pltpu


def _outconv_kernel(x_ref, w_ref, o_ref, xpad_ref, acc_ref):
    # x_ref   : (1, C_TILE, H, W)    input-channel tile (VMEM, NCHW)
    # w_ref   : (Cin*9*Cout,)        flat 3x3 tap weights, scalars in SMEM
    # o_ref   : (1, Cout, H*W)       lane-dense flattened output block
    # xpad_ref: (C_TILE, H+2, W+2)   VMEM scratch: fused zero padding
    # acc_ref : (Cout, H, W)         VMEM f32 accumulator across Cin tiles
    _, c_tile, H, W = x_ref.shape
    c_out = o_ref.shape[1]

    ci_step = pl.program_id(1)
    c_base = ci_step * c_tile

    @pl.when(ci_step == 0)
    def _init():
        acc_ref[...] = jnp.zeros_like(acc_ref)

    # Fused zero padding (padding=1): borders stay zero, interior overwritten.
    # Zeroed every step so megacore splitting of the parallel axis stays safe.
    xpad_ref[...] = jnp.zeros_like(xpad_ref)
    xpad_ref[:, 1:H + 1, 1:W + 1] = x_ref[0].astype(jnp.float32)

    # 3x3 conv as 9 shifted VPU MACs.  One shifted slice per tap, covering the
    # whole channel tile, shared by every (ci, co) pair; weights are SMEM
    # scalars broadcast against the (H, W) plane.  Accumulate in registers,
    # touch the VMEM accumulator once per output channel per step.
    accs = [jnp.zeros((H, W), jnp.float32) for _ in range(c_out)]
    for t in range(9):
        kh, kw = divmod(t, 3)
        shifted = xpad_ref[:, kh:kh + H, kw:kw + W]  # (c_tile, H, W)
        for co in range(c_out):
            for ci in range(c_tile):
                w = w_ref[(c_base + ci) * (9 * c_out) + t * c_out + co]
                accs[co] = accs[co] + w * shifted[ci]

    for co in range(c_out):
        acc_ref[co] = acc_ref[co] + accs[co]

    @pl.when(ci_step == pl.num_programs(1) - 1)
    def _finalize():
        o_ref[...] = acc_ref[...].reshape(1, c_out, H * W).astype(o_ref.dtype)


def _pick_c_tile(cin, max_tile=16):
    t = min(cin, max_tile)
    while cin % t:
        t -= 1
    return t


@jax.jit
def outconv_forward(x_nchw, weight):
    """x_nchw: (N, Cin, H, W); weight: (Cout, Cin, 3, 3). Returns (N, Cout, H, W)."""
    N, Cin, H, W = x_nchw.shape
    Cout = weight.shape[0]
    c_tile = _pick_c_tile(Cin)
    n_ci = Cin // c_tile

    # (Cout, Cin, 3, 3) -> flat (Cin*9*Cout,); index = (ci*9 + kh*3 + kw)*Cout + co.
    w_flat = jnp.transpose(weight, (1, 2, 3, 0)).reshape(-1).astype(jnp.float32)

    out_flat = pl.pallas_call(
        _outconv_kernel,
        out_shape=jax.ShapeDtypeStruct((N, Cout, H * W), x_nchw.dtype),
        grid=(N, n_ci),
        in_specs=[
            pl.BlockSpec((1, c_tile, H, W), lambda n, c: (n, c, 0, 0)),
            pl.BlockSpec(memory_space=pltpu.MemorySpace.SMEM),  # tiny 1-D scalar table
        ],
        out_specs=pl.BlockSpec((1, Cout, H * W), lambda n, c: (n, 0, 0)),
        scratch_shapes=[
            pltpu.VMEM((c_tile, H + 2, W + 2), jnp.float32),  # fused zero-pad buffer
            pltpu.VMEM((Cout, H, W), jnp.float32),            # f32 accumulator
        ],
        compiler_params=pltpu.CompilerParams(
            dimension_semantics=("parallel", "arbitrary"),
            vmem_limit_bytes=32 * 1024 * 1024,
        ),
    )(x_nchw, w_flat)

    # Free metadata reshape back to NCHW (contiguous trailing dims).
    return out_flat.reshape(N, Cout, H, W)


def make_outconv_params(key, in_channels, out_channels):
    """Deterministic kaiming_normal_ init (fan_in, gain=sqrt(2)), bias=False."""
    fan_in = in_channels * 3 * 3
    std = (2.0 / fan_in) ** 0.5
    weight = std * jax.random.normal(
        key, (out_channels, in_channels, 3, 3), dtype=jnp.float32
    )
    return weight


def _reference_conv(x, weight):
    return jax.lax.conv_general_dilated(
        x, weight, window_strides=(1, 1), padding=((1, 1), (1, 1)),
        dimension_numbers=("NCHW", "OIHW", "NCHW"),
    )


if __name__ == "__main__":
    key = jax.random.PRNGKey(0)
    k_x, k_w, k_x2, k_w2 = jax.random.split(key, 4)

    # Case 1: module-sized small shapes (single Cin tile).
    N, Cin, H, W = 2, 4, 16, 16
    Cout = 3
    x = jax.random.normal(k_x, (N, Cin, H, W), dtype=jnp.float32)
    weight = make_outconv_params(k_w, Cin, Cout)
    out = jax.block_until_ready(outconv_forward(x, weight))
    ref = _reference_conv(x, weight)
    assert out.shape == (N, Cout, H, W)
    assert jnp.allclose(out, ref, atol=1e-4, rtol=1e-4)

    # Case 2: exercises the multi-tile Cin reduction path (n_ci > 1).
    N2, Cin2, H2, W2, Cout2 = 1, 32, 8, 8, 2
    x2 = jax.random.normal(k_x2, (N2, Cin2, H2, W2), dtype=jnp.float32)
    weight2 = make_outconv_params(k_w2, Cin2, Cout2)
    out2 = jax.block_until_ready(outconv_forward(x2, weight2))
    ref2 = _reference_conv(x2, weight2)
    assert out2.shape == (N2, Cout2, H2, W2)
    assert jnp.allclose(out2, ref2, atol=1e-4, rtol=1e-4)

    print("KERNEL_OK")
</pallas_src>

<mosaic_0001>
module attributes {stable_mosaic.version = 11 : i64} {
  func.func @_outconv_kernel(%arg0: i32, %arg1: i32, %arg2: memref<1x4x16x16xf32, #tpu.memory_space<vmem>>, %arg3: memref<108xf32, #tpu.memory_space<smem>>, %arg4: memref<1x3x256xf32, #tpu.memory_space<vmem>>, %arg5: memref<4x18x18xf32, #tpu.memory_space<vmem>>, %arg6: memref<3x16x16xf32, #tpu.memory_space<vmem>>) attributes {dimension_semantics = [#tpu.dimension_semantics<parallel>, #tpu.dimension_semantics<arbitrary>], iteration_bounds = array<i64: 2, 1>, scalar_prefetch = 0 : i64, scratch_operands = 2 : i64, tpu.core_type = #tpu.core_type<tc>, window_params = [{transform_indices = @transform_0, window_bounds = array<i64: 1, 4, 16, 16>}, {transform_indices = @transform_1, window_bounds = array<i64: 108>}, {transform_indices = @transform_2, window_bounds = array<i64: 1, 3, 256>}]} {
    %c4_i32 = arith.constant 4 : i32
    %0 = arith.muli %arg1, %c4_i32 : i32
    %c0_i32 = arith.constant 0 : i32
    %1 = arith.cmpi eq, %arg1, %c0_i32 : i32
    %2 = arith.extui %1 : i1 to i32
    %c0_i32_0 = arith.constant 0 : i32
    %3 = arith.cmpi ne, %2, %c0_i32_0 : i32
    scf.if %3 {
      %cst_479 = arith.constant 0.000000e+00 : f32
      %1230 = vector.broadcast %cst_479 : f32 to vector<3x16x16xf32>
      %c0_480 = arith.constant 0 : index
      %c0_481 = arith.constant 0 : index
      %c0_482 = arith.constant 0 : index
      %1231 = vector.load %arg6[%c0_480, %c0_481, %c0_482] : memref<3x16x16xf32, #tpu.memory_space<vmem>>, vector<3x16x16xf32>
      tpu.vector_store %arg6[%c0_480, %c0_481, %c0_482], %1230 {strides = array<i32>} : memref<3x16x16xf32, #tpu.memory_space<vmem>>, vector<3x16x16xf32>,
    } else {
    }
    %cst = arith.constant 0.000000e+00 : f32
    %4 = vector.broadcast %cst : f32 to vector<4x18x18xf32>
    %c0 = arith.constant 0 : index
    %c0_1 = arith.constant 0 : index
    %c0_2 = arith.constant 0 : index
    %5 = vector.load %arg5[%c0, %c0_1, %c0_2] : memref<4x18x18xf32, #tpu.memory_space<vmem>>, vector<4x18x18xf32>
    tpu.vector_store %arg5[%c0, %c0_1, %c0_2], %4 {strides = array<i32>} : memref<4x18x18xf32, #tpu.memory_space<vmem>>, vector<4x18x18xf32>,
    %c0_3 = arith.constant 0 : index
    %c0_4 = arith.constant 0 : index
    %c0_5 = arith.constant 0 : index
    %c0_6 = arith.constant 0 : index
    %6 = vector.load %arg2[%c0_3, %c0_4, %c0_5, %c0_6] : memref<1x4x16x16xf32, #tpu.memory_space<vmem>>, vector<1x4x16x16xf32>
    %7 = vector.shape_cast %6 : vector<1x4x16x16xf32> to vector<4x16x16xf32>
    %c0_7 = arith.constant 0 : index
    %c1 = arith.constant 1 : index
    %c1_8 = arith.constant 1 : index
    %8 = vector.load %arg5[%c0_7, %c1, %c1_8] : memref<4x18x18xf32, #tpu.memory_space<vmem>>, vector<4x16x16xf32>
    tpu.vector_store %arg5[%c0_7, %c1, %c1_8], %7 {strides = array<i32>} : memref<4x18x18xf32, #tpu.memory_space<vmem>>, vector<4x16x16xf32>,
    %cst_9 = arith.constant 0.000000e+00 : f32
    %9 = vector.broadcast %cst_9 : f32 to vector<16x16xf32>
    %cst_10 = arith.constant 0.000000e+00 : f32
    %10 = vector.broadcast %cst_10 : f32 to vector<16x16xf32>
    %cst_11 = arith.constant 0.000000e+00 : f32
    %11 = vector.broadcast %cst_11 : f32 to vector<16x16xf32>
    %c0_12 = arith.constant 0 : index
    %c0_13 = arith.constant 0 : index
    %c0_14 = arith.constant 0 : index
    %12 = vector.load %arg5[%c0_12, %c0_13, %c0_14] : memref<4x18x18xf32, #tpu.memory_space<vmem>>, vector<4x16x16xf32>
    %c0_i32_15 = arith.constant 0 : i32
    %13 = arith.addi %0, %c0_i32_15 : i32
    %c27_i32 = arith.constant 27 : i32
    %14 = arith.muli %13, %c27_i32 : i32
    %c0_i32_16 = arith.constant 0 : i32
    %15 = arith.addi %14, %c0_i32_16 : i32
    %c0_i32_17 = arith.constant 0 : i32
    %16 = arith.addi %15, %c0_i32_17 : i32
    %17 = arith.index_cast %16 : i32 to index
    %18 = memref.load %arg3[%17] : memref<108xf32, #tpu.memory_space<smem>>
    %19 = vector.extract_strided_slice %12 {offsets = [0, 0, 0], sizes = [1, 16, 16], strides = [1, 1, 1]} : vector<4x16x16xf32> to vector<1x16x16xf32>
    %20 = vector.shape_cast %19 : vector<1x16x16xf32> to vector<16x16xf32>
    %21 = vector.broadcast %18 : f32 to vector<16x16xf32>
    %22 = arith.mulf %21, %20 : vector<16x16xf32>
    %23 = arith.addf %9, %22 : vector<16x16xf32>
    %c1_i32 = arith.constant 1 : i32
    %24 = arith.addi %0, %c1_i32 : i32
    %c27_i32_18 = arith.constant 27 : i32
    %25 = arith.muli %24, %c27_i32_18 : i32
    %c0_i32_19 = arith.constant 0 : i32
    %26 = arith.addi %25, %c0_i32_19 : i32
    %c0_i32_20 = arith.constant 0 : i32
    %27 = arith.addi %26, %c0_i32_20 : i32
    %28 = arith.index_cast %27 : i32 to index
    %29 = memref.load %arg3[%28] : memref<108xf32, #tpu.memory_space<smem>>
    %30 = vector.extract_strided_slice %12 {offsets = [1, 0, 0], sizes = [1, 16, 16], strides = [1, 1, 1]} : vector<4x16x16xf32> to vector<1x16x16xf32>
    %31 = vector.shape_cast %30 : vector<1x16x16xf32> to vector<16x16xf32>
    %32 = vector.broadcast %29 : f32 to vector<16x16xf32>
    %33 = arith.mulf %32, %31 : vector<16x16xf32>
    %34 = arith.addf %23, %33 : vector<16x16xf32>
    %c2_i32 = arith.constant 2 : i32
    %35 = arith.addi %0, %c2_i32 : i32
    %c27_i32_21 = arith.constant 27 : i32
    %36 = arith.muli %35, %c27_i32_21 : i32
    %c0_i32_22 = arith.constant 0 : i32
    %37 = arith.addi %36, %c0_i32_22 : i32
    %c0_i32_23 = arith.constant 0 : i32
    %38 = arith.addi %37, %c0_i32_23 : i32
    %39 = arith.index_cast %38 : i32 to index
    %40 = memref.load %arg3[%39] : memref<108xf32, #tpu.memory_space<smem>>
    %41 = vector.extract_strided_slice %12 {offsets = [2, 0, 0], sizes = [1, 16, 16], strides = [1, 1, 1]} : vector<4x16x16xf32> to vector<1x16x16xf32>
    %42 = vector.shape_cast %41 : vector<1x16x16xf32> to vector<16x16xf32>
    %43 = vector.broadcast %40 : f32 to vector<16x16xf32>
    %44 = arith.mulf %43, %42 : vector<16x16xf32>
    %45 = arith.addf %34, %44 : vector<16x16xf32>
    %c3_i32 = arith.constant 3 : i32
    %46 = arith.addi %0, %c3_i32 : i32
    %c27_i32_24 = arith.constant 27 : i32
    %47 = arith.muli %46, %c27_i32_24 : i32
    %c0_i32_25 = arith.constant 0 : i32
    %48 = arith.addi %47, %c0_i32_25 : i32
    %c0_i32_26 = arith.constant 0 : i32
    %49 = arith.addi %48, %c0_i32_26 : i32
    %50 = arith.index_cast %49 : i32 to index
    %51 = memref.load %arg3[%50] : memref<108xf32, #tpu.memory_space<smem>>
    %52 = vector.extract_strided_slice %12 {offsets = [3, 0, 0], sizes = [1, 16, 16], strides = [1, 1, 1]} : vector<4x16x16xf32> to vector<1x16x16xf32>
    %53 = vector.shape_cast %52 : vector<1x16x16xf32> to vector<16x16xf32>
    %54 = vector.broadcast %51 : f32 to vector<16x16xf32>
    %55 = arith.mulf %54, %53 : vector<16x16xf32>
    %56 = arith.addf %45, %55 : vector<16x16xf32>
    %c0_i32_27 = arith.constant 0 : i32
    %57 = arith.addi %0, %c0_i32_27 : i32
    %c27_i32_28 = arith.constant 27 : i32
    %58 = arith.muli %57, %c27_i32_28 : i32
    %c0_i32_29 = arith.constant 0 : i32
    %59 = arith.addi %58, %c0_i32_29 : i32
    %c1_i32_30 = arith.constant 1 : i32
    %60 = arith.addi %59, %c1_i32_30 : i32
    %61 = arith.index_cast %60 : i32 to index
    %62 = memref.load %arg3[%61] : memref<108xf32, #tpu.memory_space<smem>>
    %63 = vector.extract_strided_slice %12 {offsets = [0, 0, 0], sizes = [1, 16, 16], strides = [1, 1, 1]} : vector<4x16x16xf32> to vector<1x16x16xf32>
    %64 = vector.shape_cast %63 : vector<1x16x16xf32> to vector<16x16xf32>
    %65 = vector.broadcast %62 : f32 to vector<16x16xf32>
    %66 = arith.mulf %65, %64 : vector<16x16xf32>
    %67 = arith.addf %10, %66 : vector<16x16xf32>
    %c1_i32_31 = arith.constant 1 : i32
    %68 = arith.addi %0, %c1_i32_31 : i32
    %c27_i32_32 = arith.constant 27 : i32
    %69 = arith.muli %68, %c27_i32_32 : i32
    %c0_i32_33 = arith.constant 0 : i32
    %70 = arith.addi %69, %c0_i32_33 : i32
    %c1_i32_34 = arith.constant 1 : i32
    %71 = arith.addi %70, %c1_i32_34 : i32
    %72 = arith.index_cast %71 : i32 to index
    %73 = memref.load %arg3[%72] : memref<108xf32, #tpu.memory_space<smem>>
    %74 = vector.extract_strided_slice %12 {offsets = [1, 0, 0], sizes = [1, 16, 16], strides = [1, 1, 1]} : vector<4x16x16xf32> to vector<1x16x16xf32>
    %75 = vector.shape_cast %74 : vector<1x16x16xf32> to vector<16x16xf32>
    %76 = vector.broadcast %73 : f32 to vector<16x16xf32>
    %77 = arith.mulf %76, %75 : vector<16x16xf32>
    %78 = arith.addf %67, %77 : vector<16x16xf32>
    %c2_i32_35 = arith.constant 2 : i32
    %79 = arith.addi %0, %c2_i32_35 : i32
    %c27_i32_36 = arith.constant 27 : i32
    %80 = arith.muli %79, %c27_i32_36 : i32
    %c0_i32_37 = arith.constant 0 : i32
    %81 = arith.addi %80, %c0_i32_37 : i32
    %c1_i32_38 = arith.constant 1 : i32
    %82 = arith.addi %81, %c1_i32_38 : i32
    %83 = arith.index_cast %82 : i32 to index
    %84 = memref.load %arg3[%83] : memref<108xf32, #tpu.memory_space<smem>>
    %85 = vector.extract_strided_slice %12 {offsets = [2, 0, 0], sizes = [1, 16, 16], strides = [1, 1, 1]} : vector<4x16x16xf32> to vector<1x16x16xf32>
    %86 = vector.shape_cast %85 : vector<1x16x16xf32> to vector<16x16xf32>
    %87 = vector.broadcast %84 : f32 to vector<16x16xf32>
    %88 = arith.mulf %87, %86 : vector<16x16xf32>
    %89 = arith.addf %78, %88 : vector<16x16xf32>
    %c3_i32_39 = arith.constant 3 : i32
    %90 = arith.addi %0, %c3_i32_39 : i32
    %c27_i32_40 = arith.constant 27 : i32
    %91 = arith.muli %90, %c27_i32_40 : i32
    %c0_i32_41 = arith.constant 0 : i32
    %92 = arith.addi %91, %c0_i32_41 : i32
    %c1_i32_42 = arith.constant 1 : i32
    %93 = arith.addi %92, %c1_i32_42 : i32
    %94 = arith.index_cast %93 : i32 to index
    %95 = memref.load %arg3[%94] : memref<108xf32, #tpu.memory_space<smem>>
    %96 = vector.extract_strided_slice %12 {offsets = [3, 0, 0], sizes = [1, 16, 16], strides = [1, 1, 1]} : vector<4x16x16xf32> to vector<1x16x16xf32>
    %97 = vector.shape_cast %96 : vector<1x16x16xf32> to vector<16x16xf32>
    %98 = vector.broadcast %95 : f32 to vector<16x16xf32>
    %99 = arith.mulf %98, %97 : vector<16x16xf32>
    %100 = arith.addf %89, %99 : vector<16x16xf32>
    %c0_i32_43 = arith.constant 0 : i32
    %101 = arith.addi %0, %c0_i32_43 : i32
    %c27_i32_44 = arith.constant 27 : i32
    %102 = arith.muli %101, %c27_i32_44 : i32
    %c0_i32_45 = arith.constant 0 : i32
    %103 = arith.addi %102, %c0_i32_45 : i32
    %c2_i32_46 = arith.constant 2 : i32
    %104 = arith.addi %103, %c2_i32_46 : i32
    %105 = arith.index_cast %104 : i32 to index
    %106 = memref.load %arg3[%105] : memref<108xf32, #tpu.memory_space<smem>>
    %107 = vector.extract_strided_slice %12 {offsets = [0, 0, 0], sizes = [1, 16, 16], strides = [1, 1, 1]} : vector<4x16x16xf32> to vector<1x16x16xf32>
    %108 = vector.shape_cast %107 : vector<1x16x16xf32> to vector<16x16xf32>
    %109 = vector.broadcast %106 : f32 to vector<16x16xf32>
    %110 = arith.mulf %109, %108 : vector<16x16xf32>
    %111 = arith.addf %11, %110 : vector<16x16xf32>
    %c1_i32_47 = arith.constant 1 : i32
    %112 = arith.addi %0, %c1_i32_47 : i32
    %c27_i32_48 = arith.constant 27 : i32
    %113 = arith.muli %112, %c27_i32_48 : i32
    %c0_i32_49 = arith.constant 0 : i32
    %114 = arith.addi %113, %c0_i32_49 : i32
    %c2_i32_50 = arith.constant 2 : i32
    %115 = arith.addi %114, %c2_i32_50 : i32
    %116 = arith.index_cast %115 : i32 to index
    %117 = memref.load %arg3[%116] : memref<108xf32, #tpu.memory_space<smem>>
    %118 = vector.extract_strided_slice %12 {offsets = [1, 0, 0], sizes = [1, 16, 16], strides = [1, 1, 1]} : vector<4x16x16xf32> to vector<1x16x16xf32>
    %119 = vector.shape_cast %118 : vector<1x16x16xf32> to vector<16x16xf32>
    %120 = vector.broadcast %117 : f32 to vector<16x16xf32>
    %121 = arith.mulf %120, %119 : vector<16x16xf32>
    %122 = arith.addf %111, %121 : vector<16x16xf32>
    %c2_i32_51 = arith.constant 2 : i32
    %123 = arith.addi %0, %c2_i32_51 : i32
    %c27_i32_52 = arith.constant 27 : i32
    %124 = arith.muli %123, %c27_i32_52 : i32
    %c0_i32_53 = arith.constant 0 : i32
    %125 = arith.addi %124, %c0_i32_53 : i32
    %c2_i32_54 = arith.constant 2 : i32
    %126 = arith.addi %125, %c2_i32_54 : i32
    %127 = arith.index_cast %126 : i32 to index
    %128 = memref.load %arg3[%127] : memref<108xf32, #tpu.memory_space<smem>>
    %129 = vector.extract_strided_slice %12 {offsets = [2, 0, 0], sizes = [1, 16, 16], strides = [1, 1, 1]} : vector<4x16x16xf32> to vector<1x16x16xf32>
    %130 = vector.shape_cast %129 : vector<1x16x16xf32> to vector<16x16xf32>
    %131 = vector.broadcast %128 : f32 to vector<16x16xf32>
    %132 = arith.mulf %131, %130 : vector<16x16xf32>
    %133 = arith.addf %122, %132 : vector<16x16xf32>
    %c3_i32_55 = arith.constant 3 : i32
    %134 = arith.addi %0, %c3_i32_55 : i32
    %c27_i32_56 = arith.constant 27 : i32
    %135 = arith.muli %134, %c27_i32_56 : i32
    %c0_i32_57 = arith.constant 0 : i32
    %136 = arith.addi %135, %c0_i32_57 : i32
    %c2_i32_58 = arith.constant 2 : i32
    %137 = arith.addi %136, %c2_i32_58 : i32
    %138 = arith.index_cast %137 : i32 to index
    %139 = memref.load %arg3[%138] : memref<108xf32, #tpu.memory_space<smem>>
    %140 = vector.extract_strided_slice %12 {offsets = [3, 0, 0], sizes = [1, 16, 16], strides = [1, 1, 1]} : vector<4x16x16xf32> to vector<1x16x16xf32>
    %141 = vector.shape_cast %140 : vector<1x16x16xf32> to vector<16x16xf32>
    %142 = vector.broadcast %139 : f32 to vector<16x16xf32>
    %143 = arith.mulf %142, %141 : vector<16x16xf32>
    %144 = arith.addf %133, %143 : vector<16x16xf32>
    %c0_59 = arith.constant 0 : index
    %c0_60 = arith.constant 0 : index
    %c1_61 = arith.constant 1 : index
    %145 = vector.load %arg5[%c0_59, %c0_60, %c1_61] : memref<4x18x18xf32, #tpu.memory_space<vmem>>, vector<4x16x16xf32>
    %c0_i32_62 = arith.constant 0 : i32
    %146 = arith.addi %0, %c0_i32_62 : i32
    %c27_i32_63 = arith.constant 27 : i32
    %147 = arith.muli %146, %c27_i32_63 : i32
    %c3_i32_64 = arith.constant 3 : i32
    %148 = arith.addi %147, %c3_i32_64 : i32
    %c0_i32_65 = arith.constant 0 : i32
    %149 = arith.addi %148, %c0_i32_65 : i32
    %150 = arith.index_cast %149 : i32 to index
    %151 = memref.load %arg3[%150] : memref<108xf32, #tpu.memory_space<smem>>
    %152 = vector.extract_strided_slice %145 {offsets = [0, 0, 0], sizes = [1, 16, 16], strides = [1, 1, 1]} : vector<4x16x16xf32> to vector<1x16x16xf32>
    %153 = vector.shape_cast %152 : vector<1x16x16xf32> to vector<16x16xf32>
    %154 = vector.broadcast %151 : f32 to vector<16x16xf32>
    %155 = arith.mulf %154, %153 : vector<16x16xf32>
    %156 = arith.addf %56, %155 : vector<16x16xf32>
    %c1_i32_66 = arith.constant 1 : i32
    %157 = arith.addi %0, %c1_i32_66 : i32
    %c27_i32_67 = arith.constant 27 : i32
    %158 = arith.muli %157, %c27_i32_67 : i32
    %c3_i32_68 = arith.constant 3 : i32
    %159 = arith.addi %158, %c3_i32_68 : i32
    %c0_i32_69 = arith.constant 0 : i32
    %160 = arith.addi %159, %c0_i32_69 : i32
    %161 = arith.index_cast %160 : i32 to index
    %162 = memref.load %arg3[%161] : memref<108xf32, #tpu.memory_space<smem>>
    %163 = vector.extract_strided_slice %145 {offsets = [1, 0, 0], sizes = [1, 16, 16], strides = [1, 1, 1]} : vector<4x16x16xf32> to vector<1x16x16xf32>
    %164 = vector.shape_cast %163 : vector<1x16x16xf32> to vector<16x16xf32>
    %165 = vector.broadcast %162 : f32 to vector<16x16xf32>
    %166 = arith.mulf %165, %164 : vector<16x16xf32>
    %167 = arith.addf %156, %166 : vector<16x16xf32>
    %c2_i32_70 = arith.constant 2 : i32
    %168 = arith.addi %0, %c2_i32_70 : i32
    %c27_i32_71 = arith.constant 27 : i32
    %169 = arith.muli %168, %c27_i32_71 : i32
    %c3_i32_72 = arith.constant 3 : i32
    %170 = arith.addi %169, %c3_i32_72 : i32
    %c0_i32_73 = arith.constant 0 : i32
    %171 = arith.addi %170, %c0_i32_73 : i32
    %172 = arith.index_cast %171 : i32 to index
    %173 = memref.load %arg3[%172] : memref<108xf32, #tpu.memory_space<smem>>
    %174 = vector.extract_strided_slice %145 {offsets = [2, 0, 0], sizes = [1, 16, 16], strides = [1, 1, 1]} : vector<4x16x16xf32> to vector<1x16x16xf32>
    %175 = vector.shape_cast %174 : vector<1x16x16xf32> to vector<16x16xf32>
    %176 = vector.broadcast %173 : f32 to vector<16x16xf32>
    %177 = arith.mulf %176, %175 : vector<16x16xf32>
    %178 = arith.addf %167, %177 : vector<16x16xf32>
    %c3_i32_74 = arith.constant 3 : i32
    %179 = arith.addi %0, %c3_i32_74 : i32
    %c27_i32_75 = arith.constant 27 : i32
    %180 = arith.muli %179, %c27_i32_75 : i32
    %c3_i32_76 = arith.constant 3 : i32
    %181 = arith.addi %180, %c3_i32_76 : i32
    %c0_i32_77 = arith.constant 0 : i32
    %182 = arith.addi %181, %c0_i32_77 : i32
    %183 = arith.index_cast %182 : i32 to index
    %184 = memref.load %arg3[%183] : memref<108xf32, #tpu.memory_space<smem>>
    %185 = vector.extract_strided_slice %145 {offsets = [3, 0, 0], sizes = [1, 16, 16], strides = [1, 1, 1]} : vector<4x16x16xf32> to vector<1x16x16xf32>
    %186 = vector.shape_cast %185 : vector<1x16x16xf32> to vector<16x16xf32>
    %187 = vector.broadcast %184 : f32 to vector<16x16xf32>
    %188 = arith.mulf %187, %186 : vector<16x16xf32>
    %189 = arith.addf %178, %188 : vector<16x16xf32>
    %c0_i32_78 = arith.constant 0 : i32
    %190 = arith.addi %0, %c0_i32_78 : i32
    %c27_i32_79 = arith.constant 27 : i32
    %191 = arith.muli %190, %c27_i32_79 : i32
    %c3_i32_80 = arith.constant 3 : i32
    %192 = arith.addi %191, %c3_i32_80 : i32
    %c1_i32_81 = arith.constant 1 : i32
    %193 = arith.addi %192, %c1_i32_81 : i32
    %194 = arith.index_cast %193 : i32 to index
    %195 = memref.load %arg3[%194] : memref<108xf32, #tpu.memory_space<smem>>
    %196 = vector.extract_strided_slice %145 {offsets = [0, 0, 0], sizes = [1, 16, 16], strides = [1, 1, 1]} : vector<4x16x16xf32> to vector<1x16x16xf32>
    %197 = vector.shape_cast %196 : vector<1x16x16xf32> to vector<16x16xf32>
    %198 = vector.broadcast %195 : f32 to vector<16x16xf32>
    %199 = arith.mulf %198, %197 : vector<16x16xf32>
    %200 = arith.addf %100, %199 : vector<16x16xf32>
    %c1_i32_82 = arith.constant 1 : i32
    %201 = arith.addi %0, %c1_i32_82 : i32
    %c27_i32_83 = arith.constant 27 : i32
    %202 = arith.muli %201, %c27_i32_83 : i32
    %c3_i32_84 = arith.constant 3 : i32
    %203 = arith.addi %202, %c3_i32_84 : i32
    %c1_i32_85 = arith.constant 1 : i32
    %204 = arith.addi %203, %c1_i32_85 : i32
    %205 = arith.index_cast %204 : i32 to index
    %206 = memref.load %arg3[%205] : memref<108xf32, #tpu.memory_space<smem>>
    %207 = vector.extract_strided_slice %145 {offsets = [1, 0, 0], sizes = [1, 16, 16], strides = [1, 1, 1]} : vector<4x16x16xf32> to vector<1x16x16xf32>
    %208 = vector.shape_cast %207 : vector<1x16x16xf32> to vector<16x16xf32>
    %209 = vector.broadcast %206 : f32 to vector<16x16xf32>
    %210 = arith.mulf %209, %208 : vector<16x16xf32>
    %211 = arith.addf %200, %210 : vector<16x16xf32>
    %c2_i32_86 = arith.constant 2 : i32
    %212 = arith.addi %0, %c2_i32_86 : i32
    %c27_i32_87 = arith.constant 27 : i32
    %213 = arith.muli %212, %c27_i32_87 : i32
    %c3_i32_88 = arith.constant 3 : i32
    %214 = arith.addi %213, %c3_i32_88 : i32
    %c1_i32_89 = arith.constant 1 : i32
    %215 = arith.addi %214, %c1_i32_89 : i32
    %216 = arith.index_cast %215 : i32 to index
    %217 = memref.load %arg3[%216] : memref<108xf32, #tpu.memory_space<smem>>
    %218 = vector.extract_strided_slice %145 {offsets = [2, 0, 0], sizes = [1, 16, 16], strides = [1, 1, 1]} : vector<4x16x16xf32> to vector<1x16x16xf32>
    %219 = vector.shape_cast %218 : vector<1x16x16xf32> to vector<16x16xf32>
    %220 = vector.broadcast %217 : f32 to vector<16x16xf32>
    %221 = arith.mulf %220, %219 : vector<16x16xf32>
    %222 = arith.addf %211, %221 : vector<16x16xf32>
    %c3_i32_90 = arith.constant 3 : i32
    %223 = arith.addi %0, %c3_i32_90 : i32
    %c27_i32_91 = arith.constant 27 : i32
    %224 = arith.muli %223, %c27_i32_91 : i32
    %c3_i32_92 = arith.constant 3 : i32
    %225 = arith.addi %224, %c3_i32_92 : i32
    %c1_i32_93 = arith.constant 1 : i32
    %226 = arith.addi %225, %c1_i32_93 : i32
    %227 = arith.index_cast %226 : i32 to index
    %228 = memref.load %arg3[%227] : memref<108xf32, #tpu.memory_space<smem>>
    %229 = vector.extract_strided_slice %145 {offsets = [3, 0, 0], sizes = [1, 16, 16], strides = [1, 1, 1]} : vector<4x16x16xf32> to vector<1x16x16xf32>
    %230 = vector.shape_cast %229 : vector<1x16x16xf32> to vector<16x16xf32>
    %231 = vector.broadcast %228 : f32 to vector<16x16xf32>
    %232 = arith.mulf %231, %230 : vector<16x16xf32>
    %233 = arith.addf %222, %232 : vector<16x16xf32>
    %c0_i32_94 = arith.constant 0 : i32
    %234 = arith.addi %0, %c0_i32_94 : i32
    %c27_i32_95 = arith.constant 27 : i32
    %235 = arith.muli %234, %c27_i32_95 : i32
    %c3_i32_96 = arith.constant 3 : i32
    %236 = arith.addi %235, %c3_i32_96 : i32
    %c2_i32_97 = arith.constant 2 : i32
    %237 = arith.addi %236, %c2_i32_97 : i32
    %238 = arith.index_cast %237 : i32 to index
    %239 = memref.load %arg3[%238] : memref<108xf32, #tpu.memory_space<smem>>
    %240 = vector.extract_strided_slice %145 {offsets = [0, 0, 0], sizes = [1, 16, 16], strides = [1, 1, 1]} : vector<4x16x16xf32> to vector<1x16x16xf32>
    %241 = vector.shape_cast %240 : vector<1x16x16xf32> to vector<16x16xf32>
    %242 = vector.broadcast %239 : f32 to vector<16x16xf32>
    %243 = arith.mulf %242, %241 : vector<16x16xf32>
    %244 = arith.addf %144, %243 : vector<16x16xf32>
    %c1_i32_98 = arith.constant 1 : i32
    %245 = arith.addi %0, %c1_i32_98 : i32
    %c27_i32_99 = arith.constant 27 : i32
    %246 = arith.muli %245, %c27_i32_99 : i32
    %c3_i32_100 = arith.constant 3 : i32
    %247 = arith.addi %246, %c3_i32_100 : i32
    %c2_i32_101 = arith.constant 2 : i32
    %248 = arith.addi %247, %c2_i32_101 : i32
    %249 = arith.index_cast %248 : i32 to index
    %250 = memref.load %arg3[%249] : memref<108xf32, #tpu.memory_space<smem>>
    %251 = vector.extract_strided_slice %145 {offsets = [1, 0, 0], sizes = [1, 16, 16], strides = [1, 1, 1]} : vector<4x16x16xf32> to vector<1x16x16xf32>
    %252 = vector.shape_cast %251 : vector<1x16x16xf32> to vector<16x16xf32>
    %253 = vector.broadcast %250 : f32 to vector<16x16xf32>
    %254 = arith.mulf %253, %252 : vector<16x16xf32>
    %255 = arith.addf %244, %254 : vector<16x16xf32>
    %c2_i32_102 = arith.constant 2 : i32
    %256 = arith.addi %0, %c2_i32_102 : i32
    %c27_i32_103 = arith.constant 27 : i32
    %257 = arith.muli %256, %c27_i32_103 : i32
    %c3_i32_104 = arith.constant 3 : i32
    %258 = arith.addi %257, %c3_i32_104 : i32
    %c2_i32_105 = arith.constant 2 : i32
    %259 = arith.addi %258, %c2_i32_105 : i32
    %260 = arith.index_cast %259 : i32 to index
    %261 = memref.load %arg3[%260] : memref<108xf32, #tpu.memory_space<smem>>
    %262 = vector.extract_strided_slice %145 {offsets = [2, 0, 0], sizes = [1, 16, 16], strides = [1, 1, 1]} : vector<4x16x16xf32> to vector<1x16x16xf32>
    %263 = vector.shape_cast %262 : vector<1x16x16xf32> to vector<16x16xf32>
    %264 = vector.broadcast %261 : f32 to vector<16x16xf32>
    %265 = arith.mulf %264, %263 : vector<16x16xf32>
    %266 = arith.addf %255, %265 : vector<16x16xf32>
    %c3_i32_106 = arith.constant 3 : i32
    %267 = arith.addi %0, %c3_i32_106 : i32
    %c27_i32_107 = arith.constant 27 : i32
    %268 = arith.muli %267, %c27_i32_107 : i32
    %c3_i32_108 = arith.constant 3 : i32
    %269 = arith.addi %268, %c3_i32_108 : i32
    %c2_i32_109 = arith.constant 2 : i32
    %270 = arith.addi %269, %c2_i32_109 : i32
    %271 = arith.index_cast %270 : i32 to index
    %272 = memref.load %arg3[%271] : memref<108xf32, #tpu.memory_space<smem>>
    %273 = vector.extract_strided_slice %145 {offsets = [3, 0, 0], sizes = [1, 16, 16], strides = [1, 1, 1]} : vector<4x16x16xf32> to vector<1x16x16xf32>
    %274 = vector.shape_cast %273 : vector<1x16x16xf32> to vector<16x16xf32>
    %275 = vector.broadcast %272 : f32 to vector<16x16xf32>
    %276 = arith.mulf %275, %274 : vector<16x16xf32>
    %277 = arith.addf %266, %276 : vector<16x16xf32>
    %c0_110 = arith.constant 0 : index
    %c0_111 = arith.constant 0 : index
    %c2 = arith.constant 2 : index
    %278 = vector.load %arg5[%c0_110, %c0_111, %c2] : memref<4x18x18xf32, #tpu.memory_space<vmem>>, vector<4x16x16xf32>
    %c0_i32_112 = arith.constant 0 : i32
    %279 = arith.addi %0, %c0_i32_112 : i32
    %c27_i32_113 = arith.constant 27 : i32
    %280 = arith.muli %279, %c27_i32_113 : i32
    %c6_i32 = arith.constant 6 : i32
    %281 = arith.addi %280, %c6_i32 : i32
    %c0_i32_114 = arith.constant 0 : i32
    %282 = arith.addi %281, %c0_i32_114 : i32
    %283 = arith.index_cast %282 : i32 to index
    %284 = memref.load %arg3[%283] : memref<108xf32, #tpu.memory_space<smem>>
    %285 = vector.extract_strided_slice %278 {offsets = [0, 0, 0], sizes = [1, 16, 16], strides = [1, 1, 1]} : vector<4x16x16xf32> to vector<1x16x16xf32>
    %286 = vector.shape_cast %285 : vector<1x16x16xf32> to vector<16x16xf32>
    %287 = vector.broadcast %284 : f32 to vector<16x16xf32>
    %288 = arith.mulf %287, %286 : vector<16x16xf32>
    %289 = arith.addf %189, %288 : vector<16x16xf32>
    %c1_i32_115 = arith.constant 1 : i32
    %290 = arith.addi %0, %c1_i32_115 : i32
    %c27_i32_116 = arith.constant 27 : i32
    %291 = arith.muli %290, %c27_i32_116 : i32
    %c6_i32_117 = arith.constant 6 : i32
    %292 = arith.addi %291, %c6_i32_117 : i32
    %c0_i32_118 = arith.constant 0 : i32
    %293 = arith.addi %292, %c0_i32_118 : i32
    %294 = arith.index_cast %293 : i32 to index
    %295 = memref.load %arg3[%294] : memref<108xf32, #tpu.memory_space<smem>>
    %296 = vector.extract_strided_slice %278 {offsets = [1, 0, 0], sizes = [1, 16, 16], strides = [1, 1, 1]} : vector<4x16x16xf32> to vector<1x16x16xf32>
    %297 = vector.shape_cast %296 : vector<1x16x16xf32> to vector<16x16xf32>
    %298 = vector.broadcast %295 : f32 to vector<16x16xf32>
    %299 = arith.mulf %298, %297 : vector<16x16xf32>
    %300 = arith.addf %289, %299 : vector<16x16xf32>
    %c2_i32_119 = arith.constant 2 : i32
    %301 = arith.addi %0, %c2_i32_119 : i32
    %c27_i32_120 = arith.constant 27 : i32
    %302 = arith.muli %301, %c27_i32_120 : i32
    %c6_i32_121 = arith.constant 6 : i32
    %303 = arith.addi %302, %c6_i32_121 : i32
    %c0_i32_122 = arith.constant 0 : i32
    %304 = arith.addi %303, %c0_i32_122 : i32
    %305 = arith.index_cast %304 : i32 to index
    %306 = memref.load %arg3[%305] : memref<108xf32, #tpu.memory_space<smem>>
    %307 = vector.extract_strided_slice %278 {offsets = [2, 0, 0], sizes = [1, 16, 16], strides = [1, 1, 1]} : vector<4x16x16xf32> to vector<1x16x16xf32>
    %308 = vector.shape_cast %307 : vector<1x16x16xf32> to vector<16x16xf32>
    %309 = vector.broadcast %306 : f32 to vector<16x16xf32>
    %310 = arith.mulf %309, %308 : vector<16x16xf32>
    %311 = arith.addf %300, %310 : vector<16x16xf32>
    %c3_i32_123 = arith.constant 3 : i32
    %312 = arith.addi %0, %c3_i32_123 : i32
    %c27_i32_124 = arith.constant 27 : i32
    %313 = arith.muli %312, %c27_i32_124 : i32
    %c6_i32_125 = arith.constant 6 : i32
    %314 = arith.addi %313, %c6_i32_125 : i32
    %c0_i32_126 = arith.constant 0 : i32
    %315 = arith.addi %314, %c0_i32_126 : i32
    %316 = arith.index_cast %315 : i32 to index
    %317 = memref.load %arg3[%316] : memref<108xf32, #tpu.memory_space<smem>>
    %318 = vector.extract_strided_slice %278 {offsets = [3, 0, 0], sizes = [1, 16, 16], strides = [1, 1, 1]} : vector<4x16x16xf32> to vector<1x16x16xf32>
    %319 = vector.shape_cast %318 : vector<1x16x16xf32> to vector<16x16xf32>
    %320 = vector.broadcast %317 : f32 to vector<16x16xf32>
    %321 = arith.mulf %320, %319 : vector<16x16xf32>
    %322 = arith.addf %311, %321 : vector<16x16xf32>
    %c0_i32_127 = arith.constant 0 : i32
    %323 = arith.addi %0, %c0_i32_127 : i32
    %c27_i32_128 = arith.constant 27 : i32
    %324 = arith.muli %323, %c27_i32_128 : i32
    %c6_i32_129 = arith.constant 6 : i32
    %325 = arith.addi %324, %c6_i32_129 : i32
    %c1_i32_130 = arith.constant 1 : i32
    %326 = arith.addi %325, %c1_i32_130 : i32
    %327 = arith.index_cast %326 : i32 to index
    %328 = memref.load %arg3[%327] : memref<108xf32, #tpu.memory_space<smem>>
    %329 = vector.extract_strided_slice %278 {offsets = [0, 0, 0], sizes = [1, 16, 16], strides = [1, 1, 1]} : vector<4x16x16xf32> to vector<1x16x16xf32>
    %330 = vector.shape_cast %329 : vector<1x16x16xf32> to vector<16x16xf32>
    %331 = vector.broadcast %328 : f32 to vector<16x16xf32>
    %332 = arith.mulf %331, %330 : vector<16x16xf32>
    %333 = arith.addf %233, %332 : vector<16x16xf32>
    %c1_i32_131 = arith.constant 1 : i32
    %334 = arith.addi %0, %c1_i32_131 : i32
    %c27_i32_132 = arith.constant 27 : i32
    %335 = arith.muli %334, %c27_i32_132 : i32
    %c6_i32_133 = arith.constant 6 : i32
    %336 = arith.addi %335, %c6_i32_133 : i32
    %c1_i32_134 = arith.constant 1 : i32
    %337 = arith.addi %336, %c1_i32_134 : i32
    %338 = arith.index_cast %337 : i32 to index
    %339 = memref.load %arg3[%338] : memref<108xf32, #tpu.memory_space<smem>>
    %340 = vector.extract_strided_slice %278 {offsets = [1, 0, 0], sizes = [1, 16, 16], strides = [1, 1, 1]} : vector<4x16x16xf32> to vector<1x16x16xf32>
    %341 = vector.shape_cast %340 : vector<1x16x16xf32> to vector<16x16xf32>
    %342 = vector.broadcast %339 : f32 to vector<16x16xf32>
    %343 = arith.mulf %342, %341 : vector<16x16xf32>
    %344 = arith.addf %333, %343 : vector<16x16xf32>
    %c2_i32_135 = arith.constant 2 : i32
    %345 = arith.addi %0, %c2_i32_135 : i32
    %c27_i32_136 = arith.constant 27 : i32
    %346 = arith.muli %345, %c27_i32_136 : i32
    %c6_i32_137 = arith.constant 6 : i32
    %347 = arith.addi %346, %c6_i32_137 : i32
    %c1_i32_138 = arith.constant 1 : i32
    %348 = arith.addi %347, %c1_i32_138 : i32
    %349 = arith.index_cast %348 : i32 to index
    %350 = memref.load %arg3[%349] : memref<108xf32, #tpu.memory_space<smem>>
    %351 = vector.extract_strided_slice %278 {offsets = [2, 0, 0], sizes = [1, 16, 16], strides = [1, 1, 1]} : vector<4x16x16xf32> to vector<1x16x16xf32>
    %352 = vector.shape_cast %351 : vector<1x16x16xf32> to vector<16x16xf32>
    %353 = vector.broadcast %350 : f32 to vector<16x16xf32>
    %354 = arith.mulf %353, %352 : vector<16x16xf32>
    %355 = arith.addf %344, %354 : vector<16x16xf32>
    %c3_i32_139 = arith.constant 3 : i32
    %356 = arith.addi %0, %c3_i32_139 : i32
    %c27_i32_140 = arith.constant 27 : i32
    %357 = arith.muli %356, %c27_i32_140 : i32
    %c6_i32_141 = arith.constant 6 : i32
    %358 = arith.addi %357, %c6_i32_141 : i32
    %c1_i32_142 = arith.constant 1 : i32
    %359 = arith.addi %358, %c1_i32_142 : i32
    %360 = arith.index_cast %359 : i32 to index
    %361 = memref.load %arg3[%360] : memref<108xf32, #tpu.memory_space<smem>>
    %362 = vector.extract_strided_slice %278 {offsets = [3, 0, 0], sizes = [1, 16, 16], strides = [1, 1, 1]} : vector<4x16x16xf32> to vector<1x16x16xf32>
    %363 = vector.shape_cast %362 : vector<1x16x16xf32> to vector<16x16xf32>
    %364 = vector.broadcast %361 : f32 to vector<16x16xf32>
    %365 = arith.mulf %364, %363 : vector<16x16xf32>
    %366 = arith.addf %355, %365 : vector<16x16xf32>
    %c0_i32_143 = arith.constant 0 : i32
    %367 = arith.addi %0, %c0_i32_143 : i32
    %c27_i32_144 = arith.constant 27 : i32
    %368 = arith.muli %367, %c27_i32_144 : i32
    %c6_i32_145 = arith.constant 6 : i32
    %369 = arith.addi %368, %c6_i32_145 : i32
    %c2_i32_146 = arith.constant 2 : i32
    %370 = arith.addi %369, %c2_i32_146 : i32
    %371 = arith.index_cast %370 : i32 to index
    %372 = memref.load %arg3[%371] : memref<108xf32, #tpu.memory_space<smem>>
    %373 = vector.extract_strided_slice %278 {offsets = [0, 0, 0], sizes = [1, 16, 16], strides = [1, 1, 1]} : vector<4x16x16xf32> to vector<1x16x16xf32>
    %374 = vector.shape_cast %373 : vector<1x16x16xf32> to vector<16x16xf32>
    %375 = vector.broadcast %372 : f32 to vector<16x16xf32>
    %376 = arith.mulf %375, %374 : vector<16x16xf32>
    %377 = arith.addf %277, %376 : vector<16x16xf32>
    %c1_i32_147 = arith.constant 1 : i32
    %378 = arith.addi %0, %c1_i32_147 : i32
    %c27_i32_148 = arith.constant 27 : i32
    %379 = arith.muli %378, %c27_i32_148 : i32
    %c6_i32_149 = arith.constant 6 : i32
    %380 = arith.addi %379, %c6_i32_149 : i32
    %c2_i32_150 = arith.constant 2 : i32
    %381 = arith.addi %380, %c2_i32_150 : i32
    %382 = arith.index_cast %381 : i32 to index
    %383 = memref.load %arg3[%382] : memref<108xf32, #tpu.memory_space<smem>>
    %384 = vector.extract_strided_slice %278 {offsets = [1, 0, 0], sizes = [1, 16, 16], strides = [1, 1, 1]} : vector<4x16x16xf32> to vector<1x16x16xf32>
    %385 = vector.shape_cast %384 : vector<1x16x16xf32> to vector<16x16xf32>
    %386 = vector.broadcast %383 : f32 to vector<16x16xf32>
    %387 = arith.mulf %386, %385 : vector<16x16xf32>
    %388 = arith.addf %377, %387 : vector<16x16xf32>
    %c2_i32_151 = arith.constant 2 : i32
    %389 = arith.addi %0, %c2_i32_151 : i32
    %c27_i32_152 = arith.constant 27 : i32
    %390 = arith.muli %389, %c27_i32_152 : i32
    %c6_i32_153 = arith.constant 6 : i32
    %391 = arith.addi %390, %c6_i32_153 : i32
    %c2_i32_154 = arith.constant 2 : i32
    %392 = arith.addi %391, %c2_i32_154 : i32
    %393 = arith.index_cast %392 : i32 to index
    %394 = memref.load %arg3[%393] : memref<108xf32, #tpu.memory_space<smem>>
    %395 = vector.extract_strided_slice %278 {offsets = [2, 0, 0], sizes = [1, 16, 16], strides = [1, 1, 1]} : vector<4x16x16xf32> to vector<1x16x16xf32>
    %396 = vector.shape_cast %395 : vector<1x16x16xf32> to vector<16x16xf32>
    %397 = vector.broadcast %394 : f32 to vector<16x16xf32>
    %398 = arith.mulf %397, %396 : vector<16x16xf32>
    %399 = arith.addf %388, %398 : vector<16x16xf32>
    %c3_i32_155 = arith.constant 3 : i32
    %400 = arith.addi %0, %c3_i32_155 : i32
    %c27_i32_156 = arith.constant 27 : i32
    %401 = arith.muli %400, %c27_i32_156 : i32
    %c6_i32_157 = arith.constant 6 : i32
    %402 = arith.addi %401, %c6_i32_157 : i32
    %c2_i32_158 = arith.constant 2 : i32
    %403 = arith.addi %402, %c2_i32_158 : i32
    %404 = arith.index_cast %403 : i32 to index
    %405 = memref.load %arg3[%404] : memref<108xf32, #tpu.memory_space<smem>>
    %406 = vector.extract_strided_slice %278 {offsets = [3, 0, 0], sizes = [1, 16, 16], strides = [1, 1, 1]} : vector<4x16x16xf32> to vector<1x16x16xf32>
    %407 = vector.shape_cast %406 : vector<1x16x16xf32> to vector<16x16xf32>
    %408 = vector.broadcast %405 : f32 to vector<16x16xf32>
    %409 = arith.mulf %408, %407 : vector<16x16xf32>
    %410 = arith.addf %399, %409 : vector<16x16xf32>
    %c0_159 = arith.constant 0 : index
    %c1_160 = arith.constant 1 : index
    %c0_161 = arith.constant 0 : index
    %411 = vector.load %arg5[%c0_159, %c1_160, %c0_161] : memref<4x18x18xf32, #tpu.memory_space<vmem>>, vector<4x16x16xf32>
    %c0_i32_162 = arith.constant 0 : i32
    %412 = arith.addi %0, %c0_i32_162 : i32
    %c27_i32_163 = arith.constant 27 : i32
    %413 = arith.muli %412, %c27_i32_163 : i32
    %c9_i32 = arith.constant 9 : i32
    %414 = arith.addi %413, %c9_i32 : i32
    %c0_i32_164 = arith.constant 0 : i32
    %415 = arith.addi %414, %c0_i32_164 : i32
    %416 = arith.index_cast %415 : i32 to index
    %417 = memref.load %arg3[%416] : memref<108xf32, #tpu.memory_space<smem>>
    %418 = vector.extract_strided_slice %411 {offsets = [0, 0, 0], sizes = [1, 16, 16], strides = [1, 1, 1]} : vector<4x16x16xf32> to vector<1x16x16xf32>
    %419 = vector.shape_cast %418 : vector<1x16x16xf32> to vector<16x16xf32>
    %420 = vector.broadcast %417 : f32 to vector<16x16xf32>
    %421 = arith.mulf %420, %419 : vector<16x16xf32>
    %422 = arith.addf %322, %421 : vector<16x16xf32>
    %c1_i32_165 = arith.constant 1 : i32
    %423 = arith.addi %0, %c1_i32_165 : i32
    %c27_i32_166 = arith.constant 27 : i32
    %424 = arith.muli %423, %c27_i32_166 : i32
    %c9_i32_167 = arith.constant 9 : i32
    %425 = arith.addi %424, %c9_i32_167 : i32
    %c0_i32_168 = arith.constant 0 : i32
    %426 = arith.addi %425, %c0_i32_168 : i32
    %427 = arith.index_cast %426 : i32 to index
    %428 = memref.load %arg3[%427] : memref<108xf32, #tpu.memory_space<smem>>
    %429 = vector.extract_strided_slice %411 {offsets = [1, 0, 0], sizes = [1, 16, 16], strides = [1, 1, 1]} : vector<4x16x16xf32> to vector<1x16x16xf32>
    %430 = vector.shape_cast %429 : vector<1x16x16xf32> to vector<16x16xf32>
    %431 = vector.broadcast %428 : f32 to vector<16x16xf32>
    %432 = arith.mulf %431, %430 : vector<16x16xf32>
    %433 = arith.addf %422, %432 : vector<16x16xf32>
    %c2_i32_169 = arith.constant 2 : i32
    %434 = arith.addi %0, %c2_i32_169 : i32
    %c27_i32_170 = arith.constant 27 : i32
    %435 = arith.muli %434, %c27_i32_170 : i32
    %c9_i32_171 = arith.constant 9 : i32
    %436 = arith.addi %435, %c9_i32_171 : i32
    %c0_i32_172 = arith.constant 0 : i32
    %437 = arith.addi %436, %c0_i32_172 : i32
    %438 = arith.index_cast %437 : i32 to index
    %439 = memref.load %arg3[%438] : memref<108xf32, #tpu.memory_space<smem>>
    %440 = vector.extract_strided_slice %411 {offsets = [2, 0, 0], sizes = [1, 16, 16], strides = [1, 1, 1]} : vector<4x16x16xf32> to vector<1x16x16xf32>
    %441 = vector.shape_cast %440 : vector<1x16x16xf32> to vector<16x16xf32>
    %442 = vector.broadcast %439 : f32 to vector<16x16xf32>
    %443 = arith.mulf %442, %441 : vector<16x16xf32>
    %444 = arith.addf %433, %443 : vector<16x16xf32>
    %c3_i32_173 = arith.constant 3 : i32
    %445 = arith.addi %0, %c3_i32_173 : i32
    %c27_i32_174 = arith.constant 27 : i32
    %446 = arith.muli %445, %c27_i32_174 : i32
    %c9_i32_175 = arith.constant 9 : i32
    %447 = arith.addi %446, %c9_i32_175 : i32
    %c0_i32_176 = arith.constant 0 : i32
    %448 = arith.addi %447, %c0_i32_176 : i32
    %449 = arith.index_cast %448 : i32 to index
    %450 = memref.load %arg3[%449] : memref<108xf32, #tpu.memory_space<smem>>
    %451 = vector.extract_strided_slice %411 {offsets = [3, 0, 0], sizes = [1, 16, 16], strides = [1, 1, 1]} : vector<4x16x16xf32> to vector<1x16x16xf32>
    %452 = vector.shape_cast %451 : vector<1x16x16xf32> to vector<16x16xf32>
    %453 = vector.broadcast %450 : f32 to vector<16x16xf32>
    %454 = arith.mulf %453, %452 : vector<16x16xf32>
    %455 = arith.addf %444, %454 : vector<16x16xf32>
    %c0_i32_177 = arith.constant 0 : i32
    %456 = arith.addi %0, %c0_i32_177 : i32
    %c27_i32_178 = arith.constant 27 : i32
    %457 = arith.muli %456, %c27_i32_178 : i32
    %c9_i32_179 = arith.constant 9 : i32
    %458 = arith.addi %457, %c9_i32_179 : i32
    %c1_i32_180 = arith.constant 1 : i32
    %459 = arith.addi %458, %c1_i32_180 : i32
    %460 = arith.index_cast %459 : i32 to index
    %461 = memref.load %arg3[%460] : memref<108xf32, #tpu.memory_space<smem>>
    %462 = vector.extract_strided_slice %411 {offsets = [0, 0, 0], sizes = [1, 16, 16], strides = [1, 1, 1]} : vector<4x16x16xf32> to vector<1x16x16xf32>
    %463 = vector.shape_cast %462 : vector<1x16x16xf32> to vector<16x16xf32>
    %464 = vector.broadcast %461 : f32 to vector<16x16xf32>
    %465 = arith.mulf %464, %463 : vector<16x16xf32>
    %466 = arith.addf %366, %465 : vector<16x16xf32>
    %c1_i32_181 = arith.constant 1 : i32
    %467 = arith.addi %0, %c1_i32_181 : i32
    %c27_i32_182 = arith.constant 27 : i32
    %468 = arith.muli %467, %c27_i32_182 : i32
    %c9_i32_183 = arith.constant 9 : i32
    %469 = arith.addi %468, %c9_i32_183 : i32
    %c1_i32_184 = arith.constant 1 : i32
    %470 = arith.addi %469, %c1_i32_184 : i32
    %471 = arith.index_cast %470 : i32 to index
    %472 = memref.load %arg3[%471] : memref<108xf32, #tpu.memory_space<smem>>
    %473 = vector.extract_strided_slice %411 {offsets = [1, 0, 0], sizes = [1, 16, 16], strides = [1, 1, 1]} : vector<4x16x16xf32> to vector<1x16x16xf32>
    %474 = vector.shape_cast %473 : vector<1x16x16xf32> to vector<16x16xf32>
    %475 = vector.broadcast %472 : f32 to vector<16x16xf32>
    %476 = arith.mulf %475, %474 : vector<16x16xf32>
    %477 = arith.addf %466, %476 : vector<16x16xf32>
    %c2_i32_185 = arith.constant 2 : i32
    %478 = arith.addi %0, %c2_i32_185 : i32
    %c27_i32_186 = arith.constant 27 : i32
    %479 = arith.muli %478, %c27_i32_186 : i32
    %c9_i32_187 = arith.constant 9 : i32
    %480 = arith.addi %479, %c9_i32_187 : i32
    %c1_i32_188 = arith.constant 1 : i32
    %481 = arith.addi %480, %c1_i32_188 : i32
    %482 = arith.index_cast %481 : i32 to index
    %483 = memref.load %arg3[%482] : memref<108xf32, #tpu.memory_space<smem>>
    %484 = vector.extract_strided_slice %411 {offsets = [2, 0, 0], sizes = [1, 16, 16], strides = [1, 1, 1]} : vector<4x16x16xf32> to vector<1x16x16xf32>
    %485 = vector.shape_cast %484 : vector<1x16x16xf32> to vector<16x16xf32>
    %486 = vector.broadcast %483 : f32 to vector<16x16xf32>
    %487 = arith.mulf %486, %485 : vector<16x16xf32>
    %488 = arith.addf %477, %487 : vector<16x16xf32>
    %c3_i32_189 = arith.constant 3 : i32
    %489 = arith.addi %0, %c3_i32_189 : i32
    %c27_i32_190 = arith.constant 27 : i32
    %490 = arith.muli %489, %c27_i32_190 : i32
    %c9_i32_191 = arith.constant 9 : i32
    %491 = arith.addi %490, %c9_i32_191 : i32
    %c1_i32_192 = arith.constant 1 : i32
    %492 = arith.addi %491, %c1_i32_192 : i32
    %493 = arith.index_cast %492 : i32 to index
    %494 = memref.load %arg3[%493] : memref<108xf32, #tpu.memory_space<smem>>
    %495 = vector.extract_strided_slice %411 {offsets = [3, 0, 0], sizes = [1, 16, 16], strides = [1, 1, 1]} : vector<4x16x16xf32> to vector<1x16x16xf32>
    %496 = vector.shape_cast %495 : vector<1x16x16xf32> to vector<16x16xf32>
    %497 = vector.broadcast %494 : f32 to vector<16x16xf32>
    %498 = arith.mulf %497, %496 : vector<16x16xf32>
    %499 = arith.addf %488, %498 : vector<16x16xf32>
    %c0_i32_193 = arith.constant 0 : i32
    %500 = arith.addi %0, %c0_i32_193 : i32
    %c27_i32_194 = arith.constant 27 : i32
    %501 = arith.muli %500, %c27_i32_194 : i32
    %c9_i32_195 = arith.constant 9 : i32
    %502 = arith.addi %501, %c9_i32_195 : i32
    %c2_i32_196 = arith.constant 2 : i32
    %503 = arith.addi %502, %c2_i32_196 : i32
    %504 = arith.index_cast %503 : i32 to index
    %505 = memref.load %arg3[%504] : memref<108xf32, #tpu.memory_space<smem>>
    %506 = vector.extract_strided_slice %411 {offsets = [0, 0, 0], sizes = [1, 16, 16], strides = [1, 1, 1]} : vector<4x16x16xf32> to vector<1x16x16xf32>
    %507 = vector.shape_cast %506 : vector<1x16x16xf32> to vector<16x16xf32>
    %508 = vector.broadcast %505 : f32 to vector<16x16xf32>
    %509 = arith.mulf %508, %507 : vector<16x16xf32>
    %510 = arith.addf %410, %509 : vector<16x16xf32>
    %c1_i32_197 = arith.constant 1 : i32
    %511 = arith.addi %0, %c1_i32_197 : i32
    %c27_i32_198 = arith.constant 27 : i32
    %512 = arith.muli %511, %c27_i32_198 : i32
    %c9_i32_199 = arith.constant 9 : i32
    %513 = arith.addi %512, %c9_i32_199 : i32
    %c2_i32_200 = arith.constant 2 : i32
    %514 = arith.addi %513, %c2_i32_200 : i32
    %515 = arith.index_cast %514 : i32 to index
    %516 = memref.load %arg3[%515] : memref<108xf32, #tpu.memory_space<smem>>
    %517 = vector.extract_strided_slice %411 {offsets = [1, 0, 0], sizes = [1, 16, 16], strides = [1, 1, 1]} : vector<4x16x16xf32> to vector<1x16x16xf32>
    %518 = vector.shape_cast %517 : vector<1x16x16xf32> to vector<16x16xf32>
    %519 = vector.broadcast %516 : f32 to vector<16x16xf32>
    %520 = arith.mulf %519, %518 : vector<16x16xf32>
    %521 = arith.addf %510, %520 : vector<16x16xf32>
    %c2_i32_201 = arith.constant 2 : i32
    %522 = arith.addi %0, %c2_i32_201 : i32
    %c27_i32_202 = arith.constant 27 : i32
    %523 = arith.muli %522, %c27_i32_202 : i32
    %c9_i32_203 = arith.constant 9 : i32
    %524 = arith.addi %523, %c9_i32_203 : i32
    %c2_i32_204 = arith.constant 2 : i32
    %525 = arith.addi %524, %c2_i32_204 : i32
    %526 = arith.index_cast %525 : i32 to index
    %527 = memref.load %arg3[%526] : memref<108xf32, #tpu.memory_space<smem>>
    %528 = vector.extract_strided_slice %411 {offsets = [2, 0, 0], sizes = [1, 16, 16], strides = [1, 1, 1]} : vector<4x16x16xf32> to vector<1x16x16xf32>
    %529 = vector.shape_cast %528 : vector<1x16x16xf32> to vector<16x16xf32>
    %530 = vector.broadcast %527 : f32 to vector<16x16xf32>
    %531 = arith.mulf %530, %529 : vector<16x16xf32>
    %532 = arith.addf %521, %531 : vector<16x16xf32>
    %c3_i32_205 = arith.constant 3 : i32
    %533 = arith.addi %0, %c3_i32_205 : i32
    %c27_i32_206 = arith.constant 27 : i32
    %534 = arith.muli %533, %c27_i32_206 : i32
    %c9_i32_207 = arith.constant 9 : i32
    %535 = arith.addi %534, %c9_i32_207 : i32
    %c2_i32_208 = arith.constant 2 : i32
    %536 = arith.addi %535, %c2_i32_208 : i32
    %537 = arith.index_cast %536 : i32 to index
    %538 = memref.load %arg3[%537] : memref<108xf32, #tpu.memory_space<smem>>
    %539 = vector.extract_strided_slice %411 {offsets = [3, 0, 0], sizes = [1, 16, 16], strides = [1, 1, 1]} : vector<4x16x16xf32> to vector<1x16x16xf32>
    %540 = vector.shape_cast %539 : vector<1x16x16xf32> to vector<16x16xf32>
    %541 = vector.broadcast %538 : f32 to vector<16x16xf32>
    %542 = arith.mulf %541, %540 : vector<16x16xf32>
    %543 = arith.addf %532, %542 : vector<16x16xf32>
    %c0_209 = arith.constant 0 : index
    %c1_210 = arith.constant 1 : index
    %c1_211 = arith.constant 1 : index
    %544 = vector.load %arg5[%c0_209, %c1_210, %c1_211] : memref<4x18x18xf32, #tpu.memory_space<vmem>>, vector<4x16x16xf32>
    %c0_i32_212 = arith.constant 0 : i32
    %545 = arith.addi %0, %c0_i32_212 : i32
    %c27_i32_213 = arith.constant 27 : i32
    %546 = arith.muli %545, %c27_i32_213 : i32
    %c12_i32 = arith.constant 12 : i32
    %547 = arith.addi %546, %c12_i32 : i32
    %c0_i32_214 = arith.constant 0 : i32
    %548 = arith.addi %547, %c0_i32_214 : i32
    %549 = arith.index_cast %548 : i32 to index
    %550 = memref.load %arg3[%549] : memref<108xf32, #tpu.memory_space<smem>>
    %551 = vector.extract_strided_slice %544 {offsets = [0, 0, 0], sizes = [1, 16, 16], strides = [1, 1, 1]} : vector<4x16x16xf32> to vector<1x16x16xf32>
    %552 = vector.shape_cast %551 : vector<1x16x16xf32> to vector<16x16xf32>
    %553 = vector.broadcast %550 : f32 to vector<16x16xf32>
    %554 = arith.mulf %553, %552 : vector<16x16xf32>
    %555 = arith.addf %455, %554 : vector<16x16xf32>
    %c1_i32_215 = arith.constant 1 : i32
    %556 = arith.addi %0, %c1_i32_215 : i32
    %c27_i32_216 = arith.constant 27 : i32
    %557 = arith.muli %556, %c27_i32_216 : i32
    %c12_i32_217 = arith.constant 12 : i32
    %558 = arith.addi %557, %c12_i32_217 : i32
    %c0_i32_218 = arith.constant 0 : i32
    %559 = arith.addi %558, %c0_i32_218 : i32
    %560 = arith.index_cast %559 : i32 to index
    %561 = memref.load %arg3[%560] : memref<108xf32, #tpu.memory_space<smem>>
    %562 = vector.extract_strided_slice %544 {offsets = [1, 0, 0], sizes = [1, 16, 16], strides = [1, 1, 1]} : vector<4x16x16xf32> to vector<1x16x16xf32>
    %563 = vector.shape_cast %562 : vector<1x16x16xf32> to vector<16x16xf32>
    %564 = vector.broadcast %561 : f32 to vector<16x16xf32>
    %565 = arith.mulf %564, %563 : vector<16x16xf32>
    %566 = arith.addf %555, %565 : vector<16x16xf32>
    %c2_i32_219 = arith.constant 2 : i32
    %567 = arith.addi %0, %c2_i32_219 : i32
    %c27_i32_220 = arith.constant 27 : i32
    %568 = arith.muli %567, %c27_i32_220 : i32
    %c12_i32_221 = arith.constant 12 : i32
    %569 = arith.addi %568, %c12_i32_221 : i32
    %c0_i32_222 = arith.constant 0 : i32
    %570 = arith.addi %569, %c0_i32_222 : i32
    %571 = arith.index_cast %570 : i32 to index
    %572 = memref.load %arg3[%571] : memref<108xf32, #tpu.memory_space<smem>>
    %573 = vector.extract_strided_slice %544 {offsets = [2, 0, 0], sizes = [1, 16, 16], strides = [1, 1, 1]} : vector<4x16x16xf32> to vector<1x16x16xf32>
    %574 = vector.shape_cast %573 : vector<1x16x16xf32> to vector<16x16xf32>
    %575 = vector.broadcast %572 : f32 to vector<16x16xf32>
    %576 = arith.mulf %575, %574 : vector<16x16xf32>
    %577 = arith.addf %566, %576 : vector<16x16xf32>
    %c3_i32_223 = arith.constant 3 : i32
    %578 = arith.addi %0, %c3_i32_223 : i32
    %c27_i32_224 = arith.constant 27 : i32
    %579 = arith.muli %578, %c27_i32_224 : i32
    %c12_i32_225 = arith.constant 12 : i32
    %580 = arith.addi %579, %c12_i32_225 : i32
    %c0_i32_226 = arith.constant 0 : i32
    %581 = arith.addi %580, %c0_i32_226 : i32
    %582 = arith.index_cast %581 : i32 to index
    %583 = memref.load %arg3[%582] : memref<108xf32, #tpu.memory_space<smem>>
    %584 = vector.extract_strided_slice %544 {offsets = [3, 0, 0], sizes = [1, 16, 16], strides = [1, 1, 1]} : vector<4x16x16xf32> to vector<1x16x16xf32>
    %585 = vector.shape_cast %584 : vector<1x16x16xf32> to vector<16x16xf32>
    %586 = vector.broadcast %583 : f32 to vector<16x16xf32>
    %587 = arith.mulf %586, %585 : vector<16x16xf32>
    %588 = arith.addf %577, %587 : vector<16x16xf32>
    %c0_i32_227 = arith.constant 0 : i32
    %589 = arith.addi %0, %c0_i32_227 : i32
    %c27_i32_228 = arith.constant 27 : i32
    %590 = arith.muli %589, %c27_i32_228 : i32
    %c12_i32_229 = arith.constant 12 : i32
    %591 = arith.addi %590, %c12_i32_229 : i32
    %c1_i32_230 = arith.constant 1 : i32
    %592 = arith.addi %591, %c1_i32_230 : i32
    %593 = arith.index_cast %592 : i32 to index
    %594 = memref.load %arg3[%593] : memref<108xf32, #tpu.memory_space<smem>>
    %595 = vector.extract_strided_slice %544 {offsets = [0, 0, 0], sizes = [1, 16, 16], strides = [1, 1, 1]} : vector<4x16x16xf32> to vector<1x16x16xf32>
    %596 = vector.shape_cast %595 : vector<1x16x16xf32> to vector<16x16xf32>
    %597 = vector.broadcast %594 : f32 to vector<16x16xf32>
    %598 = arith.mulf %597, %596 : vector<16x16xf32>
    %599 = arith.addf %499, %598 : vector<16x16xf32>
    %c1_i32_231 = arith.constant 1 : i32
    %600 = arith.addi %0, %c1_i32_231 : i32
    %c27_i32_232 = arith.constant 27 : i32
    %601 = arith.muli %600, %c27_i32_232 : i32
    %c12_i32_233 = arith.constant 12 : i32
    %602 = arith.addi %601, %c12_i32_233 : i32
    %c1_i32_234 = arith.constant 1 : i32
    %603 = arith.addi %602, %c1_i32_234 : i32
    %604 = arith.index_cast %603 : i32 to index
    %605 = memref.load %arg3[%604] : memref<108xf32, #tpu.memory_space<smem>>
    %606 = vector.extract_strided_slice %544 {offsets = [1, 0, 0], sizes = [1, 16, 16], strides = [1, 1, 1]} : vector<4x16x16xf32> to vector<1x16x16xf32>
    %607 = vector.shape_cast %606 : vector<1x16x16xf32> to vector<16x16xf32>
    %608 = vector.broadcast %605 : f32 to vector<16x16xf32>
    %609 = arith.mulf %608, %607 : vector<16x16xf32>
    %610 = arith.addf %599, %609 : vector<16x16xf32>
    %c2_i32_235 = arith.constant 2 : i32
    %611 = arith.addi %0, %c2_i32_235 : i32
    %c27_i32_236 = arith.constant 27 : i32
    %612 = arith.muli %611, %c27_i32_236 : i32
    %c12_i32_237 = arith.constant 12 : i32
    %613 = arith.addi %612, %c12_i32_237 : i32
    %c1_i32_238 = arith.constant 1 : i32
    %614 = arith.addi %613, %c1_i32_238 : i32
    %615 = arith.index_cast %614 : i32 to index
    %616 = memref.load %arg3[%615] : memref<108xf32, #tpu.memory_space<smem>>
    %617 = vector.extract_strided_slice %544 {offsets = [2, 0, 0], sizes = [1, 16, 16], strides = [1, 1, 1]} : vector<4x16x16xf32> to vector<1x16x16xf32>
    %618 = vector.shape_cast %617 : vector<1x16x16xf32> to vector<16x16xf32>
    %619 = vector.broadcast %616 : f32 to vector<16x16xf32>
    %620 = arith.mulf %619, %618 : vector<16x16xf32>
    %621 = arith.addf %610, %620 : vector<16x16xf32>
    %c3_i32_239 = arith.constant 3 : i32
    %622 = arith.addi %0, %c3_i32_239 : i32
    %c27_i32_240 = arith.constant 27 : i32
    %623 = arith.muli %622, %c27_i32_240 : i32
    %c12_i32_241 = arith.constant 12 : i32
    %624 = arith.addi %623, %c12_i32_241 : i32
    %c1_i32_242 = arith.constant 1 : i32
    %625 = arith.addi %624, %c1_i32_242 : i32
    %626 = arith.index_cast %625 : i32 to index
    %627 = memref.load %arg3[%626] : memref<108xf32, #tpu.memory_space<smem>>
    %628 = vector.extract_strided_slice %544 {offsets = [3, 0, 0], sizes = [1, 16, 16], strides = [1, 1, 1]} : vector<4x16x16xf32> to vector<1x16x16xf32>
    %629 = vector.shape_cast %628 : vector<1x16x16xf32> to vector<16x16xf32>
    %630 = vector.broadcast %627 : f32 to vector<16x16xf32>
    %631 = arith.mulf %630, %629 : vector<16x16xf32>
    %632 = arith.addf %621, %631 : vector<16x16xf32>
    %c0_i32_243 = arith.constant 0 : i32
    %633 = arith.addi %0, %c0_i32_243 : i32
    %c27_i32_244 = arith.constant 27 : i32
    %634 = arith.muli %633, %c27_i32_244 : i32
    %c12_i32_245 = arith.constant 12 : i32
    %635 = arith.addi %634, %c12_i32_245 : i32
    %c2_i32_246 = arith.constant 2 : i32
    %636 = arith.addi %635, %c2_i32_246 : i32
    %637 = arith.index_cast %636 : i32 to index
    %638 = memref.load %arg3[%637] : memref<108xf32, #tpu.memory_space<smem>>
    %639 = vector.extract_strided_slice %544 {offsets = [0, 0, 0], sizes = [1, 16, 16], strides = [1, 1, 1]} : vector<4x16x16xf32> to vector<1x16x16xf32>
    %640 = vector.shape_cast %639 : vector<1x16x16xf32> to vector<16x16xf32>
    %641 = vector.broadcast %638 : f32 to vector<16x16xf32>
    %642 = arith.mulf %641, %640 : vector<16x16xf32>
    %643 = arith.addf %543, %642 : vector<16x16xf32>
    %c1_i32_247 = arith.constant 1 : i32
    %644 = arith.addi %0, %c1_i32_247 : i32
    %c27_i32_248 = arith.constant 27 : i32
    %645 = arith.muli %644, %c27_i32_248 : i32
    %c12_i32_249 = arith.constant 12 : i32
    %646 = arith.addi %645, %c12_i32_249 : i32
    %c2_i32_250 = arith.constant 2 : i32
    %647 = arith.addi %646, %c2_i32_250 : i32
    %648 = arith.index_cast %647 : i32 to index
    %649 = memref.load %arg3[%648] : memref<108xf32, #tpu.memory_space<smem>>
    %650 = vector.extract_strided_slice %544 {offsets = [1, 0, 0], sizes = [1, 16, 16], strides = [1, 1, 1]} : vector<4x16x16xf32> to vector<1x16x16xf32>
    %651 = vector.shape_cast %650 : vector<1x16x16xf32> to vector<16x16xf32>
    %652 = vector.broadcast %649 : f32 to vector<16x16xf32>
    %653 = arith.mulf %652, %651 : vector<16x16xf32>
    %654 = arith.addf %643, %653 : vector<16x16xf32>
    %c2_i32_251 = arith.constant 2 : i32
    %655 = arith.addi %0, %c2_i32_251 : i32
    %c27_i32_252 = arith.constant 27 : i32
    %656 = arith.muli %655, %c27_i32_252 : i32
    %c12_i32_253 = arith.constant 12 : i32
    %657 = arith.addi %656, %c12_i32_253 : i32
    %c2_i32_254 = arith.constant 2 : i32
    %658 = arith.addi %657, %c2_i32_254 : i32
    %659 = arith.index_cast %658 : i32 to index
    %660 = memref.load %arg3[%659] : memref<108xf32, #tpu.memory_space<smem>>
    %661 = vector.extract_strided_slice %544 {offsets = [2, 0, 0], sizes = [1, 16, 16], strides = [1, 1, 1]} : vector<4x16x16xf32> to vector<1x16x16xf32>
    %662 = vector.shape_cast %661 : vector<1x16x16xf32> to vector<16x16xf32>
    %663 = vector.broadcast %660 : f32 to vector<16x16xf32>
    %664 = arith.mulf %663, %662 : vector<16x16xf32>
    %665 = arith.addf %654, %664 : vector<16x16xf32>
    %c3_i32_255 = arith.constant 3 : i32
    %666 = arith.addi %0, %c3_i32_255 : i32
    %c27_i32_256 = arith.constant 27 : i32
    %667 = arith.muli %666, %c27_i32_256 : i32
    %c12_i32_257 = arith.constant 12 : i32
    %668 = arith.addi %667, %c12_i32_257 : i32
    %c2_i32_258 = arith.constant 2 : i32
    %669 = arith.addi %668, %c2_i32_258 : i32
    %670 = arith.index_cast %669 : i32 to index
    %671 = memref.load %arg3[%670] : memref<108xf32, #tpu.memory_space<smem>>
    %672 = vector.extract_strided_slice %544 {offsets = [3, 0, 0], sizes = [1, 16, 16], strides = [1, 1, 1]} : vector<4x16x16xf32> to vector<1x16x16xf32>
    %673 = vector.shape_cast %672 : vector<1x16x16xf32> to vector<16x16xf32>
    %674 = vector.broadcast %671 : f32 to vector<16x16xf32>
    %675 = arith.mulf %674, %673 : vector<16x16xf32>
    %676 = arith.addf %665, %675 : vector<16x16xf32>
    %c0_259 = arith.constant 0 : index
    %c1_260 = arith.constant 1 : index
    %c2_261 = arith.constant 2 : index
    %677 = vector.load %arg5[%c0_259, %c1_260, %c2_261] : memref<4x18x18xf32, #tpu.memory_space<vmem>>, vector<4x16x16xf32>
    %c0_i32_262 = arith.constant 0 : i32
    %678 = arith.addi %0, %c0_i32_262 : i32
    %c27_i32_263 = arith.constant 27 : i32
    %679 = arith.muli %678, %c27_i32_263 : i32
    %c15_i32 = arith.constant 15 : i32
    %680 = arith.addi %679, %c15_i32 : i32
    %c0_i32_264 = arith.constant 0 : i32
    %681 = arith.addi %680, %c0_i32_264 : i32
    %682 = arith.index_cast %681 : i32 to index
    %683 = memref.load %arg3[%682] : memref<108xf32, #tpu.memory_space<smem>>
    %684 = vector.extract_strided_slice %677 {offsets = [0, 0, 0], sizes = [1, 16, 16], strides = [1, 1, 1]} : vector<4x16x16xf32> to vector<1x16x16xf32>
    %685 = vector.shape_cast %684 : vector<1x16x16xf32> to vector<16x16xf32>
    %686 = vector.broadcast %683 : f32 to vector<16x16xf32>
    %687 = arith.mulf %686, %685 : vector<16x16xf32>
    %688 = arith.addf %588, %687 : vector<16x16xf32>
    %c1_i32_265 = arith.constant 1 : i32
    %689 = arith.addi %0, %c1_i32_265 : i32
    %c27_i32_266 = arith.constant 27 : i32
    %690 = arith.muli %689, %c27_i32_266 : i32
    %c15_i32_267 = arith.constant 15 : i32
    %691 = arith.addi %690, %c15_i32_267 : i32
    %c0_i32_268 = arith.constant 0 : i32
    %692 = arith.addi %691, %c0_i32_268 : i32
    %693 = arith.index_cast %692 : i32 to index
    %694 = memref.load %arg3[%693] : memref<108xf32, #tpu.memory_space<smem>>
    %695 = vector.extract_strided_slice %677 {offsets = [1, 0, 0], sizes = [1, 16, 16], strides = [1, 1, 1]} : vector<4x16x16xf32> to vector<1x16x16xf32>
    %696 = vector.shape_cast %695 : vector<1x16x16xf32> to vector<16x16xf32>
    %697 = vector.broadcast %694 : f32 to vector<16x16xf32>
    %698 = arith.mulf %697, %696 : vector<16x16xf32>
    %699 = arith.addf %688, %698 : vector<16x16xf32>
    %c2_i32_269 = arith.constant 2 : i32
    %700 = arith.addi %0, %c2_i32_269 : i32
    %c27_i32_270 = arith.constant 27 : i32
    %701 = arith.muli %700, %c27_i32_270 : i32
    %c15_i32_271 = arith.constant 15 : i32
    %702 = arith.addi %701, %c15_i32_271 : i32
    %c0_i32_272 = arith.constant 0 : i32
    %703 = arith.addi %702, %c0_i32_272 : i32
    %704 = arith.index_cast %703 : i32 to index
    %705 = memref.load %arg3[%704] : memref<108xf32, #tpu.memory_space<smem>>
    %706 = vector.extract_strided_slice %677 {offsets = [2, 0, 0], sizes = [1, 16, 16], strides = [1, 1, 1]} : vector<4x16x16xf32> to vector<1x16x16xf32>
    %707 = vector.shape_cast %706 : vector<1x16x16xf32> to vector<16x16xf32>
    %708 = vector.broadcast %705 : f32 to vector<16x16xf32>
    %709 = arith.mulf %708, %707 : vector<16x16xf32>
    %710 = arith.addf %699, %709 : vector<16x16xf32>
    %c3_i32_273 = arith.constant 3 : i32
    %711 = arith.addi %0, %c3_i32_273 : i32
    %c27_i32_274 = arith.constant 27 : i32
    %712 = arith.muli %711, %c27_i32_274 : i32
    %c15_i32_275 = arith.constant 15 : i32
    %713 = arith.addi %712, %c15_i32_275 : i32
    %c0_i32_276 = arith.constant 0 : i32
    %714 = arith.addi %713, %c0_i32_276 : i32
    %715 = arith.index_cast %714 : i32 to index
    %716 = memref.load %arg3[%715] : memref<108xf32, #tpu.memory_space<smem>>
    %717 = vector.extract_strided_slice %677 {offsets = [3, 0, 0], sizes = [1, 16, 16], strides = [1, 1, 1]} : vector<4x16x16xf32> to vector<1x16x16xf32>
    %718 = vector.shape_cast %717 : vector<1x16x16xf32> to vector<16x16xf32>
    %719 = vector.broadcast %716 : f32 to vector<16x16xf32>
    %720 = arith.mulf %719, %718 : vector<16x16xf32>
    %721 = arith.addf %710, %720 : vector<16x16xf32>
    %c0_i32_277 = arith.constant 0 : i32
    %722 = arith.addi %0, %c0_i32_277 : i32
    %c27_i32_278 = arith.constant 27 : i32
    %723 = arith.muli %722, %c27_i32_278 : i32
    %c15_i32_279 = arith.constant 15 : i32
    %724 = arith.addi %723, %c15_i32_279 : i32
    %c1_i32_280 = arith.constant 1 : i32
    %725 = arith.addi %724, %c1_i32_280 : i32
    %726 = arith.index_cast %725 : i32 to index
    %727 = memref.load %arg3[%726] : memref<108xf32, #tpu.memory_space<smem>>
    %728 = vector.extract_strided_slice %677 {offsets = [0, 0, 0], sizes = [1, 16, 16], strides = [1, 1, 1]} : vector<4x16x16xf32> to vector<1x16x16xf32>
    %729 = vector.shape_cast %728 : vector<1x16x16xf32> to vector<16x16xf32>
    %730 = vector.broadcast %727 : f32 to vector<16x16xf32>
    %731 = arith.mulf %730, %729 : vector<16x16xf32>
    %732 = arith.addf %632, %731 : vector<16x16xf32>
    %c1_i32_281 = arith.constant 1 : i32
    %733 = arith.addi %0, %c1_i32_281 : i32
    %c27_i32_282 = arith.constant 27 : i32
    %734 = arith.muli %733, %c27_i32_282 : i32
    %c15_i32_283 = arith.constant 15 : i32
    %735 = arith.addi %734, %c15_i32_283 : i32
    %c1_i32_284 = arith.constant 1 : i32
    %736 = arith.addi %735, %c1_i32_284 : i32
    %737 = arith.index_cast %736 : i32 to index
    %738 = memref.load %arg3[%737] : memref<108xf32, #tpu.memory_space<smem>>
    %739 = vector.extract_strided_slice %677 {offsets = [1, 0, 0], sizes = [1, 16, 16], strides = [1, 1, 1]} : vector<4x16x16xf32> to vector<1x16x16xf32>
    %740 = vector.shape_cast %739 : vector<1x16x16xf32> to vector<16x16xf32>
    %741 = vector.broadcast %738 : f32 to vector<16x16xf32>
    %742 = arith.mulf %741, %740 : vector<16x16xf32>
    %743 = arith.addf %732, %742 : vector<16x16xf32>
    %c2_i32_285 = arith.constant 2 : i32
    %744 = arith.addi %0, %c2_i32_285 : i32
    %c27_i32_286 = arith.constant 27 : i32
    %745 = arith.muli %744, %c27_i32_286 : i32
    %c15_i32_287 = arith.constant 15 : i32
    %746 = arith.addi %745, %c15_i32_287 : i32
    %c1_i32_288 = arith.constant 1 : i32
    %747 = arith.addi %746, %c1_i32_288 : i32
    %748 = arith.index_cast %747 : i32 to index
    %749 = memref.load %arg3[%748] : memref<108xf32, #tpu.memory_space<smem>>
    %750 = vector.extract_strided_slice %677 {offsets = [2, 0, 0], sizes = [1, 16, 16], strides = [1, 1, 1]} : vector<4x16x16xf32> to vector<1x16x16xf32>
    %751 = vector.shape_cast %750 : vector<1x16x16xf32> to vector<16x16xf32>
    %752 = vector.broadcast %749 : f32 to vector<16x16xf32>
    %753 = arith.mulf %752, %751 : vector<16x16xf32>
    %754 = arith.addf %743, %753 : vector<16x16xf32>
    %c3_i32_289 = arith.constant 3 : i32
    %755 = arith.addi %0, %c3_i32_289 : i32
    %c27_i32_290 = arith.constant 27 : i32
    %756 = arith.muli %755, %c27_i32_290 : i32
    %c15_i32_291 = arith.constant 15 : i32
    %757 = arith.addi %756, %c15_i32_291 : i32
    %c1_i32_292 = arith.constant 1 : i32
    %758 = arith.addi %757, %c1_i32_292 : i32
    %759 = arith.index_cast %758 : i32 to index
    %760 = memref.load %arg3[%759] : memref<108xf32, #tpu.memory_space<smem>>
    %761 = vector.extract_strided_slice %677 {offsets = [3, 0, 0], sizes = [1, 16, 16], strides = [1, 1, 1]} : vector<4x16x16xf32> to vector<1x16x16xf32>
    %762 = vector.shape_cast %761 : vector<1x16x16xf32> to vector<16x16xf32>
    %763 = vector.broadcast %760 : f32 to vector<16x16xf32>
    %764 = arith.mulf %763, %762 : vector<16x16xf32>
    %765 = arith.addf %754, %764 : vector<16x16xf32>
    %c0_i32_293 = arith.constant 0 : i32
    %766 = arith.addi %0, %c0_i32_293 : i32
    %c27_i32_294 = arith.constant 27 : i32
    %767 = arith.muli %766, %c27_i32_294 : i32
    %c15_i32_295 = arith.constant 15 : i32
    %768 = arith.addi %767, %c15_i32_295 : i32
    %c2_i32_296 = arith.constant 2 : i32
    %769 = arith.addi %768, %c2_i32_296 : i32
    %770 = arith.index_cast %769 : i32 to index
    %771 = memref.load %arg3[%770] : memref<108xf32, #tpu.memory_space<smem>>
    %772 = vector.extract_strided_slice %677 {offsets = [0, 0, 0], sizes = [1, 16, 16], strides = [1, 1, 1]} : vector<4x16x16xf32> to vector<1x16x16xf32>
    %773 = vector.shape_cast %772 : vector<1x16x16xf32> to vector<16x16xf32>
    %774 = vector.broadcast %771 : f32 to vector<16x16xf32>
    %775 = arith.mulf %774, %773 : vector<16x16xf32>
    %776 = arith.addf %676, %775 : vector<16x16xf32>
    %c1_i32_297 = arith.constant 1 : i32
    %777 = arith.addi %0, %c1_i32_297 : i32
    %c27_i32_298 = arith.constant 27 : i32
    %778 = arith.muli %777, %c27_i32_298 : i32
    %c15_i32_299 = arith.constant 15 : i32
    %779 = arith.addi %778, %c15_i32_299 : i32
    %c2_i32_300 = arith.constant 2 : i32
    %780 = arith.addi %779, %c2_i32_300 : i32
    %781 = arith.index_cast %780 : i32 to index
    %782 = memref.load %arg3[%781] : memref<108xf32, #tpu.memory_space<smem>>
    %783 = vector.extract_strided_slice %677 {offsets = [1, 0, 0], sizes = [1, 16, 16], strides = [1, 1, 1]} : vector<4x16x16xf32> to vector<1x16x16xf32>
    %784 = vector.shape_cast %783 : vector<1x16x16xf32> to vector<16x16xf32>
    %785 = vector.broadcast %782 : f32 to vector<16x16xf32>
    %786 = arith.mulf %785, %784 : vector<16x16xf32>
    %787 = arith.addf %776, %786 : vector<16x16xf32>
    %c2_i32_301 = arith.constant 2 : i32
    %788 = arith.addi %0, %c2_i32_301 : i32
    %c27_i32_302 = arith.constant 27 : i32
    %789 = arith.muli %788, %c27_i32_302 : i32
    %c15_i32_303 = arith.constant 15 : i32
    %790 = arith.addi %789, %c15_i32_303 : i32
    %c2_i32_304 = arith.constant 2 : i32
    %791 = arith.addi %790, %c2_i32_304 : i32
    %792 = arith.index_cast %791 : i32 to index
    %793 = memref.load %arg3[%792] : memref<108xf32, #tpu.memory_space<smem>>
    %794 = vector.extract_strided_slice %677 {offsets = [2, 0, 0], sizes = [1, 16, 16], strides = [1, 1, 1]} : vector<4x16x16xf32> to vector<1x16x16xf32>
    %795 = vector.shape_cast %794 : vector<1x16x16xf32> to vector<16x16xf32>
    %796 = vector.broadcast %793 : f32 to vector<16x16xf32>
    %797 = arith.mulf %796, %795 : vector<16x16xf32>
    %798 = arith.addf %787, %797 : vector<16x16xf32>
    %c3_i32_305 = arith.constant 3 : i32
    %799 = arith.addi %0, %c3_i32_305 : i32
    %c27_i32_306 = arith.constant 27 : i32
    %800 = arith.muli %799, %c27_i32_306 : i32
    %c15_i32_307 = arith.constant 15 : i32
    %801 = arith.addi %800, %c15_i32_307 : i32
    %c2_i32_308 = arith.constant 2 : i32
    %802 = arith.addi %801, %c2_i32_308 : i32
    %803 = arith.index_cast %802 : i32 to index
    %804 = memref.load %arg3[%803] : memref<108xf32, #tpu.memory_space<smem>>
    %805 = vector.extract_strided_slice %677 {offsets = [3, 0, 0], sizes = [1, 16, 16], strides = [1, 1, 1]} : vector<4x16x16xf32> to vector<1x16x16xf32>
    %806 = vector.shape_cast %805 : vector<1x16x16xf32> to vector<16x16xf32>
    %807 = vector.broadcast %804 : f32 to vector<16x16xf32>
    %808 = arith.mulf %807, %806 : vector<16x16xf32>
    %809 = arith.addf %798, %808 : vector<16x16xf32>
    %c0_309 = arith.constant 0 : index
    %c2_310 = arith.constant 2 : index
    %c0_311 = arith.constant 0 : index
    %810 = vector.load %arg5[%c0_309, %c2_310, %c0_311] : memref<4x18x18xf32, #tpu.memory_space<vmem>>, vector<4x16x16xf32>
    %c0_i32_312 = arith.constant 0 : i32
    %811 = arith.addi %0, %c0_i32_312 : i32
    %c27_i32_313 = arith.constant 27 : i32
    %812 = arith.muli %811, %c27_i32_313 : i32
    %c18_i32 = arith.constant 18 : i32
    %813 = arith.addi %812, %c18_i32 : i32
    %c0_i32_314 = arith.constant 0 : i32
    %814 = arith.addi %813, %c0_i32_314 : i32
    %815 = arith.index_cast %814 : i32 to index
    %816 = memref.load %arg3[%815] : memref<108xf32, #tpu.memory_space<smem>>
    %817 = vector.extract_strided_slice %810 {offsets = [0, 0, 0], sizes = [1, 16, 16], strides = [1, 1, 1]} : vector<4x16x16xf32> to vector<1x16x16xf32>
    %818 = vector.shape_cast %817 : vector<1x16x16xf32> to vector<16x16xf32>
    %819 = vector.broadcast %816 : f32 to vector<16x16xf32>
    %820 = arith.mulf %819, %818 : vector<16x16xf32>
    %821 = arith.addf %721, %820 : vector<16x16xf32>
    %c1_i32_315 = arith.constant 1 : i32
    %822 = arith.addi %0, %c1_i32_315 : i32
    %c27_i32_316 = arith.constant 27 : i32
    %823 = arith.muli %822, %c27_i32_316 : i32
    %c18_i32_317 = arith.constant 18 : i32
    %824 = arith.addi %823, %c18_i32_317 : i32
    %c0_i32_318 = arith.constant 0 : i32
    %825 = arith.addi %824, %c0_i32_318 : i32
    %826 = arith.index_cast %825 : i32 to index
    %827 = memref.load %arg3[%826] : memref<108xf32, #tpu.memory_space<smem>>
    %828 = vector.extract_strided_slice %810 {offsets = [1, 0, 0], sizes = [1, 16, 16], strides = [1, 1, 1]} : vector<4x16x16xf32> to vector<1x16x16xf32>
    %829 = vector.shape_cast %828 : vector<1x16x16xf32> to vector<16x16xf32>
    %830 = vector.broadcast %827 : f32 to vector<16x16xf32>
    %831 = arith.mulf %830, %829 : vector<16x16xf32>
    %832 = arith.addf %821, %831 : vector<16x16xf32>
    %c2_i32_319 = arith.constant 2 : i32
    %833 = arith.addi %0, %c2_i32_319 : i32
    %c27_i32_320 = arith.constant 27 : i32
    %834 = arith.muli %833, %c27_i32_320 : i32
    %c18_i32_321 = arith.constant 18 : i32
    %835 = arith.addi %834, %c18_i32_321 : i32
    %c0_i32_322 = arith.constant 0 : i32
    %836 = arith.addi %835, %c0_i32_322 : i32
    %837 = arith.index_cast %836 : i32 to index
    %838 = memref.load %arg3[%837] : memref<108xf32, #tpu.memory_space<smem>>
    %839 = vector.extract_strided_slice %810 {offsets = [2, 0, 0], sizes = [1, 16, 16], strides = [1, 1, 1]} : vector<4x16x16xf32> to vector<1x16x16xf32>
    %840 = vector.shape_cast %839 : vector<1x16x16xf32> to vector<16x16xf32>
    %841 = vector.broadcast %838 : f32 to vector<16x16xf32>
    %842 = arith.mulf %841, %840 : vector<16x16xf32>
    %843 = arith.addf %832, %842 : vector<16x16xf32>
    %c3_i32_323 = arith.constant 3 : i32
    %844 = arith.addi %0, %c3_i32_323 : i32
    %c27_i32_324 = arith.constant 27 : i32
    %845 = arith.muli %844, %c27_i32_324 : i32
    %c18_i32_325 = arith.constant 18 : i32
    %846 = arith.addi %845, %c18_i32_325 : i32
    %c0_i32_326 = arith.constant 0 : i32
    %847 = arith.addi %846, %c0_i32_326 : i32
    %848 = arith.index_cast %847 : i32 to index
    %849 = memref.load %arg3[%848] : memref<108xf32, #tpu.memory_space<smem>>
    %850 = vector.extract_strided_slice %810 {offsets = [3, 0, 0], sizes = [1, 16, 16], strides = [1, 1, 1]} : vector<4x16x16xf32> to vector<1x16x16xf32>
    %851 = vector.shape_cast %850 : vector<1x16x16xf32> to vector<16x16xf32>
    %852 = vector.broadcast %849 : f32 to vector<16x16xf32>
    %853 = arith.mulf %852, %851 : vector<16x16xf32>
    %854 = arith.addf %843, %853 : vector<16x16xf32>
    %c0_i32_327 = arith.constant 0 : i32
    %855 = arith.addi %0, %c0_i32_327 : i32
    %c27_i32_328 = arith.constant 27 : i32
    %856 = arith.muli %855, %c27_i32_328 : i32
    %c18_i32_329 = arith.constant 18 : i32
    %857 = arith.addi %856, %c18_i32_329 : i32
    %c1_i32_330 = arith.constant 1 : i32
    %858 = arith.addi %857, %c1_i32_330 : i32
    %859 = arith.index_cast %858 : i32 to index
    %860 = memref.load %arg3[%859] : memref<108xf32, #tpu.memory_space<smem>>
    %861 = vector.extract_strided_slice %810 {offsets = [0, 0, 0], sizes = [1, 16, 16], strides = [1, 1, 1]} : vector<4x16x16xf32> to vector<1x16x16xf32>
    %862 = vector.shape_cast %861 : vector<1x16x16xf32> to vector<16x16xf32>
    %863 = vector.broadcast %860 : f32 to vector<16x16xf32>
    %864 = arith.mulf %863, %862 : vector<16x16xf32>
    %865 = arith.addf %765, %864 : vector<16x16xf32>
    %c1_i32_331 = arith.constant 1 : i32
    %866 = arith.addi %0, %c1_i32_331 : i32
    %c27_i32_332 = arith.constant 27 : i32
    %867 = arith.muli %866, %c27_i32_332 : i32
    %c18_i32_333 = arith.constant 18 : i32
    %868 = arith.addi %867, %c18_i32_333 : i32
    %c1_i32_334 = arith.constant 1 : i32
    %869 = arith.addi %868, %c1_i32_334 : i32
    %870 = arith.index_cast %869 : i32 to index
    %871 = memref.load %arg3[%870] : memref<108xf32, #tpu.memory_space<smem>>
    %872 = vector.extract_strided_slice %810 {offsets = [1, 0, 0], sizes = [1, 16, 16], strides = [1, 1, 1]} : vector<4x16x16xf32> to vector<1x16x16xf32>
    %873 = vector.shape_cast %872 : vector<1x16x16xf32> to vector<16x16xf32>
    %874 = vector.broadcast %871 : f32 to vector<16x16xf32>
    %875 = arith.mulf %874, %873 : vector<16x16xf32>
    %876 = arith.addf %865, %875 : vector<16x16xf32>
    %c2_i32_335 = arith.constant 2 : i32
    %877 = arith.addi %0, %c2_i32_335 : i32
    %c27_i32_336 = arith.constant 27 : i32
    %878 = arith.muli %877, %c27_i32_336 : i32
    %c18_i32_337 = arith.constant 18 : i32
    %879 = arith.addi %878, %c18_i32_337 : i32
    %c1_i32_338 = arith.constant 1 : i32
    %880 = arith.addi %879, %c1_i32_338 : i32
    %881 = arith.index_cast %880 : i32 to index
    %882 = memref.load %arg3[%881] : memref<108xf32, #tpu.memory_space<smem>>
    %883 = vector.extract_strided_slice %810 {offsets = [2, 0, 0], sizes = [1, 16, 16], strides = [1, 1, 1]} : vector<4x16x16xf32> to vector<1x16x16xf32>
    %884 = vector.shape_cast %883 : vector<1x16x16xf32> to vector<16x16xf32>
    %885 = vector.broadcast %882 : f32 to vector<16x16xf32>
    %886 = arith.mulf %885, %884 : vector<16x16xf32>
    %887 = arith.addf %876, %886 : vector<16x16xf32>
    %c3_i32_339 = arith.constant 3 : i32
    %888 = arith.addi %0, %c3_i32_339 : i32
    %c27_i32_340 = arith.constant 27 : i32
    %889 = arith.muli %888, %c27_i32_340 : i32
    %c18_i32_341 = arith.constant 18 : i32
    %890 = arith.addi %889, %c18_i32_341 : i32
    %c1_i32_342 = arith.constant 1 : i32
    %891 = arith.addi %890, %c1_i32_342 : i32
    %892 = arith.index_cast %891 : i32 to index
    %893 = memref.load %arg3[%892] : memref<108xf32, #tpu.memory_space<smem>>
    %894 = vector.extract_strided_slice %810 {offsets = [3, 0, 0], sizes = [1, 16, 16], strides = [1, 1, 1]} : vector<4x16x16xf32> to vector<1x16x16xf32>
    %895 = vector.shape_cast %894 : vector<1x16x16xf32> to vector<16x16xf32>
    %896 = vector.broadcast %893 : f32 to vector<16x16xf32>
    %897 = arith.mulf %896, %895 : vector<16x16xf32>
    %898 = arith.addf %887, %897 : vector<16x16xf32>
    %c0_i32_343 = arith.constant 0 : i32
    %899 = arith.addi %0, %c0_i32_343 : i32
    %c27_i32_344 = arith.constant 27 : i32
    %900 = arith.muli %899, %c27_i32_344 : i32
    %c18_i32_345 = arith.constant 18 : i32
    %901 = arith.addi %900, %c18_i32_345 : i32
    %c2_i32_346 = arith.constant 2 : i32
    %902 = arith.addi %901, %c2_i32_346 : i32
    %903 = arith.index_cast %902 : i32 to index
    %904 = memref.load %arg3[%903] : memref<108xf32, #tpu.memory_space<smem>>
    %905 = vector.extract_strided_slice %810 {offsets = [0, 0, 0], sizes = [1, 16, 16], strides = [1, 1, 1]} : vector<4x16x16xf32> to vector<1x16x16xf32>
    %906 = vector.shape_cast %905 : vector<1x16x16xf32> to vector<16x16xf32>
    %907 = vector.broadcast %904 : f32 to vector<16x16xf32>
    %908 = arith.mulf %907, %906 : vector<16x16xf32>
    %909 = arith.addf %809, %908 : vector<16x16xf32>
    %c1_i32_347 = arith.constant 1 : i32
    %910 = arith.addi %0, %c1_i32_347 : i32
    %c27_i32_348 = arith.constant 27 : i32
    %911 = arith.muli %910, %c27_i32_348 : i32
    %c18_i32_349 = arith.constant 18 : i32
    %912 = arith.addi %911, %c18_i32_349 : i32
    %c2_i32_350 = arith.constant 2 : i32
    %913 = arith.addi %912, %c2_i32_350 : i32
    %914 = arith.index_cast %913 : i32 to index
    %915 = memref.load %arg3[%914] : memref<108xf32, #tpu.memory_space<smem>>
    %916 = vector.extract_strided_slice %810 {offsets = [1, 0, 0], sizes = [1, 16, 16], strides = [1, 1, 1]} : vector<4x16x16xf32> to vector<1x16x16xf32>
    %917 = vector.shape_cast %916 : vector<1x16x16xf32> to vector<16x16xf32>
    %918 = vector.broadcast %915 : f32 to vector<16x16xf32>
    %919 = arith.mulf %918, %917 : vector<16x16xf32>
    %920 = arith.addf %909, %919 : vector<16x16xf32>
    %c2_i32_351 = arith.constant 2 : i32
    %921 = arith.addi %0, %c2_i32_351 : i32
    %c27_i32_352 = arith.constant 27 : i32
    %922 = arith.muli %921, %c27_i32_352 : i32
    %c18_i32_353 = arith.constant 18 : i32
    %923 = arith.addi %922, %c18_i32_353 : i32
    %c2_i32_354 = arith.constant 2 : i32
    %924 = arith.addi %923, %c2_i32_354 : i32
    %925 = arith.index_cast %924 : i32 to index
    %926 = memref.load %arg3[%925] : memref<108xf32, #tpu.memory_space<smem>>
    %927 = vector.extract_strided_slice %810 {offsets = [2, 0, 0], sizes = [1, 16, 16], strides = [1, 1, 1]} : vector<4x16x16xf32> to vector<1x16x16xf32>
    %928 = vector.shape_cast %927 : vector<1x16x16xf32> to vector<16x16xf32>
    %929 = vector.broadcast %926 : f32 to vector<16x16xf32>
    %930 = arith.mulf %929, %928 : vector<16x16xf32>
    %931 = arith.addf %920, %930 : vector<16x16xf32>
    %c3_i32_355 = arith.constant 3 : i32
    %932 = arith.addi %0, %c3_i32_355 : i32
    %c27_i32_356 = arith.constant 27 : i32
    %933 = arith.muli %932, %c27_i32_356 : i32
    %c18_i32_357 = arith.constant 18 : i32
    %934 = arith.addi %933, %c18_i32_357 : i32
    %c2_i32_358 = arith.constant 2 : i32
    %935 = arith.addi %934, %c2_i32_358 : i32
    %936 = arith.index_cast %935 : i32 to index
    %937 = memref.load %arg3[%936] : memref<108xf32, #tpu.memory_space<smem>>
    %938 = vector.extract_strided_slice %810 {offsets = [3, 0, 0], sizes = [1, 16, 16], strides = [1, 1, 1]} : vector<4x16x16xf32> to vector<1x16x16xf32>
    %939 = vector.shape_cast %938 : vector<1x16x16xf32> to vector<16x16xf32>
    %940 = vector.broadcast %937 : f32 to vector<16x16xf32>
    %941 = arith.mulf %940, %939 : vector<16x16xf32>
    %942 = arith.addf %931, %941 : vector<16x16xf32>
    %c0_359 = arith.constant 0 : index
    %c2_360 = arith.constant 2 : index
    %c1_361 = arith.constant 1 : index
    %943 = vector.load %arg5[%c0_359, %c2_360, %c1_361] : memref<4x18x18xf32, #tpu.memory_space<vmem>>, vector<4x16x16xf32>
    %c0_i32_362 = arith.constant 0 : i32
    %944 = arith.addi %0, %c0_i32_362 : i32
    %c27_i32_363 = arith.constant 27 : i32
    %945 = arith.muli %944, %c27_i32_363 : i32
    %c21_i32 = arith.constant 21 : i32
    %946 = arith.addi %945, %c21_i32 : i32
    %c0_i32_364 = arith.constant 0 : i32
    %947 = arith.addi %946, %c0_i32_364 : i32
    %948 = arith.index_cast %947 : i32 to index
    %949 = memref.load %arg3[%948] : memref<108xf32, #tpu.memory_space<smem>>
    %950 = vector.extract_strided_slice %943 {offsets = [0, 0, 0], sizes = [1, 16, 16], strides = [1, 1, 1]} : vector<4x16x16xf32> to vector<1x16x16xf32>
    %951 = vector.shape_cast %950 : vector<1x16x16xf32> to vector<16x16xf32>
    %952 = vector.broadcast %949 : f32 to vector<16x16xf32>
    %953 = arith.mulf %952, %951 : vector<16x16xf32>
    %954 = arith.addf %854, %953 : vector<16x16xf32>
    %c1_i32_365 = arith.constant 1 : i32
    %955 = arith.addi %0, %c1_i32_365 : i32
    %c27_i32_366 = arith.constant 27 : i32
    %956 = arith.muli %955, %c27_i32_366 : i32
    %c21_i32_367 = arith.constant 21 : i32
    %957 = arith.addi %956, %c21_i32_367 : i32
    %c0_i32_368 = arith.constant 0 : i32
    %958 = arith.addi %957, %c0_i32_368 : i32
    %959 = arith.index_cast %958 : i32 to index
    %960 = memref.load %arg3[%959] : memref<108xf32, #tpu.memory_space<smem>>
    %961 = vector.extract_strided_slice %943 {offsets = [1, 0, 0], sizes = [1, 16, 16], strides = [1, 1, 1]} : vector<4x16x16xf32> to vector<1x16x16xf32>
    %962 = vector.shape_cast %961 : vector<1x16x16xf32> to vector<16x16xf32>
    %963 = vector.broadcast %960 : f32 to vector<16x16xf32>
    %964 = arith.mulf %963, %962 : vector<16x16xf32>
    %965 = arith.addf %954, %964 : vector<16x16xf32>
    %c2_i32_369 = arith.constant 2 : i32
    %966 = arith.addi %0, %c2_i32_369 : i32
    %c27_i32_370 = arith.constant 27 : i32
    %967 = arith.muli %966, %c27_i32_370 : i32
    %c21_i32_371 = arith.constant 21 : i32
    %968 = arith.addi %967, %c21_i32_371 : i32
    %c0_i32_372 = arith.constant 0 : i32
    %969 = arith.addi %968, %c0_i32_372 : i32
    %970 = arith.index_cast %969 : i32 to index
    %971 = memref.load %arg3[%970] : memref<108xf32, #tpu.memory_space<smem>>
    %972 = vector.extract_strided_slice %943 {offsets = [2, 0, 0], sizes = [1, 16, 16], strides = [1, 1, 1]} : vector<4x16x16xf32> to vector<1x16x16xf32>
    %973 = vector.shape_cast %972 : vector<1x16x16xf32> to vector<16x16xf32>
    %974 = vector.broadcast %971 : f32 to vector<16x16xf32>
    %975 = arith.mulf %974, %973 : vector<16x16xf32>
    %976 = arith.addf %965, %975 : vector<16x16xf32>
    %c3_i32_373 = arith.constant 3 : i32
    %977 = arith.addi %0, %c3_i32_373 : i32
    %c27_i32_374 = arith.constant 27 : i32
    %978 = arith.muli %977, %c27_i32_374 : i32
    %c21_i32_375 = arith.constant 21 : i32
    %979 = arith.addi %978, %c21_i32_375 : i32
    %c0_i32_376 = arith.constant 0 : i32
    %980 = arith.addi %979, %c0_i32_376 : i32
    %981 = arith.index_cast %980 : i32 to index
    %982 = memref.load %arg3[%981] : memref<108xf32, #tpu.memory_space<smem>>
    %983 = vector.extract_strided_slice %943 {offsets = [3, 0, 0], sizes = [1, 16, 16], strides = [1, 1, 1]} : vector<4x16x16xf32> to vector<1x16x16xf32>
    %984 = vector.shape_cast %983 : vector<1x16x16xf32> to vector<16x16xf32>
    %985 = vector.broadcast %982 : f32 to vector<16x16xf32>
    %986 = arith.mulf %985, %984 : vector<16x16xf32>
    %987 = arith.addf %976, %986 : vector<16x16xf32>
    %c0_i32_377 = arith.constant 0 : i32
    %988 = arith.addi %0, %c0_i32_377 : i32
    %c27_i32_378 = arith.constant 27 : i32
    %989 = arith.muli %988, %c27_i32_378 : i32
    %c21_i32_379 = arith.constant 21 : i32
    %990 = arith.addi %989, %c21_i32_379 : i32
    %c1_i32_380 = arith.constant 1 : i32
    %991 = arith.addi %990, %c1_i32_380 : i32
    %992 = arith.index_cast %991 : i32 to index
    %993 = memref.load %arg3[%992] : memref<108xf32, #tpu.memory_space<smem>>
    %994 = vector.extract_strided_slice %943 {offsets = [0, 0, 0], sizes = [1, 16, 16], strides = [1, 1, 1]} : vector<4x16x16xf32> to vector<1x16x16xf32>
    %995 = vector.shape_cast %994 : vector<1x16x16xf32> to vector<16x16xf32>
    %996 = vector.broadcast %993 : f32 to vector<16x16xf32>
    %997 = arith.mulf %996, %995 : vector<16x16xf32>
    %998 = arith.addf %898, %997 : vector<16x16xf32>
    %c1_i32_381 = arith.constant 1 : i32
    %999 = arith.addi %0, %c1_i32_381 : i32
    %c27_i32_382 = arith.constant 27 : i32
    %1000 = arith.muli %999, %c27_i32_382 : i32
    %c21_i32_383 = arith.constant 21 : i32
    %1001 = arith.addi %1000, %c21_i32_383 : i32
    %c1_i32_384 = arith.constant 1 : i32
    %1002 = arith.addi %1001, %c1_i32_384 : i32
    %1003 = arith.index_cast %1002 : i32 to index
    %1004 = memref.load %arg3[%1003] : memref<108xf32, #tpu.memory_space<smem>>
    %1005 = vector.extract_strided_slice %943 {offsets = [1, 0, 0], sizes = [1, 16, 16], strides = [1, 1, 1]} : vector<4x16x16xf32> to vector<1x16x16xf32>
    %1006 = vector.shape_cast %1005 : vector<1x16x16xf32> to vector<16x16xf32>
    %1007 = vector.broadcast %1004 : f32 to vector<16x16xf32>
    %1008 = arith.mulf %1007, %1006 : vector<16x16xf32>
    %1009 = arith.addf %998, %1008 : vector<16x16xf32>
    %c2_i32_385 = arith.constant 2 : i32
    %1010 = arith.addi %0, %c2_i32_385 : i32
    %c27_i32_386 = arith.constant 27 : i32
    %1011 = arith.muli %1010, %c27_i32_386 : i32
    %c21_i32_387 = arith.constant 21 : i32
    %1012 = arith.addi %1011, %c21_i32_387 : i32
    %c1_i32_388 = arith.constant 1 : i32
    %1013 = arith.addi %1012, %c1_i32_388 : i32
    %1014 = arith.index_cast %1013 : i32 to index
    %1015 = memref.load %arg3[%1014] : memref<108xf32, #tpu.memory_space<smem>>
    %1016 = vector.extract_strided_slice %943 {offsets = [2, 0, 0], sizes = [1, 16, 16], strides = [1, 1, 1]} : vector<4x16x16xf32> to vector<1x16x16xf32>
    %1017 = vector.shape_cast %1016 : vector<1x16x16xf32> to vector<16x16xf32>
    %1018 = vector.broadcast %1015 : f32 to vector<16x16xf32>
    %1019 = arith.mulf %1018, %1017 : vector<16x16xf32>
    %1020 = arith.addf %1009, %1019 : vector<16x16xf32>
    %c3_i32_389 = arith.constant 3 : i32
    %1021 = arith.addi %0, %c3_i32_389 : i32
    %c27_i32_390 = arith.constant 27 : i32
    %1022 = arith.muli %1021, %c27_i32_390 : i32
    %c21_i32_391 = arith.constant 21 : i32
    %1023 = arith.addi %1022, %c21_i32_391 : i32
    %c1_i32_392 = arith.constant 1 : i32
    %1024 = arith.addi %1023, %c1_i32_392 : i32
    %1025 = arith.index_cast %1024 : i32 to index
    %1026 = memref.load %arg3[%1025] : memref<108xf32, #tpu.memory_space<smem>>
    %1027 = vector.extract_strided_slice %943 {offsets = [3, 0, 0], sizes = [1, 16, 16], strides = [1, 1, 1]} : vector<4x16x16xf32> to vector<1x16x16xf32>
    %1028 = vector.shape_cast %1027 : vector<1x16x16xf32> to vector<16x16xf32>
    %1029 = vector.broadcast %1026 : f32 to vector<16x16xf32>
    %1030 = arith.mulf %1029, %1028 : vector<16x16xf32>
    %1031 = arith.addf %1020, %1030 : vector<16x16xf32>
    %c0_i32_393 = arith.constant 0 : i32
    %1032 = arith.addi %0, %c0_i32_393 : i32
    %c27_i32_394 = arith.constant 27 : i32
    %1033 = arith.muli %1032, %c27_i32_394 : i32
    %c21_i32_395 = arith.constant 21 : i32
    %1034 = arith.addi %1033, %c21_i32_395 : i32
    %c2_i32_396 = arith.constant 2 : i32
    %1035 = arith.addi %1034, %c2_i32_396 : i32
    %1036 = arith.index_cast %1035 : i32 to index
    %1037 = memref.load %arg3[%1036] : memref<108xf32, #tpu.memory_space<smem>>
    %1038 = vector.extract_strided_slice %943 {offsets = [0, 0, 0], sizes = [1, 16, 16], strides = [1, 1, 1]} : vector<4x16x16xf32> to vector<1x16x16xf32>
    %1039 = vector.shape_cast %1038 : vector<1x16x16xf32> to vector<16x16xf32>
    %1040 = vector.broadcast %1037 : f32 to vector<16x16xf32>
    %1041 = arith.mulf %1040, %1039 : vector<16x16xf32>
    %1042 = arith.addf %942, %1041 : vector<16x16xf32>
    %c1_i32_397 = arith.constant 1 : i32
    %1043 = arith.addi %0, %c1_i32_397 : i32
    %c27_i32_398 = arith.constant 27 : i32
    %1044 = arith.muli %1043, %c27_i32_398 : i32
    %c21_i32_399 = arith.constant 21 : i32
    %1045 = arith.addi %1044, %c21_i32_399 : i32
    %c2_i32_400 = arith.constant 2 : i32
    %1046 = arith.addi %1045, %c2_i32_400 : i32
    %1047 = arith.index_cast %1046 : i32 to index
    %1048 = memref.load %arg3[%1047] : memref<108xf32, #tpu.memory_space<smem>>
    %1049 = vector.extract_strided_slice %943 {offsets = [1, 0, 0], sizes = [1, 16, 16], strides = [1, 1, 1]} : vector<4x16x16xf32> to vector<1x16x16xf32>
    %1050 = vector.shape_cast %1049 : vector<1x16x16xf32> to vector<16x16xf32>
    %1051 = vector.broadcast %1048 : f32 to vector<16x16xf32>
    %1052 = arith.mulf %1051, %1050 : vector<16x16xf32>
    %1053 = arith.addf %1042, %1052 : vector<16x16xf32>
    %c2_i32_401 = arith.constant 2 : i32
    %1054 = arith.addi %0, %c2_i32_401 : i32
    %c27_i32_402 = arith.constant 27 : i32
    %1055 = arith.muli %1054, %c27_i32_402 : i32
    %c21_i32_403 = arith.constant 21 : i32
    %1056 = arith.addi %1055, %c21_i32_403 : i32
    %c2_i32_404 = arith.constant 2 : i32
    %1057 = arith.addi %1056, %c2_i32_404 : i32
    %1058 = arith.index_cast %1057 : i32 to index
    %1059 = memref.load %arg3[%1058] : memref<108xf32, #tpu.memory_space<smem>>
    %1060 = vector.extract_strided_slice %943 {offsets = [2, 0, 0], sizes = [1, 16, 16], strides = [1, 1, 1]} : vector<4x16x16xf32> to vector<1x16x16xf32>
    %1061 = vector.shape_cast %1060 : vector<1x16x16xf32> to vector<16x16xf32>
    %1062 = vector.broadcast %1059 : f32 to vector<16x16xf32>
    %1063 = arith.mulf %1062, %1061 : vector<16x16xf32>
    %1064 = arith.addf %1053, %1063 : vector<16x16xf32>
    %c3_i32_405 = arith.constant 3 : i32
    %1065 = arith.addi %0, %c3_i32_405 : i32
    %c27_i32_406 = arith.constant 27 : i32
    %1066 = arith.muli %1065, %c27_i32_406 : i32
    %c21_i32_407 = arith.constant 21 : i32
    %1067 = arith.addi %1066, %c21_i32_407 : i32
    %c2_i32_408 = arith.constant 2 : i32
    %1068 = arith.addi %1067, %c2_i32_408 : i32
    %1069 = arith.index_cast %1068 : i32 to index
    %1070 = memref.load %arg3[%1069] : memref<108xf32, #tpu.memory_space<smem>>
    %1071 = vector.extract_strided_slice %943 {offsets = [3, 0, 0], sizes = [1, 16, 16], strides = [1, 1, 1]} : vector<4x16x16xf32> to vector<1x16x16xf32>
    %1072 = vector.shape_cast %1071 : vector<1x16x16xf32> to vector<16x16xf32>
    %1073 = vector.broadcast %1070 : f32 to vector<16x16xf32>
    %1074 = arith.mulf %1073, %1072 : vector<16x16xf32>
    %1075 = arith.addf %1064, %1074 : vector<16x16xf32>
    %c0_409 = arith.constant 0 : index
    %c2_410 = arith.constant 2 : index
    %c2_411 = arith.constant 2 : index
    %1076 = vector.load %arg5[%c0_409, %c2_410, %c2_411] : memref<4x18x18xf32, #tpu.memory_space<vmem>>, vector<4x16x16xf32>
    %c0_i32_412 = arith.constant 0 : i32
    %1077 = arith.addi %0, %c0_i32_412 : i32
    %c27_i32_413 = arith.constant 27 : i32
    %1078 = arith.muli %1077, %c27_i32_413 : i32
    %c24_i32 = arith.constant 24 : i32
    %1079 = arith.addi %1078, %c24_i32 : i32
    %c0_i32_414 = arith.constant 0 : i32
    %1080 = arith.addi %1079, %c0_i32_414 : i32
    %1081 = arith.index_cast %1080 : i32 to index
    %1082 = memref.load %arg3[%1081] : memref<108xf32, #tpu.memory_space<smem>>
    %1083 = vector.extract_strided_slice %1076 {offsets = [0, 0, 0], sizes = [1, 16, 16], strides = [1, 1, 1]} : vector<4x16x16xf32> to vector<1x16x16xf32>
    %1084 = vector.shape_cast %1083 : vector<1x16x16xf32> to vector<16x16xf32>
    %1085 = vector.broadcast %1082 : f32 to vector<16x16xf32>
    %1086 = arith.mulf %1085, %1084 : vector<16x16xf32>
    %1087 = arith.addf %987, %1086 : vector<16x16xf32>
    %c1_i32_415 = arith.constant 1 : i32
    %1088 = arith.addi %0, %c1_i32_415 : i32
    %c27_i32_416 = arith.constant 27 : i32
    %1089 = arith.muli %1088, %c27_i32_416 : i32
    %c24_i32_417 = arith.constant 24 : i32
    %1090 = arith.addi %1089, %c24_i32_417 : i32
    %c0_i32_418 = arith.constant 0 : i32
    %1091 = arith.addi %1090, %c0_i32_418 : i32
    %1092 = arith.index_cast %1091 : i32 to index
    %1093 = memref.load %arg3[%1092] : memref<108xf32, #tpu.memory_space<smem>>
    %1094 = vector.extract_strided_slice %1076 {offsets = [1, 0, 0], sizes = [1, 16, 16], strides = [1, 1, 1]} : vector<4x16x16xf32> to vector<1x16x16xf32>
    %1095 = vector.shape_cast %1094 : vector<1x16x16xf32> to vector<16x16xf32>
    %1096 = vector.broadcast %1093 : f32 to vector<16x16xf32>
    %1097 = arith.mulf %1096, %1095 : vector<16x16xf32>
    %1098 = arith.addf %1087, %1097 : vector<16x16xf32>
    %c2_i32_419 = arith.constant 2 : i32
    %1099 = arith.addi %0, %c2_i32_419 : i32
    %c27_i32_420 = arith.constant 27 : i32
    %1100 = arith.muli %1099, %c27_i32_420 : i32
    %c24_i32_421 = arith.constant 24 : i32
    %1101 = arith.addi %1100, %c24_i32_421 : i32
    %c0_i32_422 = arith.constant 0 : i32
    %1102 = arith.addi %1101, %c0_i32_422 : i32
    %1103 = arith.index_cast %1102 : i32 to index
    %1104 = memref.load %arg3[%1103] : memref<108xf32, #tpu.memory_space<smem>>
    %1105 = vector.extract_strided_slice %1076 {offsets = [2, 0, 0], sizes = [1, 16, 16], strides = [1, 1, 1]} : vector<4x16x16xf32> to vector<1x16x16xf32>
    %1106 = vector.shape_cast %1105 : vector<1x16x16xf32> to vector<16x16xf32>
    %1107 = vector.broadcast %1104 : f32 to vector<16x16xf32>
    %1108 = arith.mulf %1107, %1106 : vector<16x16xf32>
    %1109 = arith.addf %1098, %1108 : vector<16x16xf32>
    %c3_i32_423 = arith.constant 3 : i32
    %1110 = arith.addi %0, %c3_i32_423 : i32
    %c27_i32_424 = arith.constant 27 : i32
    %1111 = arith.muli %1110, %c27_i32_424 : i32
    %c24_i32_425 = arith.constant 24 : i32
    %1112 = arith.addi %1111, %c24_i32_425 : i32
    %c0_i32_426 = arith.constant 0 : i32
    %1113 = arith.addi %1112, %c0_i32_426 : i32
    %1114 = arith.index_cast %1113 : i32 to index
    %1115 = memref.load %arg3[%1114] : memref<108xf32, #tpu.memory_space<smem>>
    %1116 = vector.extract_strided_slice %1076 {offsets = [3, 0, 0], sizes = [1, 16, 16], strides = [1, 1, 1]} : vector<4x16x16xf32> to vector<1x16x16xf32>
    %1117 = vector.shape_cast %1116 : vector<1x16x16xf32> to vector<16x16xf32>
    %1118 = vector.broadcast %1115 : f32 to vector<16x16xf32>
    %1119 = arith.mulf %1118, %1117 : vector<16x16xf32>
    %1120 = arith.addf %1109, %1119 : vector<16x16xf32>
    %c0_i32_427 = arith.constant 0 : i32
    %1121 = arith.addi %0, %c0_i32_427 : i32
    %c27_i32_428 = arith.constant 27 : i32
    %1122 = arith.muli %1121, %c27_i32_428 : i32
    %c24_i32_429 = arith.constant 24 : i32
    %1123 = arith.addi %1122, %c24_i32_429 : i32
    %c1_i32_430 = arith.constant 1 : i32
    %1124 = arith.addi %1123, %c1_i32_430 : i32
    %1125 = arith.index_cast %1124 : i32 to index
    %1126 = memref.load %arg3[%1125] : memref<108xf32, #tpu.memory_space<smem>>
    %1127 = vector.extract_strided_slice %1076 {offsets = [0, 0, 0], sizes = [1, 16, 16], strides = [1, 1, 1]} : vector<4x16x16xf32> to vector<1x16x16xf32>
    %1128 = vector.shape_cast %1127 : vector<1x16x16xf32> to vector<16x16xf32>
    %1129 = vector.broadcast %1126 : f32 to vector<16x16xf32>
    %1130 = arith.mulf %1129, %1128 : vector<16x16xf32>
    %1131 = arith.addf %1031, %1130 : vector<16x16xf32>
    %c1_i32_431 = arith.constant 1 : i32
    %1132 = arith.addi %0, %c1_i32_431 : i32
    %c27_i32_432 = arith.constant 27 : i32
    %1133 = arith.muli %1132, %c27_i32_432 : i32
    %c24_i32_433 = arith.constant 24 : i32
    %1134 = arith.addi %1133, %c24_i32_433 : i32
    %c1_i32_434 = arith.constant 1 : i32
    %1135 = arith.addi %1134, %c1_i32_434 : i32
    %1136 = arith.index_cast %1135 : i32 to index
    %1137 = memref.load %arg3[%1136] : memref<108xf32, #tpu.memory_space<smem>>
    %1138 = vector.extract_strided_slice %1076 {offsets = [1, 0, 0], sizes = [1, 16, 16], strides = [1, 1, 1]} : vector<4x16x16xf32> to vector<1x16x16xf32>
    %1139 = vector.shape_cast %1138 : vector<1x16x16xf32> to vector<16x16xf32>
    %1140 = vector.broadcast %1137 : f32 to vector<16x16xf32>
    %1141 = arith.mulf %1140, %1139 : vector<16x16xf32>
    %1142 = arith.addf %1131, %1141 : vector<16x16xf32>
    %c2_i32_435 = arith.constant 2 : i32
    %1143 = arith.addi %0, %c2_i32_435 : i32
    %c27_i32_436 = arith.constant 27 : i32
    %1144 = arith.muli %1143, %c27_i32_436 : i32
    %c24_i32_437 = arith.constant 24 : i32
    %1145 = arith.addi %1144, %c24_i32_437 : i32
    %c1_i32_438 = arith.constant 1 : i32
    %1146 = arith.addi %1145, %c1_i32_438 : i32
    %1147 = arith.index_cast %1146 : i32 to index
    %1148 = memref.load %arg3[%1147] : memref<108xf32, #tpu.memory_space<smem>>
    %1149 = vector.extract_strided_slice %1076 {offsets = [2, 0, 0], sizes = [1, 16, 16], strides = [1, 1, 1]} : vector<4x16x16xf32> to vector<1x16x16xf32>
    %1150 = vector.shape_cast %1149 : vector<1x16x16xf32> to vector<16x16xf32>
    %1151 = vector.broadcast %1148 : f32 to vector<16x16xf32>
    %1152 = arith.mulf %1151, %1150 : vector<16x16xf32>
    %1153 = arith.addf %1142, %1152 : vector<16x16xf32>
    %c3_i32_439 = arith.constant 3 : i32
    %1154 = arith.addi %0, %c3_i32_439 : i32
    %c27_i32_440 = arith.constant 27 : i32
    %1155 = arith.muli %1154, %c27_i32_440 : i32
    %c24_i32_441 = arith.constant 24 : i32
    %1156 = arith.addi %1155, %c24_i32_441 : i32
    %c1_i32_442 = arith.constant 1 : i32
    %1157 = arith.addi %1156, %c1_i32_442 : i32
    %1158 = arith.index_cast %1157 : i32 to index
    %1159 = memref.load %arg3[%1158] : memref<108xf32, #tpu.memory_space<smem>>
    %1160 = vector.extract_strided_slice %1076 {offsets = [3, 0, 0], sizes = [1, 16, 16], strides = [1, 1, 1]} : vector<4x16x16xf32> to vector<1x16x16xf32>
    %1161 = vector.shape_cast %1160 : vector<1x16x16xf32> to vector<16x16xf32>
    %1162 = vector.broadcast %1159 : f32 to vector<16x16xf32>
    %1163 = arith.mulf %1162, %1161 : vector<16x16xf32>
    %1164 = arith.addf %1153, %1163 : vector<16x16xf32>
    %c0_i32_443 = arith.constant 0 : i32
    %1165 = arith.addi %0, %c0_i32_443 : i32
    %c27_i32_444 = arith.constant 27 : i32
    %1166 = arith.muli %1165, %c27_i32_444 : i32
    %c24_i32_445 = arith.constant 24 : i32
    %1167 = arith.addi %1166, %c24_i32_445 : i32
    %c2_i32_446 = arith.constant 2 : i32
    %1168 = arith.addi %1167, %c2_i32_446 : i32
    %1169 = arith.index_cast %1168 : i32 to index
    %1170 = memref.load %arg3[%1169] : memref<108xf32, #tpu.memory_space<smem>>
    %1171 = vector.extract_strided_slice %1076 {offsets = [0, 0, 0], sizes = [1, 16, 16], strides = [1, 1, 1]} : vector<4x16x16xf32> to vector<1x16x16xf32>
    %1172 = vector.shape_cast %1171 : vector<1x16x16xf32> to vector<16x16xf32>
    %1173 = vector.broadcast %1170 : f32 to vector<16x16xf32>
    %1174 = arith.mulf %1173, %1172 : vector<16x16xf32>
    %1175 = arith.addf %1075, %1174 : vector<16x16xf32>
    %c1_i32_447 = arith.constant 1 : i32
    %1176 = arith.addi %0, %c1_i32_447 : i32
    %c27_i32_448 = arith.constant 27 : i32
    %1177 = arith.muli %1176, %c27_i32_448 : i32
    %c24_i32_449 = arith.constant 24 : i32
    %1178 = arith.addi %1177, %c24_i32_449 : i32
    %c2_i32_450 = arith.constant 2 : i32
    %1179 = arith.addi %1178, %c2_i32_450 : i32
    %1180 = arith.index_cast %1179 : i32 to index
    %1181 = memref.load %arg3[%1180] : memref<108xf32, #tpu.memory_space<smem>>
    %1182 = vector.extract_strided_slice %1076 {offsets = [1, 0, 0], sizes = [1, 16, 16], strides = [1, 1, 1]} : vector<4x16x16xf32> to vector<1x16x16xf32>
    %1183 = vector.shape_cast %1182 : vector<1x16x16xf32> to vector<16x16xf32>
    %1184 = vector.broadcast %1181 : f32 to vector<16x16xf32>
    %1185 = arith.mulf %1184, %1183 : vector<16x16xf32>
    %1186 = arith.addf %1175, %1185 : vector<16x16xf32>
    %c2_i32_451 = arith.constant 2 : i32
    %1187 = arith.addi %0, %c2_i32_451 : i32
    %c27_i32_452 = arith.constant 27 : i32
    %1188 = arith.muli %1187, %c27_i32_452 : i32
    %c24_i32_453 = arith.constant 24 : i32
    %1189 = arith.addi %1188, %c24_i32_453 : i32
    %c2_i32_454 = arith.constant 2 : i32
    %1190 = arith.addi %1189, %c2_i32_454 : i32
    %1191 = arith.index_cast %1190 : i32 to index
    %1192 = memref.load %arg3[%1191] : memref<108xf32, #tpu.memory_space<smem>>
    %1193 = vector.extract_strided_slice %1076 {offsets = [2, 0, 0], sizes = [1, 16, 16], strides = [1, 1, 1]} : vector<4x16x16xf32> to vector<1x16x16xf32>
    %1194 = vector.shape_cast %1193 : vector<1x16x16xf32> to vector<16x16xf32>
    %1195 = vector.broadcast %1192 : f32 to vector<16x16xf32>
    %1196 = arith.mulf %1195, %1194 : vector<16x16xf32>
    %1197 = arith.addf %1186, %1196 : vector<16x16xf32>
    %c3_i32_455 = arith.constant 3 : i32
    %1198 = arith.addi %0, %c3_i32_455 : i32
    %c27_i32_456 = arith.constant 27 : i32
    %1199 = arith.muli %1198, %c27_i32_456 : i32
    %c24_i32_457 = arith.constant 24 : i32
    %1200 = arith.addi %1199, %c24_i32_457 : i32
    %c2_i32_458 = arith.constant 2 : i32
    %1201 = arith.addi %1200, %c2_i32_458 : i32
    %1202 = arith.index_cast %1201 : i32 to index
    %1203 = memref.load %arg3[%1202] : memref<108xf32, #tpu.memory_space<smem>>
    %1204 = vector.extract_strided_slice %1076 {offsets = [3, 0, 0], sizes = [1, 16, 16], strides = [1, 1, 1]} : vector<4x16x16xf32> to vector<1x16x16xf32>
    %1205 = vector.shape_cast %1204 : vector<1x16x16xf32> to vector<16x16xf32>
    %1206 = vector.broadcast %1203 : f32 to vector<16x16xf32>
    %1207 = arith.mulf %1206, %1205 : vector<16x16xf32>
    %1208 = arith.addf %1197, %1207 : vector<16x16xf32>
    %c0_459 = arith.constant 0 : index
    %c0_460 = arith.constant 0 : index
    %c0_461 = arith.constant 0 : index
    %1209 = vector.load %arg6[%c0_459, %c0_460, %c0_461] : memref<3x16x16xf32, #tpu.memory_space<vmem>>, vector<1x16x16xf32>
    %1210 = vector.shape_cast %1209 : vector<1x16x16xf32> to vector<16x16xf32>
    %1211 = arith.addf %1210, %1120 : vector<16x16xf32>
    %c0_462 = arith.constant 0 : index
    %c0_463 = arith.constant 0 : index
    %c0_464 = arith.constant 0 : index
    %1212 = vector.load %arg6[%c0_462, %c0_463, %c0_464] : memref<3x16x16xf32, #tpu.memory_space<vmem>>, vector<1x16x16xf32>
    %1213 = vector.shape_cast %1212 : vector<1x16x16xf32> to vector<16x16xf32>
    %1214 = vector.shape_cast %1211 : vector<16x16xf32> to vector<1x16x16xf32>
    tpu.vector_store %arg6[%c0_462, %c0_463, %c0_464], %1214 {strides = array<i32>} : memref<3x16x16xf32, #tpu.memory_space<vmem>>, vector<1x16x16xf32>,
    %c1_465 = arith.constant 1 : index
    %c0_466 = arith.constant 0 : index
    %c0_467 = arith.constant 0 : index
    %1215 = vector.load %arg6[%c1_465, %c0_466, %c0_467] : memref<3x16x16xf32, #tpu.memory_space<vmem>>, vector<1x16x16xf32>
    %1216 = vector.shape_cast %1215 : vector<1x16x16xf32> to vector<16x16xf32>
    %1217 = arith.addf %1216, %1164 : vector<16x16xf32>
    %c1_468 = arith.constant 1 : index
    %c0_469 = arith.constant 0 : index
    %c0_470 = arith.constant 0 : index
    %1218 = vector.load %arg6[%c1_468, %c0_469, %c0_470] : memref<3x16x16xf32, #tpu.memory_space<vmem>>, vector<1x16x16xf32>
    %1219 = vector.shape_cast %1218 : vector<1x16x16xf32> to vector<16x16xf32>
    %1220 = vector.shape_cast %1217 : vector<16x16xf32> to vector<1x16x16xf32>
    tpu.vector_store %arg6[%c1_468, %c0_469, %c0_470], %1220 {strides = array<i32>} : memref<3x16x16xf32, #tpu.memory_space<vmem>>, vector<1x16x16xf32>,
    %c2_471 = arith.constant 2 : index
    %c0_472 = arith.constant 0 : index
    %c0_473 = arith.constant 0 : index
    %1221 = vector.load %arg6[%c2_471, %c0_472, %c0_473] : memref<3x16x16xf32, #tpu.memory_space<vmem>>, vector<1x16x16xf32>
    %1222 = vector.shape_cast %1221 : vector<1x16x16xf32> to vector<16x16xf32>
    %1223 = arith.addf %1222, %1208 : vector<16x16xf32>
    %c2_474 = arith.constant 2 : index
    %c0_475 = arith.constant 0 : index
    %c0_476 = arith.constant 0 : index
    %1224 = vector.load %arg6[%c2_474, %c0_475, %c0_476] : memref<3x16x16xf32, #tpu.memory_space<vmem>>, vector<1x16x16xf32>
    %1225 = vector.shape_cast %1224 : vector<1x16x16xf32> to vector<16x16xf32>
    %1226 = vector.shape_cast %1223 : vector<16x16xf32> to vector<1x16x16xf32>
    tpu.vector_store %arg6[%c2_474, %c0_475, %c0_476], %1226 {strides = array<i32>} : memref<3x16x16xf32, #tpu.memory_space<vmem>>, vector<1x16x16xf32>,
    %c0_i32_477 = arith.constant 0 : i32
    %1227 = arith.cmpi eq, %arg1, %c0_i32_477 : i32
    %1228 = arith.extui %1227 : i1 to i32
    %c0_i32_478 = arith.constant 0 : i32
    %1229 = arith.cmpi ne, %1228, %c0_i32_478 : i32
    scf.if %1229 {
      %c0_479 = arith.constant 0 : index
      %c0_480 = arith.constant 0 : index
      %c0_481 = arith.constant 0 : index
      %1230 = vector.load %arg6[%c0_479, %c0_480, %c0_481] : memref<3x16x16xf32, #tpu.memory_space<vmem>>, vector<3x16x16xf32>
      %1231 = vector.shape_cast %1230 : vector<3x16x16xf32> to vector<1x3x256xf32>
      %c0_482 = arith.constant 0 : index
      %c0_483 = arith.constant 0 : index
      %c0_484 = arith.constant 0 : index
      %1232 = vector.load %arg4[%c0_482, %c0_483, %c0_484] : memref<1x3x256xf32, #tpu.memory_space<vmem>>, vector<1x3x256xf32>
      tpu.vector_store %arg4[%c0_482, %c0_483, %c0_484], %1231 {strides = array<i32>} : memref<1x3x256xf32, #tpu.memory_space<vmem>>, vector<1x3x256xf32>,
    } else {
    }
    return
  }
  func.func @transform_0(%arg0: i32, %arg1: i32) -> (i32, i32, i32, i32) {
    %c0_i32 = arith.constant 0 : i32
    %c0_i32_0 = arith.constant 0 : i32
    %c0_i32_1 = arith.constant 0 : i32
    return %arg0, %arg1, %c0_i32, %c0_i32_0 : i32, i32, i32, i32
  }
  func.func @transform_1(%arg0: i32, %arg1: i32) -> i32 {
    %c0_i32 = arith.constant 0 : i32
    %c0_i32_0 = arith.constant 0 : i32
    return %c0_i32 : i32
  }
  func.func @transform_2(%arg0: i32, %arg1: i32) -> (i32, i32, i32) {
    %c0_i32 = arith.constant 0 : i32
    %c0_i32_0 = arith.constant 0 : i32
    %c0_i32_1 = arith.constant 0 : i32
    return %arg0, %c0_i32, %c0_i32_0 : i32, i32, i32
  }
}

</mosaic_0001>

<bundles_post_ra>
// kernel: outconv_forward.1
= control target key start
LH: loop header
LB: loop body
LE: loop exit
PB: predicated region body
PF: predicated region fallthrough
CT: control target
= control target key end

     0   :  { %7 = vsyncpa [#allocation5], 0  ;;  %s2195_s9 = smov 0   ;;  %s2197_s10 = smov 0   ;;  %s3087_s0 = inlined_call_operand.vmem [shape: f32[2,4,16,16], index: 0, kind: input, shape index: {}]   ;;  %s3088_s1 = inlined_call_operand.vmem [shape: f32[108], index: 1, kind: input, shape index: {}]   ;;  %s3089_s2 = inlined_call_operand.vmem [shape: f32[2,3,256], index: 2, kind: output, shape index: {}]  }
   0x1   :  { %s2199_s11 = smov 0  }
   0x2 LB: > { %s1953_s12 = sadd.s32 4294967295, %s2164_s11   ;;  %s25_s13 = sadd.s32 1, %s2160_s10  ;;  %s2164_s11 = sphi %s2199_s11, %s13_s11   ;;  %s2160_s10 = sphi %s2197_s10, %s3093_s10   ;;  %s2156_s9 = sphi %s2195_s9, %s3092_s9  }
   0x3   : > { %p27_p0 = scmp.ge.s32.totalorder %s25_s13, 2  ;;  %p1955_p1 = scmp.ge.s32.totalorder %s2164_s11, 1 }
   0x4   : > { %p105_p2 = scmp.lt.s32.totalorder %s2164_s11, 3  ;;  %p2220_p4 = scmp.eq.s32.totalorder %s1953_s12, 0 }
   0x5   : > { %s3095_s13 = smov (%p27_p0, %s25_s13), 0  ;;  %s118_s18 = sshll.u32 %s3088_s1, 4  ;;  %s119_s18 = int_to_ptr.vmem [resolvable:$true] %s118_s18 }
   0x6   : > { %p2216_p3 = pnand %p1955_p1, %p105_p2  ;;  %s2123_s19 = scalar_lea.vmem %s119_s18, 16 }
   0x7   : > { %p2124_p7 = scmp.ne.s32.totalorder %s119_s18, %s2123_s19  ;;  %p2131_p11 = scmp.lt.s32.totalorder %s119_s18, %s119_s18 }
   0x8   : > { %p2079_p5 = pneg %p2216_p3  ;;  %p2132_p12 = scmp.lt.s32.totalorder %s2123_s19, %s2123_s19 }
   0xa   : > { %p2080_p6 = pnand %p2220_p4, %p2079_p5  ;;  %p2133_p13 = por %p2132_p12, %p2131_p11 }
   0xc   : > { %p2125_p8 = pneg %p2080_p6 }
   0xe   : > { %p2126_p9 = pnand %p2125_p8, %p2124_p7 }
  0x10   : > { %p2127_p10 = pneg %p2126_p9 }
  0x12   : > { %p2134_p0 = pnand %p2133_p13, %p2127_p10 }
  0x14   : > { %2137 = shalt.err (!%p2134_p0)
}
  0x15   : > { %s2166_s20 = smov [#allocation4]   ;;  %145 = sbr.rel (%p2216_p3) target bundleno = 726 (0x2d6), region = 28 }
  0x16   : > { %2082 = dma.vmem_to_smem (!%p2080_p6), %s119_s18, 16, %s2166_s20, [#allocation5]  }
  0x1c   : > { %2151 = dma.done.wait (%p2220_p4), [#allocation5], 16  }
  0x1d   : > { %2153 = vsyncadd (%p2220_p4), [#allocation5], 4294967280 }
  0x1e   : > { %151 = sfence }
  0x1f   : > { %p174_p1 = scmp.lt.s32.totalorder %s2156_s9, 1  ;;  %vm201_vm0 = vcmask 146432   ;;  %vm204_vm1 = vcmask 140288   ;;  %v2167_v0 = vmov 0.0   ;;  %s2168_s25 = smov 1   ;;  %vm255_vm2 = vcmask 138248  }
  0x20   : > { %206 = vst.msk [vmem:[#allocation2 + $0x18] sm:$0xff] %vm201_vm0, %v2167_v0  ;;  %207 = vst.msk [vmem:[#allocation2 + $0x20] sm:$0xff] %vm201_vm0, %v2167_v0  ;;  %s2259_s26 = sld [smem:[#allocation4 + $0x3]]  ;;  %s2261_s27 = sld [smem:[#allocation4 + $0x1e]]  ;;  %vm194_vm3 = vcmask 130048   ;;  %vm1844_vm4 = vcmask 261120  }
  0x21   : > { %202 = vst.msk [vmem:[#allocation2] sm:$0xff] %vm201_vm0, %v2167_v0  ;;  %203 = vst.msk [vmem:[#allocation2 + $0x8] sm:$0xff] %vm201_vm0, %v2167_v0  ;;  %s3097_s9 = smov (!%p174_p1, %s2156_s9), 1  ;;  %s2267_s28 = sld [smem:[#allocation4]]  ;;  %vm1846_vm5 = vcmask 392192   ;;  %vm1848_vm6 = vcmask 523264  }
  0x22   : > { %209 = vst.msk [vmem:[#allocation2 + $0x30] sm:$0xff] %vm201_vm0, %v2167_v0  ;;  %210 = vst.msk [vmem:[#allocation2 + $0x38] sm:$0xff] %vm201_vm0, %v2167_v0  ;;  %s2073_s21 = sshll.u32 %s3097_s9, 6  ;;  %s2269_s29 = sld [smem:[#allocation4 + $0x1b]]  ;;  %vm1850_vm7 = vcmask 654336   ;;  %vm1852_vm8 = vcmask 785408  }
  0x23   : > { %212 = vst.msk [vmem:[#allocation2 + $0x48] sm:$0xff] %vm201_vm0, %v2167_v0  ;;  %213 = vst.msk [vmem:[#allocation2 + $0x50] sm:$0xff] %vm201_vm0, %v2167_v0  ;;  %s182_s24 = scalar_lea.vmem %s3087_s0, %s2073_s21  ;;  %s2272_s30 = sld [smem:[#allocation4 + $0x39]]  ;;  %vm1854_vm9 = vcmask 916480  }
  0x24   : > { %208 = vst.msk [vmem:[#allocation2 + $0x28] sm:$0x3] %vm204_vm1, %v2167_v0  ;;  %205 = vst.msk [vmem:[#allocation2 + $0x10] sm:$0x3] %vm204_vm1, %v2167_v0  ;;  %v217_v1 = vld [vmem:[%s182_s24 + $0x10] sm:$0xff]  ;;  %v215_v2 = vld [vmem:[%s182_s24] sm:$0xff] }
  0x25   : > { %211 = vst.msk [vmem:[#allocation2 + $0x40] sm:$0x3] %vm204_vm1, %v2167_v0  ;;  %214 = vst.msk [vmem:[#allocation2 + $0x58] sm:$0x3] %vm204_vm1, %v2167_v0  ;;  %235 = vrot.lane.b32.xlu1 %v217_v1, %s2168_s25  ;;  %231 = vrot.lane.b32.xlu0 %v215_v2, %s2168_s25  ;;  %v218_v3 = vld [vmem:[%s182_s24 + $0x18] sm:$0xff]  ;;  %v216_v4 = vld [vmem:[%s182_s24 + $0x8] sm:$0xff] }
  0x26   : > { %v220_v5 = vld [vmem:[%s182_s24 + $0x28] sm:$0xff]  ;;  %v219_v6 = vld [vmem:[%s182_s24 + $0x20] sm:$0xff]  ;;  %v222_v7 = vld [vmem:[%s182_s24 + $0x38] sm:$0xff]  ;;  %v361_v13 = vstv %s2259_s26  ;;  %s2282_s3 = sld [smem:[#allocation4 + $0x54]]  ;;  %s2169_s4 = smov 127   ;;  %195 = vst.msk [vmem:[#allocation3] sm:$0xff] %vm194_vm3, %v2167_v0 }
  0x27   : > { %v221_v8 = vld [vmem:[%s182_s24 + $0x30] sm:$0xff]  ;;  %v376_v17 = vstv %s2261_s27  ;;  %v274_v25 = vstv %s2267_s28  ;;  %s2293_s5 = sld [smem:[#allocation4 + $0x36]]  ;;  %s2298_s6 = sld [smem:[#allocation4 + $0x4]]  ;;  %196 = vst.msk [vmem:[#allocation3 + $0x8] sm:$0xff] %vm194_vm3, %v2167_v0  ;;  %197 = vst.msk [vmem:[#allocation3 + $0x10] sm:$0xff] %vm194_vm3, %v2167_v0 }
  0x28   : > { %v282_v26 = vstv %s2269_s29  ;;  %s2300_s7 = sld [smem:[#allocation4 + $0x51]]  ;;  %s2304_s8 = sld [smem:[#allocation4 + $0x1f]]  ;;  %198 = vst.msk [vmem:[#allocation3 + $0x18] sm:$0xff] %vm194_vm3, %v2167_v0  ;;  %199 = vst.msk [vmem:[#allocation3 + $0x20] sm:$0xff] %vm194_vm3, %v2167_v0 }
  0x29   : > { %237 = vrot.lane.b32.xlu1 %v218_v3, %s2168_s25  ;;  %233 = vrot.lane.b32.xlu0 %v216_v4, %s2168_s25  ;;  %v391_v28 = vstv %s2272_s30  ;;  %s2308_s12 = sld [smem:[#allocation4 + $0x3a]]  ;;  %s2312_s14 = sld [smem:[#allocation4 + $0x1]]  ;;  %200 = vst.msk [vmem:[#allocation3 + $0x28] sm:$0xff] %vm194_vm3, %v2167_v0 }
  0x2a   : > { %s2316_s15 = sld [smem:[#allocation4 + $0x1c]]  ;;  %s2321_s16 = sld [smem:[#allocation4 + $0x37]] }
  0x2b   : > { %s2326_s17 = sld [smem:[#allocation4 + $0x55]]  ;;  %s2328_s18 = sld [smem:[#allocation4 + $0x52]] }
  0x2c   : > { %v406_v35 = vstv %s2282_s3  ;;  %s2338_s19 = sld [smem:[#allocation4 + $0x2]]  ;;  %s2340_s20 = sld [smem:[#allocation4 + $0x1d]] }
  0x2d   : > { %241 = vrot.lane.b32.xlu1 %v220_v5, %s2168_s25  ;;  %239 = vrot.lane.b32.xlu0 %v219_v6, %s2168_s25  ;;  %v290_v40 = vstv %s2293_s5  ;;  %v421_v42 = vstv %s2298_s6  ;;  %s2345_s21 = sld [smem:[#allocation4 + $0x38]]  ;;  %s2351_s22 = sld [smem:[#allocation4 + $0x53]] }
  0x2e   : > { %v298_v43 = vstv %s2300_s7  ;;  %v436_v45 = vstv %s2304_s8  ;;  %s2372_s23 = sld [smem:[#allocation4 + $0x5]]  ;;  %s2389_s24 = sld [smem:[#allocation4 + $0x20]] }
  0x2f   : > { %v451_v46 = vstv %s2308_s12  ;;  %v305_v48 = vstv %s2312_s14  ;;  %s1986_s26 = sld [smem:[#allocation4 + $0x56]]  ;;  %s1988_s28 = sld [smem:[#allocation4 + $0x21]] }
  0x30   : > { %v312_v52 = vstv %s2316_s15  ;;  %v319_v56 = vstv %s2321_s16  ;;  %s1987_s27 = sld [smem:[#allocation4 + $0x6]]  ;;  %s1989_s29 = sld [smem:[#allocation4 + $0x3c]] }
  0x31   : > { %245 = vrot.lane.b32.xlu1 %v222_v7, %s2168_s25  ;;  %243 = vrot.lane.b32.xlu0 %v221_v8, %s2168_s25  ;;  %v466_v57 = vstv %s2326_s17  ;;  %v326_v58 = vstv %s2328_s18  ;;  %s1985_s25 = sld [smem:[#allocation4 + $0x3b]]  ;;  %s1990_s30 = sld [smem:[#allocation4 + $0x57]] }
  0x32   : > { %v333_v6 = vstv %s2338_s19  ;;  %v340_v7 = vstv %s2340_s20  ;;  %s2170_s3 = smov 126   ;;  %s1991_s5 = sld [smem:[#allocation4 + $0x7]] }
  0x33   : > { %s1992_s6 = sld [smem:[#allocation4 + $0x22]]  ;;  %s1993_s7 = sld [smem:[#allocation4 + $0x3d]] }
  0x34   : > { %s1994_s8 = sld [smem:[#allocation4 + $0x58]]  ;;  %s1996_s14 = sld [smem:[#allocation4 + $0x23]] }
  0x35   : > { %s1995_s12 = sld [smem:[#allocation4 + $0x8]]  ;;  %s1997_s15 = sld [smem:[#allocation4 + $0x3e]] }
  0x36   : > { %s1998_s16 = sld [smem:[#allocation4 + $0x59]]  ;;  %s2011_s17 = sld [smem:[#allocation4 + $0xc]] }
  0x37   : > { %s2012_s18 = sld [smem:[#allocation4 + $0x27]]  ;;  %s2013_s19 = sld [smem:[#allocation4 + $0x42]] }
  0x38   : > { %s2014_s20 = sld [smem:[#allocation4 + $0x5d]] }
  0x97   : > { %v236_v9 = vpop.permute.xlu1 %235  ;;  %v232_v10 = vpop.permute.xlu0 %231 }
  0x98   : > { %258 = vst.msk [vmem:[#allocation2 + $0x19] sm:$0xff] %vm255_vm2, %v236_v9  ;;  %256 = vst.msk [vmem:[#allocation2 + $0x1] sm:$0xff] %vm255_vm2, %v232_v10 }
  0x9b   : > { %v238_v11 = vpop.permute.xlu1 %237  ;;  %v234_v12 = vpop.permute.xlu0 %233 }
  0x9c   : > { %259 = vst.msk [vmem:[#allocation2 + $0x21] sm:$0xff] %vm255_vm2, %v238_v11  ;;  %257 = vst.msk [vmem:[#allocation2 + $0x9] sm:$0xff] %vm255_vm2, %v234_v12  ;;  %v347_v11 = vstv %s2345_s21  ;;  %s2015_s21 = sld [smem:[#allocation4 + $0xd]] }
  0x9f   : > { %v242_v14 = vpop.permute.xlu1 %241  ;;  %v240_v15 = vpop.permute.xlu0 %239  ;;  %v2274_v16 = vld [vmem:[#allocation2] sm:$0xff]  ;;  %v2280_v19 = vld [vmem:[#allocation2 + $0x18] sm:$0xff] }
  0xa0   : > { %261 = vst.msk [vmem:[#allocation2 + $0x39] sm:$0xff] %vm255_vm2, %v242_v14  ;;  %260 = vst.msk [vmem:[#allocation2 + $0x31] sm:$0xff] %vm255_vm2, %v240_v15  ;;  %v362_v18 = vmul.f32 %v361_v13, %v2274_v16  ;;  %v377_v20 = vmul.f32 %v376_v17, %v2280_v19  ;;  %v275_v30 = vmul.f32 %v274_v25, %v2274_v16  ;;  %v354_v15 = vstv %s2351_s22  ;;  %s2016_s22 = sld [smem:[#allocation4 + $0x28]] }
  0xa1   : > { %v283_v31 = vmul.f32 %v282_v26, %v2280_v19  ;;  %v422_v49 = vmul.f32 %v421_v42, %v2274_v16  ;;  %v437_v59 = vmul.f32 %v436_v45, %v2280_v19  ;;  %v306_v1 = vmul.f32 %v305_v48, %v2274_v16 }
  0xa2   : > { %366 = vrot.lane.b32.xlu0 %v362_v18, %s2169_s4  ;;  %v313_v2 = vmul.f32 %v312_v52, %v2280_v19 }
  0xa3   : > { %v246_v21 = vpop.permute.xlu1 %245  ;;  %v244_v22 = vpop.permute.xlu0 %243  ;;  %v2286_v23 = vld [vmem:[#allocation2 + $0x8] sm:$0xff]  ;;  %v2295_v27 = vld [vmem:[#allocation2 + $0x20] sm:$0xff]  ;;  %v285_v38 = vadd.f32 %v283_v31, %v275_v30 }
  0xa4   : > { %263 = vst.msk [vmem:[#allocation2 + $0x51] sm:$0xff] %vm255_vm2, %v246_v21  ;;  %262 = vst.msk [vmem:[#allocation2 + $0x49] sm:$0xff] %vm255_vm2, %v244_v22  ;;  %v363_v24 = vmul.f32 %v361_v13, %v2286_v23  ;;  %v378_v32 = vmul.f32 %v376_v17, %v2295_v27  ;;  %v284_v51 = vmul.f32 %v282_v26, %v2295_v27 }
  0xa5   : > { %v276_v54 = vmul.f32 %v274_v25, %v2286_v23  ;;  %v423_v63 = vmul.f32 %v421_v42, %v2286_v23  ;;  %v315_v8 = vadd.f32 %v313_v2, %v306_v1  ;;  %v307_v9 = vmul.f32 %v305_v48, %v2286_v23 }
  0xa6   : > { %381 = vrot.lane.b32.xlu0 %v377_v20, %s2169_s4  ;;  %368 = vrot.lane.b32.xlu1 %v363_v24, %s2169_s4  ;;  %v314_v10 = vmul.f32 %v312_v52, %v2295_v27  ;;  %v438_v12 = vmul.f32 %v436_v45, %v2295_v27  ;;  %v334_v22 = vmul.f32 %v333_v6, %v2274_v16 }
  0xa7   : > { %v2306_v29 = vld [vmem:[#allocation2 + $0x30] sm:$0xff]  ;;  %v2318_v34 = vld [vmem:[#allocation2 + $0x38] sm:$0xff]  ;;  %v286_v61 = vadd.f32 %v284_v51, %v276_v54  ;;  %v341_v26 = vmul.f32 %v340_v7, %v2280_v19 }
  0xa8   : > { %v392_v33 = vmul.f32 %v391_v28, %v2306_v29  ;;  %v393_v36 = vmul.f32 %v391_v28, %v2318_v34  ;;  %v291_v47 = vmul.f32 %v290_v40, %v2306_v29  ;;  %v292_v55 = vmul.f32 %v290_v40, %v2318_v34 }
  0xa9   : > { %v320_v3 = vmul.f32 %v319_v56, %v2306_v29  ;;  %v321_v14 = vmul.f32 %v319_v56, %v2318_v34  ;;  %v452_v17 = vmul.f32 %v451_v46, %v2306_v29  ;;  %v316_v20 = vadd.f32 %v314_v10, %v307_v9 }
  0xaa   : > { %383 = vrot.lane.b32.xlu1 %v378_v32, %s2169_s4  ;;  %396 = vrot.lane.b32.xlu0 %v392_v33, %s2169_s4  ;;  %v293_v53 = vadd.f32 %v291_v47, %v285_v38  ;;  %v294_v4 = vadd.f32 %v292_v55, %v286_v61  ;;  %v453_v28 = vmul.f32 %v451_v46, %v2318_v34  ;;  %v526_v56 = vstv %s1986_s26  ;;  %s2020_s26 = sld [smem:[#allocation4 + $0x29]] }
  0xab   : > { %v2330_v37 = vld [vmem:[#allocation2 + $0x48] sm:$0xff]  ;;  %v2334_v41 = vld [vmem:[#allocation2 + $0x50] sm:$0xff]  ;;  %v322_v18 = vadd.f32 %v320_v3, %v315_v8  ;;  %v323_v25 = vadd.f32 %v321_v14, %v316_v20  ;;  %v348_v31 = vmul.f32 %v347_v11, %v2306_v29  ;;  %v342_v38 = vmul.f32 %v340_v7, %v2295_v27 }
  0xac   : > { %v407_v39 = vmul.f32 %v406_v35, %v2330_v37  ;;  %v408_v44 = vmul.f32 %v406_v35, %v2334_v41  ;;  %v299_v50 = vmul.f32 %v298_v43, %v2330_v37  ;;  %v300_v62 = vmul.f32 %v298_v43, %v2334_v41 }
  0xad   : > { %v327_v5 = vmul.f32 %v326_v58, %v2330_v37  ;;  %v328_v21 = vmul.f32 %v326_v58, %v2334_v41  ;;  %v467_v30 = vmul.f32 %v466_v57, %v2330_v37  ;;  %v355_v32 = vmul.f32 %v354_v15, %v2330_v37 }
  0xae   : > { %398 = vrot.lane.b32.xlu1 %v393_v36, %s2169_s4  ;;  %411 = vrot.lane.b32.xlu0 %v407_v39, %s2169_s4  ;;  %v2365_v60 = vadd.f32 %v299_v50, %v293_v53  ;;  %v2383_v13 = vadd.f32 %v300_v62, %v294_v4  ;;  %v343_v35 = vadd.f32 %v341_v26, %v334_v22  ;;  %v481_v39 = vstv %s2372_s23  ;;  %s2017_s23 = sld [smem:[#allocation4 + $0x43]] }
  0xaf   : > { %v2394_v24 = vadd.f32 %v327_v5, %v322_v18  ;;  %v2401_v33 = vadd.f32 %v328_v21, %v323_v25  ;;  %v335_v36 = vmul.f32 %v333_v6, %v2286_v23  ;;  %v349_v40 = vmul.f32 %v347_v11, %v2318_v34 }
  0xb0   : > { %v350_v42 = vadd.f32 %v348_v31, %v343_v35  ;;  %v468_v45 = vmul.f32 %v466_v57, %v2334_v41  ;;  %v482_v46 = vmul.f32 %v481_v39, %v2274_v16  ;;  %v483_v51 = vmul.f32 %v481_v39, %v2286_v23 }
  0xb1   : > { %v344_v43 = vadd.f32 %v342_v38, %v335_v36  ;;  %v511_v53 = vstv %s1985_s25  ;;  %v527_v58 = vmul.f32 %v526_v56, %v2330_v37  ;;  %v528_v61 = vmul.f32 %v526_v56, %v2334_v41  ;;  %s2019_s25 = sld [smem:[#allocation4 + $0xe]] }
  0xb2   : > { %413 = vrot.lane.b32.xlu1 %v408_v44, %s2169_s4  ;;  %426 = vrot.lane.b32.xlu0 %v422_v49, %s2169_s4  ;;  %v356_v44 = vmul.f32 %v354_v15, %v2334_v41  ;;  %v2412_v47 = vadd.f32 %v355_v32, %v350_v42  ;;  %v496_v49 = vstv %s2389_s24  ;;  %v512_v55 = vmul.f32 %v511_v53, %v2306_v29  ;;  %s2018_s24 = sld [smem:[#allocation4 + $0x5e]] }
  0xb3   : > { %v351_v48 = vadd.f32 %v349_v40, %v344_v43  ;;  %v497_v52 = vmul.f32 %v496_v49, %v2280_v19  ;;  %v498_v54 = vmul.f32 %v496_v49, %v2295_v27  ;;  %v513_v57 = vmul.f32 %v511_v53, %v2318_v34  ;;  %v2477_v40 = vld [vmem:[#allocation2 + $0x1] sm:$0xff]  ;;  %v2483_v43 = vld [vmem:[#allocation2 + $0x9] sm:$0xff] }
  0xb4   : > { %v571_v3 = vstv %s1989_s29  ;;  %v586_v6 = vstv %s1990_s30  ;;  %v601_v9 = vstv %s1991_s5  ;;  %v646_v21 = vstv %s1994_s8  ;;  %v2501_v53 = vld [vmem:[#allocation2 + $0x49] sm:$0xff]  ;;  %s2023_s29 = sld [smem:[#allocation4 + $0xf]]  ;;  %s2031_s30 = sld [smem:[#allocation4 + $0x11]] }
  0xb5   : > { %v2417_v50 = vadd.f32 %v356_v44, %v351_v48  ;;  %v572_v5 = vmul.f32 %v571_v3, %v2306_v29  ;;  %v573_v7 = vmul.f32 %v571_v3, %v2318_v34  ;;  %v587_v8 = vmul.f32 %v586_v6, %v2330_v37  ;;  %v2485_v44 = vld [vmem:[#allocation2 + $0x19] sm:$0xff]  ;;  %v2493_v48 = vld [vmem:[#allocation2 + $0x31] sm:$0xff]  ;;  %s2024_s5 = sld [smem:[#allocation4 + $0x2a]]  ;;  %s2591_s8 = sld [smem:[#allocation4 + $0x45]] }
  0xb6   : > { %428 = vrot.lane.b32.xlu1 %v423_v63, %s2169_s4  ;;  %441 = vrot.lane.b32.xlu0 %v437_v59, %s2169_s4  ;;  %v541_v59 = vstv %s1987_s27  ;;  %v556_v63 = vstv %s1988_s28  ;;  %v588_v10 = vmul.f32 %v586_v6, %v2334_v41  ;;  %v602_v11 = vmul.f32 %v601_v9, %v2274_v16  ;;  %s2021_s27 = sld [smem:[#allocation4 + $0x44]]  ;;  %s2022_s28 = sld [smem:[#allocation4 + $0x5f]] }
  0xb7   : > { %v542_v62 = vmul.f32 %v541_v59, %v2274_v16  ;;  %v543_v1 = vmul.f32 %v541_v59, %v2286_v23  ;;  %v557_v2 = vmul.f32 %v556_v63, %v2280_v19  ;;  %v558_v4 = vmul.f32 %v556_v63, %v2295_v27 }
  0xb8   : > { %v603_v14 = vmul.f32 %v601_v9, %v2286_v23  ;;  %v647_v25 = vmul.f32 %v646_v21, %v2330_v37  ;;  %v661_v26 = vstv %s1995_s12  ;;  %v676_v31 = vstv %s1996_s14  ;;  %s2601_s12 = sld [smem:[#allocation4 + $0x2b]]  ;;  %s2612_s14 = sld [smem:[#allocation4 + $0x47]] }
  0xb9   : > { %v663_v32 = vmul.f32 %v661_v26, %v2286_v23  ;;  %v677_v35 = vmul.f32 %v676_v31, %v2280_v19  ;;  %v691_v36 = vstv %s1997_s15  ;;  %v678_v38 = vmul.f32 %v676_v31, %v2295_v27  ;;  %s2624_s15 = sld [smem:[#allocation4 + $0x60]] }
  0xba   : > { %443 = vrot.lane.b32.xlu1 %v438_v12, %s2169_s4  ;;  %456 = vrot.lane.b32.xlu0 %v452_v17, %s2169_s4  ;;  %v616_v12 = vstv %s1992_s6  ;;  %v631_v17 = vstv %s1993_s7  ;;  %v693_v23 = vmul.f32 %v691_v36, %v2318_v34  ;;  %s2027_s6 = sld [smem:[#allocation4 + $0x10]]  ;;  %s2032_s7 = sld [smem:[#allocation4 + $0x2c]] }
  0xbb   : > { %v617_v15 = vmul.f32 %v616_v12, %v2280_v19  ;;  %v618_v18 = vmul.f32 %v616_v12, %v2295_v27  ;;  %v632_v20 = vmul.f32 %v631_v17, %v2306_v29  ;;  %v633_v22 = vmul.f32 %v631_v17, %v2318_v34 }
  0xbc   : > { %v706_v39 = vstv %s1998_s16  ;;  %v813_v42 = vstv %s2011_s17  ;;  %v903_v3 = vstv %s2017_s23  ;;  %s2628_s16 = sld [smem:[#allocation4 + $0x9]]  ;;  %s2635_s17 = sld [smem:[#allocation4 + $0x24]] }
  0xbd   : > { %v707_v19 = vmul.f32 %v706_v39, %v2330_v37  ;;  %v708_v27 = vmul.f32 %v706_v39, %v2334_v41  ;;  %v815_v34 = vmul.f32 %v813_v42, %v2483_v43  ;;  %s2677_s23 = sld [smem:[#allocation4 + $0x15]] }
  0xbe   : > { %458 = vrot.lane.b32.xlu1 %v453_v28, %s2169_s4  ;;  %471 = vrot.lane.b32.xlu0 %v467_v30, %s2169_s4  ;;  %v648_v28 = vmul.f32 %v646_v21, %v2334_v41  ;;  %v662_v30 = vmul.f32 %v661_v26, %v2274_v16  ;;  %v692_v16 = vmul.f32 %v691_v36, %v2306_v29  ;;  %v843_v41 = vstv %s2013_s19  ;;  %s2644_s19 = sld [smem:[#allocation4 + $0x3f]] }
  0xbf   : > { %v814_v29 = vmul.f32 %v813_v42, %v2477_v40  ;;  %v948_v21 = vstv %s2020_s26  ;;  %v993_v42 = vstv %s2023_s29  ;;  %s2697_s26 = sld [smem:[#allocation4 + $0x17]]  ;;  %s2711_s29 = sld [smem:[#allocation4 + $0x30]] }
  0xc2   : > { %473 = vrot.lane.b32.xlu1 %v468_v45, %s2169_s4  ;;  %486 = vrot.lane.b32.xlu0 %v482_v46, %s2169_s4  ;;  %v828_v45 = vstv %s2012_s18  ;;  %v2491_v46 = vld [vmem:[#allocation2 + $0x21] sm:$0xff]  ;;  %s2640_s18 = sld [smem:[#allocation4 + $0x46]] }
  0xc3   : > { %v829_v37 = vmul.f32 %v828_v45, %v2485_v44  ;;  %v830_v49 = vmul.f32 %v828_v45, %v2491_v46 }
  0xc6   : > { %488 = vrot.lane.b32.xlu1 %v483_v51, %s2169_s4  ;;  %501 = vrot.lane.b32.xlu0 %v497_v52, %s2169_s4  ;;  %v844_v51 = vmul.f32 %v843_v41, %v2493_v48  ;;  %v2499_v52 = vld [vmem:[#allocation2 + $0x39] sm:$0xff] }
  0xca   : > { %503 = vrot.lane.b32.xlu1 %v498_v54, %s2169_s4  ;;  %516 = vrot.lane.b32.xlu0 %v512_v55, %s2169_s4  ;;  %v858_v54 = vstv %s2014_s20  ;;  %v845_v55 = vmul.f32 %v843_v41, %v2499_v52  ;;  %s2646_s20 = sld [smem:[#allocation4 + $0x5a]] }
  0xcb   : > { %v859_v56 = vmul.f32 %v858_v54, %v2501_v53 }
  0xce   : > { %518 = vrot.lane.b32.xlu1 %v513_v57, %s2169_s4  ;;  %531 = vrot.lane.b32.xlu0 %v527_v58, %s2169_s4  ;;  %v2507_v57 = vld [vmem:[#allocation2 + $0x51] sm:$0xff]  ;;  %v873_v58 = vstv %s2015_s21  ;;  %s2651_s21 = sld [smem:[#allocation4 + $0x62]] }
  0xcf   : > { %v860_v59 = vmul.f32 %v858_v54, %v2507_v57 }
  0xd2   : > { %533 = vrot.lane.b32.xlu1 %v528_v61, %s2169_s4  ;;  %546 = vrot.lane.b32.xlu0 %v542_v62, %s2170_s3  ;;  %v874_v61 = vmul.f32 %v873_v58, %v2477_v40  ;;  %v888_v62 = vstv %s2016_s22  ;;  %s2661_s22 = sld [smem:[#allocation4 + $0x61]] }
  0xd3   : > { %v890_v6 = vmul.f32 %v888_v62, %v2491_v46 }
  0xd6   : > { %548 = vrot.lane.b32.xlu1 %v543_v1, %s2170_s3  ;;  %561 = vrot.lane.b32.xlu0 %v557_v2, %s2170_s3  ;;  %v875_v1 = vmul.f32 %v873_v58, %v2483_v43  ;;  %v889_v2 = vmul.f32 %v888_v62, %v2485_v44  ;;  %v1053_v62 = vstv %s2027_s6  ;;  %s2751_s6 = sld [smem:[#allocation4 + $0xb]] }
  0xda   : > { %563 = vrot.lane.b32.xlu1 %v558_v4, %s2170_s3  ;;  %576 = vrot.lane.b32.xlu0 %v572_v5, %s2170_s3 }
  0xde   : > { %578 = vrot.lane.b32.xlu1 %v573_v7, %s2170_s3  ;;  %591 = vrot.lane.b32.xlu0 %v587_v8, %s2170_s3  ;;  %v904_v7 = vmul.f32 %v903_v3, %v2493_v48  ;;  %v918_v8 = vstv %s2018_s24  ;;  %s2683_s24 = sld [smem:[#allocation4 + $0xa]] }
  0xdf   : > { %v919_v12 = vmul.f32 %v918_v8, %v2501_v53 }
  0xe2   : > { %593 = vrot.lane.b32.xlu1 %v588_v10, %s2170_s3  ;;  %606 = vrot.lane.b32.xlu0 %v602_v11, %s2170_s3  ;;  %v905_v11 = vmul.f32 %v903_v3, %v2499_v52 }
  0xe6   : > { %608 = vrot.lane.b32.xlu1 %v603_v14, %s2170_s3  ;;  %621 = vrot.lane.b32.xlu0 %v617_v15, %s2170_s3  ;;  %v933_v14 = vstv %s2019_s25  ;;  %s2692_s25 = sld [smem:[#allocation4 + $0x25]] }
  0xe7   : > { %v935_v26 = vmul.f32 %v933_v14, %v2483_v43 }
  0xea   : > { %623 = vrot.lane.b32.xlu1 %v618_v18, %s2170_s3  ;;  %636 = vrot.lane.b32.xlu0 %v632_v20, %s2170_s3  ;;  %v920_v18 = vmul.f32 %v918_v8, %v2507_v57  ;;  %v934_v20 = vmul.f32 %v933_v14, %v2477_v40 }
  0xee   : > { %638 = vrot.lane.b32.xlu1 %v633_v22, %s2170_s3  ;;  %651 = vrot.lane.b32.xlu0 %v647_v25, %s2170_s3 }
  0xf2   : > { %653 = vrot.lane.b32.xlu1 %v648_v28, %s2170_s3  ;;  %666 = vrot.lane.b32.xlu0 %v662_v30, %s2170_s3  ;;  %v949_v28 = vmul.f32 %v948_v21, %v2485_v44  ;;  %v963_v30 = vstv %s2021_s27  ;;  %s2703_s27 = sld [smem:[#allocation4 + $0x40]] }
  0xf3   : > { %v964_v36 = vmul.f32 %v963_v30, %v2493_v48 }
  0xf6   : > { %668 = vrot.lane.b32.xlu1 %v663_v32, %s2170_s3  ;;  %681 = vrot.lane.b32.xlu0 %v677_v35, %s2170_s3  ;;  %v950_v35 = vmul.f32 %v948_v21, %v2491_v46 }
  0xfa   : > { %683 = vrot.lane.b32.xlu1 %v678_v38, %s2170_s3  ;;  %696 = vrot.lane.b32.xlu0 %v692_v16, %s2170_s3  ;;  %v978_v38 = vstv %s2022_s28  ;;  %s2705_s28 = sld [smem:[#allocation4 + $0x5b]] }
  0xfb   : > { %v980_v45 = vmul.f32 %v978_v38, %v2507_v57 }
  0xfe   : > { %698 = vrot.lane.b32.xlu1 %v693_v23, %s2170_s3  ;;  %711 = vrot.lane.b32.xlu0 %v707_v19, %s2170_s3  ;;  %v965_v23 = vmul.f32 %v963_v30, %v2499_v52  ;;  %v979_v19 = vmul.f32 %v978_v38, %v2501_v53 }
 0x102   : > { %713 = vrot.lane.b32.xlu1 %v708_v27, %s2170_s3  ;;  %818 = vrot.lane.b32.xlu0 %v814_v29, %s2169_s4 }
 0x106   : > { %820 = vrot.lane.b32.xlu1 %v815_v34, %s2169_s4  ;;  %833 = vrot.lane.b32.xlu0 %v829_v37, %s2169_s4  ;;  %v994_v34 = vmul.f32 %v993_v42, %v2477_v40  ;;  %v1113_v37 = vstv %s2031_s30  ;;  %s2725_s30 = sld [smem:[#allocation4 + $0x16]] }
 0x107   : > { %v1114_v54 = vmul.f32 %v1113_v37, %v2477_v40 }
 0x10a   : > { %835 = vrot.lane.b32.xlu1 %v830_v49, %s2169_s4  ;;  %848 = vrot.lane.b32.xlu0 %v844_v51, %s2169_s4  ;;  %v995_v51 = vmul.f32 %v993_v42, %v2483_v43 }
 0x10e   : > { %850 = vrot.lane.b32.xlu1 %v845_v55, %s2169_s4  ;;  %863 = vrot.lane.b32.xlu0 %v859_v56, %s2169_s4  ;;  %v1008_v55 = vstv %s2024_s5  ;;  %s2745_s5 = sld [smem:[#allocation4 + $0x32]] }
 0x10f   : > { %v1010_v3 = vmul.f32 %v1008_v55, %v2491_v46 }
 0x112   : > { %865 = vrot.lane.b32.xlu1 %v860_v59, %s2169_s4  ;;  %878 = vrot.lane.b32.xlu0 %v874_v61, %s2169_s4  ;;  %v1115_v59 = vmul.f32 %v1113_v37, %v2483_v43  ;;  %v1009_v61 = vmul.f32 %v1008_v55, %v2485_v44  ;;  %v1038_v55 = vstv %s2624_s15  ;;  %s2781_s15 = sld [smem:[#allocation4 + $0x5c]] }
 0x114   : > { %v2515_v63 = vpop.permute.xlu0 %366 }
 0x116   : > { %880 = vrot.lane.b32.xlu1 %v875_v1, %s2169_s4  ;;  %893 = vrot.lane.b32.xlu0 %v889_v2, %s2169_s4 }
 0x118   : > { %v2521_v4 = vpop.permute.xlu1 %368  ;;  %v2523_v5 = vpop.permute.xlu0 %381 }
 0x11a   : > { %895 = vrot.lane.b32.xlu1 %v890_v6, %s2169_s4  ;;  %908 = vrot.lane.b32.xlu0 %v904_v7, %s2169_s4  ;;  %v1054_v6 = vmul.f32 %v1053_v62, %v2477_v40  ;;  %v1128_v7 = vstv %s2032_s7  ;;  %s2760_s7 = sld [smem:[#allocation4 + $0x26]] }
 0x11b   : > { %v1129_v14 = vmul.f32 %v1128_v7, %v2485_v44 }
 0x11c   : > { %v2529_v9 = vpop.permute.xlu1 %383  ;;  %v2531_v10 = vpop.permute.xlu0 %396 }
 0x11e   : > { %910 = vrot.lane.b32.xlu1 %v905_v11, %s2169_s4  ;;  %923 = vrot.lane.b32.xlu0 %v919_v12, %s2169_s4  ;;  %v1055_v12 = vmul.f32 %v1053_v62, %v2483_v43 }
 0x120   : > { %v2537_v15 = vpop.permute.xlu1 %398  ;;  %v2539_v17 = vpop.permute.xlu0 %411 }
 0x122   : > { %925 = vrot.lane.b32.xlu1 %v920_v18, %s2169_s4  ;;  %938 = vrot.lane.b32.xlu0 %v934_v20, %s2169_s4  ;;  %v1023_v18 = vstv %s2591_s8  ;;  %v372_v20 = vadd.f32 %v2515_v63, %v2365_v60  ;;  %v373_v60 = vadd.f32 %v2521_v4, %v2383_v13  ;;  %s2767_s8 = sld [smem:[#allocation4 + $0x4b]] }
 0x123   : > { %v1024_v30 = vmul.f32 %v1023_v18, %v2493_v48 }
 0x124   : > { %v2545_v22 = vpop.permute.xlu1 %413  ;;  %v2547_v25 = vpop.permute.xlu0 %426  ;;  %v388_v42 = vadd.f32 %v2529_v9, %v373_v60 }
 0x126   : > { %940 = vrot.lane.b32.xlu1 %v935_v26, %s2169_s4  ;;  %953 = vrot.lane.b32.xlu0 %v949_v28, %s2169_s4  ;;  %v1130_v28 = vmul.f32 %v1128_v7, %v2491_v46  ;;  %v403_v13 = vadd.f32 %v2537_v15, %v388_v42  ;;  %v729_v15 = vstv %s2628_s16  ;;  %v1158_v42 = vstv %s2651_s21  ;;  %s2797_s16 = sld [smem:[#allocation4 + $0x4d]]  ;;  %s2867_s21 = sld [smem:[#allocation4 + $0x18]] }
 0x128   : > { %v2553_v31 = vpop.permute.xlu1 %428  ;;  %v2555_v32 = vpop.permute.xlu0 %441 }
 0x12a   : > { %955 = vrot.lane.b32.xlu1 %v950_v35, %s2169_s4  ;;  %968 = vrot.lane.b32.xlu0 %v964_v36, %s2169_s4  ;;  %v387_v35 = vadd.f32 %v2523_v5, %v372_v20  ;;  %v1068_v36 = vstv %s2601_s12  ;;  %v1083_v20 = vstv %s2640_s18  ;;  %s2773_s12 = sld [smem:[#allocation4 + $0x41]]  ;;  %s2826_s18 = sld [smem:[#allocation4 + $0x4c]] }
 0x12b   : > { %v1069_v5 = vmul.f32 %v1068_v36, %v2485_v44 }
 0x12c   : > { %v2561_v16 = vpop.permute.xlu1 %443  ;;  %v2563_v39 = vpop.permute.xlu0 %456  ;;  %v402_v63 = vadd.f32 %v2531_v10, %v387_v35 }
 0x12e   : > { %970 = vrot.lane.b32.xlu1 %v965_v23, %s2169_s4  ;;  %983 = vrot.lane.b32.xlu0 %v979_v19, %s2169_s4  ;;  %v1025_v19 = vmul.f32 %v1023_v18, %v2499_v52 }
 0x130   : > { %v2569_v27 = vpop.permute.xlu1 %458  ;;  %v2571_v29 = vpop.permute.xlu0 %471 }
 0x132   : > { %985 = vrot.lane.b32.xlu1 %v980_v45, %s2169_s4  ;;  %998 = vrot.lane.b32.xlu0 %v994_v34, %s2170_s3  ;;  %v417_v45 = vadd.f32 %v2539_v17, %v402_v63  ;;  %v1143_v34 = vstv %s2612_s14  ;;  %v1070_v17 = vmul.f32 %v1068_v36, %v2491_v46  ;;  %v731_v63 = vmul.f32 %v729_v15, %v2483_v43  ;;  %s2779_s14 = sld [smem:[#allocation4 + $0x31]] }
 0x133   : > { %v1144_v37 = vmul.f32 %v1143_v34, %v2493_v48  ;;  %v1145_v7 = vmul.f32 %v1143_v34, %v2499_v52 }
 0x134   : > { %v2577_v41 = vpop.permute.xlu1 %473  ;;  %v2579_v49 = vpop.permute.xlu0 %486 }
 0x136   : > { %1000 = vrot.lane.b32.xlu1 %v995_v51, %s2170_s3  ;;  %1118 = vrot.lane.b32.xlu0 %v1114_v54, %s2170_s3  ;;  %v418_v51 = vadd.f32 %v2545_v22, %v403_v13 }
 0x138   : > { %v2585_v56 = vpop.permute.xlu1 %488  ;;  %v2587_v58 = vpop.permute.xlu0 %501 }
 0x13a   : > { %1120 = vrot.lane.b32.xlu1 %v1115_v59, %s2170_s3  ;;  %1013 = vrot.lane.b32.xlu0 %v1009_v61, %s2170_s3 }
 0x13c   : > { %v2595_v1 = vpop.permute.xlu1 %503  ;;  %v2597_v2 = vpop.permute.xlu0 %516 }
 0x13e   : > { %1015 = vrot.lane.b32.xlu1 %v1010_v3, %s2170_s3  ;;  %1058 = vrot.lane.b32.xlu0 %v1054_v6, %s2170_s3  ;;  %v736_v3 = vstv %s2635_s17  ;;  %s2812_s17 = sld [smem:[#allocation4 + $0x66]] }
 0x13f   : > { %v737_v36 = vmul.f32 %v736_v3, %v2485_v44 }
 0x140   : > { %v2605_v8 = vpop.permute.xlu1 %518  ;;  %v2607_v11 = vpop.permute.xlu0 %531 }
 0x142   : > { %1060 = vrot.lane.b32.xlu1 %v1055_v12, %s2170_s3  ;;  %1133 = vrot.lane.b32.xlu0 %v1129_v14, %s2170_s3  ;;  %v1039_v12 = vmul.f32 %v1038_v55, %v2501_v53  ;;  %v730_v14 = vmul.f32 %v729_v15, %v2477_v40  ;;  %v1098_v15 = vstv %s2661_s22  ;;  %s2875_s22 = sld [smem:[#allocation4 + $0x1a]] }
 0x144   : > { %v2618_v21 = vpop.permute.xlu1 %533  ;;  %v547_v26 = vpop.permute.xlu0 %546 }
 0x145   : > { %v552_v4 = vadd.f32 %v547_v26, %v417_v45  ;;  %v743_v26 = vstv %s2644_s19  ;;  %s2843_s19 = sld [smem:[#allocation4 + $0x68]] }
 0x146   : > { %1135 = vrot.lane.b32.xlu1 %v1130_v28, %s2170_s3  ;;  %1028 = vrot.lane.b32.xlu0 %v1024_v30, %s2170_s3  ;;  %v750_v28 = vstv %s2646_s20  ;;  %v432_v30 = vadd.f32 %v2547_v25, %v2394_v24  ;;  %v744_v24 = vmul.f32 %v743_v26, %v2493_v48  ;;  %v738_v25 = vmul.f32 %v736_v3, %v2491_v46  ;;  %s2858_s20 = sld [smem:[#allocation4 + $0x67]] }
 0x148   : > { %v549_v38 = vpop.permute.xlu1 %548  ;;  %v562_v23 = vpop.permute.xlu0 %561  ;;  %v447_v45 = vadd.f32 %v2555_v32, %v432_v30  ;;  %v433_v32 = vadd.f32 %v2553_v31, %v2401_v33 }
 0x149   : > { %v567_v54 = vadd.f32 %v562_v23, %v552_v4  ;;  %v553_v59 = vadd.f32 %v549_v38, %v418_v51  ;;  %v751_v4 = vmul.f32 %v750_v28, %v2501_v53 }
 0x14a   : > { %1030 = vrot.lane.b32.xlu1 %v1025_v19, %s2170_s3  ;;  %1073 = vrot.lane.b32.xlu0 %v1069_v5, %s2170_s3  ;;  %v1040_v19 = vmul.f32 %v1038_v55, %v2507_v57  ;;  %v1084_v5 = vmul.f32 %v1083_v20, %v2493_v48  ;;  %v1159_v55 = vmul.f32 %v1158_v42, %v2501_v53 }
 0x14c   : > { %v564_v9 = vpop.permute.xlu1 %563  ;;  %v577_v10 = vpop.permute.xlu0 %576 }
 0x14d   : > { %v582_v61 = vadd.f32 %v577_v10, %v567_v54  ;;  %v568_v22 = vadd.f32 %v564_v9, %v553_v59  ;;  %v462_v9 = vadd.f32 %v2563_v39, %v447_v45  ;;  %v1085_v54 = vmul.f32 %v1083_v20, %v2499_v52  ;;  %v2714_v20 = vld [vmem:[#allocation2 + $0x2] sm:$0xff] }
 0x14e   : > { %1075 = vrot.lane.b32.xlu1 %v1070_v17, %s2170_s3  ;;  %1148 = vrot.lane.b32.xlu0 %v1144_v37, %s2170_s3  ;;  %v745_v59 = vmul.f32 %v743_v26, %v2499_v52  ;;  %v1385_v45 = vstv %s2697_s26  ;;  %s2916_s26 = sld [smem:[#allocation4 + $0x34]] }
 0x150   : > { %v579_v62 = vpop.permute.xlu1 %578  ;;  %v592_v6 = vpop.permute.xlu0 %591 }
 0x151   : > { %v597_v18 = vadd.f32 %v592_v6, %v582_v61  ;;  %v583_v35 = vadd.f32 %v579_v62, %v568_v22  ;;  %v448_v61 = vadd.f32 %v2561_v16, %v433_v32  ;;  %v477_v62 = vadd.f32 %v2571_v29, %v462_v9 }
 0x152   : > { %1150 = vrot.lane.b32.xlu1 %v1145_v7, %s2170_s3  ;;  %1043 = vrot.lane.b32.xlu0 %v1039_v12, %s2170_s3  ;;  %v752_v29 = vmul.f32 %v750_v28, %v2507_v57  ;;  %v1160_v12 = vmul.f32 %v1158_v42, %v2507_v57  ;;  %v1099_v22 = vmul.f32 %v1098_v15, %v2501_v53  ;;  %v757_v28 = vstv %s2683_s24  ;;  %v2728_v42 = vld [vmem:[#allocation2 + $0xa] sm:$0xff]  ;;  %s2892_s24 = sld [smem:[#allocation4 + $0x19]] }
 0x153   : > { %v732_v60 = vadd.f32 %v730_v14, %v597_v18  ;;  %v463_v39 = vadd.f32 %v2569_v27, %v448_v61  ;;  %v1265_v27 = vstv %s2677_s23  ;;  %v759_v9 = vmul.f32 %v757_v28, %v2483_v43  ;;  %v2743_v61 = vld [vmem:[#allocation2 + $0x1a] sm:$0xff]  ;;  %s2883_s23 = sld [smem:[#allocation4 + $0x33]] }
 0x154   : > { %v594_v38 = vpop.permute.xlu1 %593  ;;  %v607_v23 = vpop.permute.xlu0 %606 }
 0x155   : > { %v739_v34 = vadd.f32 %v737_v36, %v732_v60  ;;  %v598_v13 = vadd.f32 %v594_v38, %v583_v35  ;;  %v612_v16 = vadd.f32 %v607_v23, %v477_v62  ;;  %v478_v14 = vadd.f32 %v2577_v41, %v463_v39 }
 0x156   : > { %1045 = vrot.lane.b32.xlu1 %v1040_v19, %s2170_s3  ;;  %1088 = vrot.lane.b32.xlu0 %v1084_v5, %s2170_s3  ;;  %v764_v60 = vstv %s2692_s25  ;;  %v1100_v41 = vmul.f32 %v1098_v15, %v2507_v57  ;;  %v1266_v38 = vmul.f32 %v1265_v27, %v2714_v20  ;;  %v758_v19 = vmul.f32 %v757_v28, %v2477_v40  ;;  %s2902_s25 = sld [smem:[#allocation4 + $0x35]] }
 0x157   : > { %v733_v10 = vadd.f32 %v731_v63, %v598_v13  ;;  %v746_v17 = vadd.f32 %v744_v24, %v739_v34  ;;  %v771_v34 = vstv %s2703_s27  ;;  %v778_v13 = vstv %s2705_s28  ;;  %s2930_s27 = sld [smem:[#allocation4 + $0x50]]  ;;  %s2940_s28 = sld [smem:[#allocation4 + $0x69]] }
 0x158   : > { %v609_v37 = vpop.permute.xlu1 %608  ;;  %v622_v51 = vpop.permute.xlu0 %621  ;;  %v492_v24 = vadd.f32 %v2579_v49, %v2412_v47  ;;  %v772_v47 = vmul.f32 %v771_v34, %v2493_v48  ;;  %v766_v49 = vmul.f32 %v764_v60, %v2491_v46  ;;  %v779_v62 = vmul.f32 %v778_v13, %v2501_v53 }
 0x159   : > { %v740_v33 = vadd.f32 %v738_v25, %v733_v10  ;;  %v2699_v31 = vadd.f32 %v751_v4, %v746_v17  ;;  %v627_v18 = vadd.f32 %v622_v51, %v612_v16  ;;  %v613_v30 = vadd.f32 %v609_v37, %v478_v14 }
 0x15a   : > { %1090 = vrot.lane.b32.xlu1 %v1085_v54, %s2170_s3  ;;  %1163 = vrot.lane.b32.xlu0 %v1159_v55, %s2170_s3  ;;  %v765_v4 = vmul.f32 %v764_v60, %v2485_v44  ;;  %v1267_v37 = vmul.f32 %v1265_v27, %v2728_v42  ;;  %v1386_v51 = vmul.f32 %v1385_v45, %v2714_v20  ;;  %v1280_v54 = vstv %s2711_s29  ;;  %s2960_s29 = sld [smem:[#allocation4 + $0x4f]] }
 0x15b   : > { %v747_v3 = vadd.f32 %v745_v59, %v740_v33  ;;  %v507_v55 = vadd.f32 %v2587_v58, %v492_v24  ;;  %v493_v58 = vadd.f32 %v2585_v56, %v2417_v50  ;;  %v2765_v56 = vld [vmem:[#allocation2 + $0x22] sm:$0xff] }
 0x15c   : > { %v624_v6 = vpop.permute.xlu1 %623  ;;  %v637_v7 = vpop.permute.xlu0 %636 }
 0x15d   : > { %v2717_v26 = vadd.f32 %v752_v29, %v747_v3  ;;  %v642_v35 = vadd.f32 %v637_v7, %v627_v18  ;;  %v628_v23 = vadd.f32 %v624_v6, %v613_v30  ;;  %v522_v33 = vadd.f32 %v2597_v2, %v507_v55 }
 0x15e   : > { %1165 = vrot.lane.b32.xlu1 %v1160_v12, %s2170_s3  ;;  %1103 = vrot.lane.b32.xlu0 %v1099_v22, %s2170_s3  ;;  %v1387_v6 = vmul.f32 %v1385_v45, %v2728_v42  ;;  %v1281_v7 = vmul.f32 %v1280_v54, %v2743_v61  ;;  %v1325_v12 = vstv %s2725_s30  ;;  %v773_v22 = vmul.f32 %v771_v34, %v2499_v52  ;;  %s2967_s30 = sld [smem:[#allocation4 + $0x6b]] }
 0x15f   : > { %v508_v14 = vadd.f32 %v2595_v1, %v493_v58  ;;  %v537_v18 = vadd.f32 %v2607_v11, %v522_v33  ;;  %v780_v11 = vmul.f32 %v778_v13, %v2507_v57  ;;  %v1326_v60 = vmul.f32 %v1325_v12, %v2714_v20 }
 0x160   : > { %v639_v36 = vpop.permute.xlu1 %638  ;;  %v652_v63 = vpop.permute.xlu0 %651  ;;  %v792_v34 = vstv %s2760_s7  ;;  %v1327_v24 = vmul.f32 %v1325_v12, %v2728_v42  ;;  %s2994_s7 = sld [smem:[#allocation4 + $0x2d]] }
 0x161   : > { %v657_v5 = vadd.f32 %v652_v63, %v642_v35  ;;  %v643_v25 = vadd.f32 %v639_v36, %v628_v23  ;;  %v523_v27 = vadd.f32 %v2605_v8, %v508_v14  ;;  %v1282_v36 = vmul.f32 %v1280_v54, %v2765_v56 }
 0x162   : > { %1105 = vrot.lane.b32.xlu1 %v1100_v41, %s2170_s3  ;;  %1270 = vrot.lane.b32.xlu0 %v1266_v38, %s2169_s4  ;;  %v1400_v8 = vstv %s2745_s5  ;;  %v785_v23 = vstv %s2751_s6  ;;  %s2975_s5 = sld [smem:[#allocation4 + $0x6a]] }
 0x163   : > { %v760_v32 = vadd.f32 %v758_v19, %v657_v5  ;;  %v538_v63 = vadd.f32 %v2618_v21, %v523_v27  ;;  %v1401_v21 = vmul.f32 %v1400_v8, %v2743_v61  ;;  %v787_v58 = vmul.f32 %v785_v23, %v2483_v43  ;;  %s2990_s6 = sld [smem:[#allocation4 + $0x12]] }
 0x164   : > { %v654_v10 = vpop.permute.xlu1 %653  ;;  %v667_v17 = vpop.permute.xlu0 %666  ;;  %v1415_v14 = vstv %s2797_s16  ;;  %s3010_s16 = sld [smem:[#allocation4 + $0x13]] }
 0x165   : > { %v767_v15 = vadd.f32 %v765_v4, %v760_v32  ;;  %v658_v59 = vadd.f32 %v654_v10, %v643_v25  ;;  %v672_v1 = vadd.f32 %v667_v17, %v537_v18  ;;  %v786_v4 = vmul.f32 %v785_v23, %v2477_v40 }
 0x166   : > { %1272 = vrot.lane.b32.xlu1 %v1267_v37, %s2169_s4  ;;  %1390 = vrot.lane.b32.xlu0 %v1386_v51, %s2169_s4  ;;  %v1295_v10 = vstv %s2767_s8  ;;  %v799_v17 = vstv %s2773_s12  ;;  %v793_v51 = vmul.f32 %v792_v34, %v2485_v44  ;;  %v1402_v40 = vmul.f32 %v1400_v8, %v2765_v56  ;;  %s2998_s8 = sld [smem:[#allocation4 + $0x48]]  ;;  %s3001_s12 = sld [smem:[#allocation4 + $0x14]] }
 0x167   : > { %v761_v39 = vadd.f32 %v759_v9, %v658_v59  ;;  %v774_v16 = vadd.f32 %v772_v47, %v767_v15  ;;  %v2794_v9 = vld [vmem:[#allocation2 + $0x32] sm:$0xff]  ;;  %v1340_v47 = vstv %s2779_s14  ;;  %v800_v44 = vmul.f32 %v799_v17, %v2493_v48  ;;  %s3003_s14 = sld [smem:[#allocation4 + $0x63]] }
 0x168   : > { %v669_v29 = vpop.permute.xlu1 %668  ;;  %v682_v3 = vpop.permute.xlu0 %681  ;;  %v1296_v59 = vmul.f32 %v1295_v10, %v2794_v9  ;;  %v1355_v8 = vstv %s2826_s18  ;;  %s3015_s18 = sld [smem:[#allocation4 + $0x2e]] }
 0x169   : > { %v768_v50 = vadd.f32 %v766_v49, %v761_v39  ;;  %v2769_v2 = vadd.f32 %v779_v62, %v774_v16  ;;  %v687_v41 = vadd.f32 %v682_v3, %v672_v1  ;;  %v673_v19 = vadd.f32 %v669_v29, %v538_v63  ;;  %v2810_v39 = vld [vmem:[#allocation2 + $0x3a] sm:$0xff] }
 0x16a   : > { %1392 = vrot.lane.b32.xlu1 %v1387_v6, %s2169_s4  ;;  %1285 = vrot.lane.b32.xlu0 %v1281_v7, %s2169_s4  ;;  %v806_v49 = vstv %s2781_s15  ;;  %v794_v16 = vmul.f32 %v792_v34, %v2491_v46  ;;  %v1297_v12 = vmul.f32 %v1295_v10, %v2810_v39  ;;  %v801_v46 = vmul.f32 %v799_v17, %v2499_v52  ;;  %s3007_s15 = sld [smem:[#allocation4 + $0x2f]] }
 0x16b   : > { %v775_v28 = vadd.f32 %v773_v22, %v768_v50  ;;  %v807_v6 = vmul.f32 %v806_v49, %v2501_v53  ;;  %v1341_v22 = vmul.f32 %v1340_v47, %v2743_v61  ;;  %v808_v53 = vmul.f32 %v806_v49, %v2507_v57 }
 0x16c   : > { %v684_v30 = vpop.permute.xlu1 %683  ;;  %v697_v35 = vpop.permute.xlu0 %696  ;;  %v1430_v34 = vstv %s2843_s19  ;;  %s3024_s19 = sld [smem:[#allocation4 + $0x65]] }
 0x16d   : > { %v2785_v38 = vadd.f32 %v780_v11, %v775_v28  ;;  %v702_v5 = vadd.f32 %v697_v35, %v687_v41  ;;  %v688_v25 = vadd.f32 %v684_v30, %v673_v19  ;;  %v1342_v11 = vmul.f32 %v1340_v47, %v2765_v56  ;;  %v2840_v30 = vld [vmem:[#allocation2 + $0x4a] sm:$0xff]  ;;  %v2855_v41 = vld [vmem:[#allocation2 + $0x52] sm:$0xff] }
 0x16e   : > { %1287 = vrot.lane.b32.xlu1 %v1282_v36, %s2169_s4  ;;  %1330 = vrot.lane.b32.xlu0 %v1326_v60, %s2169_s4  ;;  %v1416_v28 = vmul.f32 %v1415_v14, %v2794_v9  ;;  %v1310_v35 = vstv %s2812_s17  ;;  %v1417_v60 = vmul.f32 %v1415_v14, %v2810_v39  ;;  %s3012_s17 = sld [smem:[#allocation4 + $0x4a]] }
 0x16f   : > { %v1311_v63 = vmul.f32 %v1310_v35, %v2840_v30 }
 0x170   : > { %v699_v45 = vpop.permute.xlu1 %698  ;;  %v712_v13 = vpop.permute.xlu0 %711 }
 0x171   : > { %v717_v32 = vadd.f32 %v712_v13, %v702_v5  ;;  %v703_v37 = vadd.f32 %v699_v45, %v688_v25  ;;  %v1312_v5 = vmul.f32 %v1310_v35, %v2855_v41  ;;  %v1356_v45 = vmul.f32 %v1355_v8, %v2794_v9 }
 0x172   : > { %1332 = vrot.lane.b32.xlu1 %v1327_v24, %s2169_s4  ;;  %1405 = vrot.lane.b32.xlu0 %v1401_v21, %s2169_s4  ;;  %v1357_v21 = vmul.f32 %v1355_v8, %v2810_v39  ;;  %v1431_v25 = vmul.f32 %v1430_v34, %v2840_v30 }
 0x173   : > { %v788_v54 = vadd.f32 %v786_v4, %v717_v32  ;;  %v1370_v32 = vstv %s2858_s20  ;;  %s3028_s20 = sld [smem:[#allocation4 + $0x64]] }
 0x174   : > { %v714_v55 = vpop.permute.xlu1 %713  ;;  %v2803_v15 = vpop.permute.xlu0 %818 }
 0x175   : > { %v795_v62 = vadd.f32 %v793_v51, %v788_v54  ;;  %v718_v33 = vadd.f32 %v714_v55, %v703_v37  ;;  %v1432_v51 = vmul.f32 %v1430_v34, %v2855_v41  ;;  %v1371_v54 = vmul.f32 %v1370_v32, %v2840_v30 }
 0x176   : > { %1407 = vrot.lane.b32.xlu1 %v1402_v40, %s2169_s4  ;;  %1300 = vrot.lane.b32.xlu0 %v1296_v59, %s2169_s4  ;;  %v1445_v59 = vstv %s2867_s21  ;;  %s2173_s21 = smov 32  }
 0x177   : > { %v789_v29 = vadd.f32 %v787_v58, %v718_v33  ;;  %v802_v3 = vadd.f32 %v800_v44, %v795_v62  ;;  %v1372_v62 = vmul.f32 %v1370_v32, %v2855_v41  ;;  %v1446_v58 = vmul.f32 %v1445_v59, %v2714_v20 }
 0x178   : > { %v2819_v7 = vpop.permute.xlu1 %820  ;;  %v2821_v43 = vpop.permute.xlu0 %833 }
 0x179   : > { %v796_v48 = vadd.f32 %v794_v16, %v789_v29  ;;  %v2828_v18 = vadd.f32 %v807_v6, %v802_v3  ;;  %v1447_v3 = vmul.f32 %v1445_v59, %v2728_v42 }
 0x17a   : > { %1302 = vrot.lane.b32.xlu1 %v1297_v12, %s2169_s4  ;;  %1345 = vrot.lane.b32.xlu0 %v1341_v22, %s2169_s4 }
 0x17b   : > { %v803_v50 = vadd.f32 %v801_v46, %v796_v48  ;;  %v1460_v48 = vstv %s2883_s23  ;;  %s2175_s23 = smov 96  }
 0x17c   : > { %v2834_v27 = vpop.permute.xlu1 %835  ;;  %v2836_v1 = vpop.permute.xlu0 %848 }
 0x17d   : > { %v2845_v52 = vadd.f32 %v808_v53, %v803_v50  ;;  %v1461_v50 = vmul.f32 %v1460_v48, %v2743_v61 }
 0x17e   : > { %1347 = vrot.lane.b32.xlu1 %v1342_v11, %s2169_s4  ;;  %1420 = vrot.lane.b32.xlu0 %v1416_v28, %s2169_s4 }
 0x180   : > { %v2849_v57 = vpop.permute.xlu1 %850  ;;  %v2851_v36 = vpop.permute.xlu0 %863 }
 0x182   : > { %1422 = vrot.lane.b32.xlu1 %v1417_v60, %s2169_s4  ;;  %1315 = vrot.lane.b32.xlu0 %v1311_v63, %s2169_s4  ;;  %v1462_v63 = vmul.f32 %v1460_v48, %v2765_v56 }
 0x184   : > { %v2862_v23 = vpop.permute.xlu1 %865  ;;  %v879_v19 = vpop.permute.xlu0 %878 }
 0x185   : > { %v884_v4 = vadd.f32 %v879_v19, %v2769_v2  ;;  %v824_v19 = vadd.f32 %v2803_v15, %v2699_v31  ;;  %v825_v31 = vadd.f32 %v2819_v7, %v2717_v26  ;;  %v1520_v7 = vstv %s2916_s26  ;;  %s2179_s26 = smov 112  }
 0x186   : > { %1317 = vrot.lane.b32.xlu1 %v1312_v5, %s2169_s4  ;;  %1360 = vrot.lane.b32.xlu0 %v1356_v45, %s2169_s4  ;;  %v1580_v45 = vstv %s2902_s25  ;;  %s2177_s25 = smov 48  }
 0x187   : > { %v839_v34 = vadd.f32 %v2821_v43, %v824_v19  ;;  %v840_v43 = vadd.f32 %v2834_v27, %v825_v31 }
 0x188   : > { %v881_v13 = vpop.permute.xlu1 %880  ;;  %v894_v24 = vpop.permute.xlu0 %893 }
 0x189   : > { %v899_v10 = vadd.f32 %v894_v24, %v884_v4  ;;  %v885_v55 = vadd.f32 %v881_v13, %v2785_v38  ;;  %v1565_v38 = vstv %s2875_s22  ;;  %v854_v15 = vadd.f32 %v2836_v1, %v839_v34  ;;  %s2174_s22 = smov 64  }
 0x18a   : > { %1362 = vrot.lane.b32.xlu1 %v1357_v21, %s2169_s4  ;;  %1435 = vrot.lane.b32.xlu0 %v1431_v25, %s2169_s4  ;;  %v1566_v6 = vmul.f32 %v1565_v38, %v2714_v20  ;;  %v1567_v53 = vmul.f32 %v1565_v38, %v2728_v42  ;;  %v1581_v25 = vmul.f32 %v1580_v45, %v2743_v61 }
 0x18b   : > { %v855_v1 = vadd.f32 %v2849_v57, %v840_v43 }
 0x18c   : > { %v896_v17 = vpop.permute.xlu1 %895  ;;  %v909_v37 = vpop.permute.xlu0 %908 }
 0x18d   : > { %v914_v40 = vadd.f32 %v909_v37, %v899_v10  ;;  %v900_v2 = vadd.f32 %v896_v17, %v885_v55  ;;  %v869_v17 = vadd.f32 %v2851_v36, %v854_v15  ;;  %v870_v27 = vadd.f32 %v2862_v23, %v855_v1 }
 0x18e   : > { %1437 = vrot.lane.b32.xlu1 %v1432_v51, %s2169_s4  ;;  %1375 = vrot.lane.b32.xlu0 %v1371_v54, %s2169_s4  ;;  %v1582_v54 = vmul.f32 %v1580_v45, %v2765_v56  ;;  %v1522_v23 = vmul.f32 %v1520_v7, %v2765_v56 }
 0x190   : > { %v911_v47 = vpop.permute.xlu1 %910  ;;  %v924_v49 = vpop.permute.xlu0 %923 }
 0x191   : > { %v915_v33 = vadd.f32 %v911_v47, %v900_v2  ;;  %v2889_v44 = vadd.f32 %v924_v49, %v914_v40  ;;  %v1521_v2 = vmul.f32 %v1520_v7, %v2743_v61 }
 0x192   : > { %1377 = vrot.lane.b32.xlu1 %v1372_v62, %s2169_s4  ;;  %1450 = vrot.lane.b32.xlu0 %v1446_v58, %s2170_s3  ;;  %s2908_s4 = sld [smem:[#allocation4 + $0x4e]]  ;;  %v1595_v62 = vstv %s2930_s27  ;;  %s2074_s27 = sshll.u32 %s3097_s9, 3 }
 0x193   : > { %v1596_v38 = vmul.f32 %v1595_v62, %v2794_v9  ;;  %v1597_v48 = vmul.f32 %v1595_v62, %v2810_v39 }
 0x194   : > { %v926_v16 = vpop.permute.xlu1 %925  ;;  %v939_v29 = vpop.permute.xlu0 %938 }
 0x195   : > { %v2898_v12 = vadd.f32 %v926_v16, %v915_v33  ;;  %v944_v22 = vadd.f32 %v939_v29, %v2828_v18  ;;  %v1505_v18 = vstv %s2892_s24  ;;  %s2176_s24 = smov 16  }
 0x196   : > { %1452 = vrot.lane.b32.xlu1 %v1447_v3, %s2170_s3  ;;  %1570 = vrot.lane.b32.xlu0 %v1566_v6, %s2170_s3  ;;  %v1506_v8 = vmul.f32 %v1505_v18, %v2714_v20  ;;  %v1507_v21 = vmul.f32 %v1505_v18, %v2728_v42  ;;  %v1490_v3 = vstv %s2940_s28 }
 0x197   : > { %v1492_v18 = vmul.f32 %v1490_v3, %v2855_v41 }
 0x198   : > { %v941_v14 = vpop.permute.xlu1 %940  ;;  %v954_v46 = vpop.permute.xlu0 %953  ;;  %v1475_v4 = vstv %s2908_s4  ;;  %s2178_s4 = smov 80  }
 0x199   : > { %v945_v11 = vadd.f32 %v941_v14, %v2845_v52  ;;  %v959_v28 = vadd.f32 %v954_v46, %v944_v22  ;;  %v1476_v26 = vmul.f32 %v1475_v4, %v2794_v9  ;;  %v1477_v59 = vmul.f32 %v1475_v4, %v2810_v39 }
 0x19a   : > { %1572 = vrot.lane.b32.xlu1 %v1567_v53, %s2170_s3  ;;  %1465 = vrot.lane.b32.xlu0 %v1461_v50, %s2170_s3  ;;  %v1491_v14 = vmul.f32 %v1490_v3, %v2840_v30  ;;  %v1535_v50 = vstv %s2960_s29 }
 0x19c   : > { %v956_v35 = vpop.permute.xlu1 %955  ;;  %v969_v60 = vpop.permute.xlu0 %968 }
 0x19d   : > { %v960_v5 = vadd.f32 %v956_v35, %v945_v11  ;;  %v974_v52 = vadd.f32 %v969_v60, %v959_v28  ;;  %v1536_v35 = vmul.f32 %v1535_v50, %v2794_v9 }
 0x19e   : > { %1467 = vrot.lane.b32.xlu1 %v1462_v63, %s2170_s3  ;;  %1510 = vrot.lane.b32.xlu0 %v1506_v8, %s2170_s3  ;;  %v1610_v8 = vstv %s2967_s30  ;;  %s188_s30 = scalar_lea.vmem %s3089_s2, %s2074_s27 }
 0x1a0   : > { %v971_v13 = vpop.permute.xlu1 %970  ;;  %v984_v24 = vpop.permute.xlu0 %983 }
 0x1a1   : > { %v975_v32 = vadd.f32 %v971_v13, %v960_v5  ;;  %v989_v10 = vadd.f32 %v984_v24, %v974_v52  ;;  %v1537_v5 = vmul.f32 %v1535_v50, %v2810_v39  ;;  %v1611_v52 = vmul.f32 %v1610_v8, %v2840_v30 }
 0x1a2   : > { %1512 = vrot.lane.b32.xlu1 %v1507_v21, %s2170_s3  ;;  %1585 = vrot.lane.b32.xlu0 %v1581_v25, %s2170_s3  ;;  %v1550_v13 = vstv %s2975_s5  ;;  %v1612_v21 = vmul.f32 %v1610_v8, %v2855_v41  ;;  %v1251_v50 = vstv %s3012_s17 }
 0x1a3   : > { %v1551_v25 = vmul.f32 %v1550_v13, %v2840_v30 }
 0x1a4   : > { %v986_v37 = vpop.permute.xlu1 %985  ;;  %v999_v51 = vpop.permute.xlu0 %998 }
 0x1a5   : > { %v990_v55 = vadd.f32 %v986_v37, %v975_v32  ;;  %v1004_v40 = vadd.f32 %v999_v51, %v869_v17  ;;  %v1181_v37 = vstv %s2990_s6 }
 0x1a6   : > { %1587 = vrot.lane.b32.xlu1 %v1582_v54, %s2170_s3  ;;  %1480 = vrot.lane.b32.xlu0 %v1476_v26, %s2170_s3  ;;  %v1188_v54 = vstv %s2994_s7  ;;  %v1182_v1 = vmul.f32 %v1181_v37, %v2714_v20 }
 0x1a8   : > { %v1001_v57 = vpop.permute.xlu1 %1000  ;;  %v1119_v36 = vpop.permute.xlu0 %1118 }
 0x1a9   : > { %v1005_v47 = vadd.f32 %v1001_v57, %v870_v27  ;;  %v1124_v49 = vadd.f32 %v1119_v36, %v989_v10  ;;  %v1552_v10 = vmul.f32 %v1550_v13, %v2855_v41  ;;  %v1189_v27 = vmul.f32 %v1188_v54, %v2743_v61 }
 0x1aa   : > { %1482 = vrot.lane.b32.xlu1 %v1477_v59, %s2170_s3  ;;  %1525 = vrot.lane.b32.xlu0 %v1521_v2, %s2170_s3  ;;  %v1183_v36 = vmul.f32 %v1181_v37, %v2728_v42 }
 0x1ac   : > { %v1121_v58 = vpop.permute.xlu1 %1120  ;;  %v1014_v33 = vpop.permute.xlu0 %1013 }
 0x1ad   : > { %v1125_v16 = vadd.f32 %v1121_v58, %v990_v55  ;;  %v1019_v29 = vadd.f32 %v1014_v33, %v1004_v40  ;;  %v1195_v40 = vstv %s2998_s8 }
 0x1ae   : > { %1527 = vrot.lane.b32.xlu1 %v1522_v23, %s2170_s3  ;;  %1600 = vrot.lane.b32.xlu0 %v1596_v38, %s2170_s3  ;;  %v1196_v23 = vmul.f32 %v1195_v40, %v2794_v9  ;;  %v1244_v38 = vstv %s3007_s15 }
 0x1af   : > { %v1245_v8 = vmul.f32 %v1244_v38, %v2743_v61 }
 0x1b0   : > { %v1016_v6 = vpop.permute.xlu1 %1015  ;;  %v1059_v22 = vpop.permute.xlu0 %1058 }
 0x1b1   : > { %v1020_v46 = vadd.f32 %v1016_v6, %v1005_v47  ;;  %v1064_v53 = vadd.f32 %v1059_v22, %v2889_v44  ;;  %v1237_v47 = vstv %s3001_s12 }
 0x1b2   : > { %1602 = vrot.lane.b32.xlu1 %v1597_v48, %s2170_s3  ;;  %1495 = vrot.lane.b32.xlu0 %v1491_v14, %s2170_s3  ;;  %v1238_v48 = vmul.f32 %v1237_v47, %v2714_v20 }
 0x1b4   : > { %v1061_v11 = vpop.permute.xlu1 %1060  ;;  %v1134_v28 = vpop.permute.xlu0 %1133 }
 0x1b5   : > { %v1065_v60 = vadd.f32 %v1061_v11, %v2898_v12  ;;  %v1139_v63 = vadd.f32 %v1134_v28, %v1124_v49  ;;  %v1202_v49 = vstv %s3003_s14 }
 0x1b6   : > { %1497 = vrot.lane.b32.xlu1 %v1492_v18, %s2170_s3  ;;  %1540 = vrot.lane.b32.xlu0 %v1536_v35, %s2170_s3  ;;  %v1203_v6 = vmul.f32 %v1202_v49, %v2840_v30 }
 0x1b8   : > { %v1136_v44 = vpop.permute.xlu1 %1135  ;;  %v1029_v19 = vpop.permute.xlu0 %1028 }
 0x1b9   : > { %v1140_v45 = vadd.f32 %v1136_v44, %v1125_v16  ;;  %v1034_v34 = vadd.f32 %v1029_v19, %v1019_v29  ;;  %v1190_v16 = vmul.f32 %v1188_v54, %v2765_v56  ;;  %v1204_v19 = vmul.f32 %v1202_v49, %v2855_v41 }
 0x1ba   : > { %1542 = vrot.lane.b32.xlu1 %v1537_v5, %s2170_s3  ;;  %1615 = vrot.lane.b32.xlu0 %v1611_v52, %s2170_s3  ;;  %v1239_v52 = vmul.f32 %v1237_v47, %v2728_v42 }
 0x1bc   : > { %v1031_v12 = vpop.permute.xlu1 %1030  ;;  %v1074_v24 = vpop.permute.xlu0 %1073 }
 0x1bd   : > { %v1035_v4 = vadd.f32 %v1031_v12, %v1020_v46  ;;  %v1079_v31 = vadd.f32 %v1074_v24, %v1064_v53  ;;  %v1209_v46 = vstv %s3010_s16  ;;  %v1197_v53 = vmul.f32 %v1195_v40, %v2810_v39 }
 0x1be   : > { %1617 = vrot.lane.b32.xlu1 %v1612_v21, %s2170_s3  ;;  %1555 = vrot.lane.b32.xlu0 %v1551_v25, %s2170_s3  ;;  %v1252_v12 = vmul.f32 %v1251_v50, %v2794_v9  ;;  %v1258_v24 = vstv %s3024_s19 }
 0x1c0   : > { %v1076_v15 = vpop.permute.xlu1 %1075  ;;  %v1149_v32 = vpop.permute.xlu0 %1148 }
 0x1c1   : > { %v1080_v43 = vadd.f32 %v1076_v15, %v1065_v60  ;;  %v1154_v17 = vadd.f32 %v1149_v32, %v1139_v63  ;;  %v1216_v60 = vstv %s3015_s18  ;;  %v1246_v15 = vmul.f32 %v1244_v38, %v2765_v56 }
 0x1c2   : > { %1557 = vrot.lane.b32.xlu1 %v1552_v10, %s2170_s3  ;;  %s3018_s3 = sld [smem:[#allocation4 + $0x49]]  ;;  %v1230_v32 = vstv %s3028_s20 }
 0x1c4   : > { %v1151_v51 = vpop.permute.xlu1 %1150  ;;  %v1044_v26 = vpop.permute.xlu0 %1043 }
 0x1c5   : > { %v1155_v7 = vadd.f32 %v1151_v51, %v1140_v45  ;;  %v1049_v55 = vadd.f32 %v1044_v26, %v1034_v34  ;;  %v1210_v34 = vmul.f32 %v1209_v46, %v2714_v20  ;;  %v1211_v51 = vmul.f32 %v1209_v46, %v2728_v42 }
 0x1c6   : > { %v1259_v26 = vmul.f32 %v1258_v24, %v2840_v30 }
 0x1c7   : > { %v1184_v57 = vadd.f32 %v1182_v1, %v1049_v55  ;;  %v1253_v1 = vmul.f32 %v1251_v50, %v2810_v39 }
 0x1c8   : > { %v1046_v59 = vpop.permute.xlu1 %1045  ;;  %v1089_v2 = vpop.permute.xlu0 %1088  ;;  %v1223_v63 = vstv %s3018_s3 }
 0x1c9   : > { %v1191_v62 = vadd.f32 %v1189_v27, %v1184_v57  ;;  %v1050_v58 = vadd.f32 %v1046_v59, %v1035_v4  ;;  %v1094_v33 = vadd.f32 %v1089_v2, %v1079_v31  ;;  %v1260_v2 = vmul.f32 %v1258_v24, %v2855_v41 }
 0x1cb   : > { %v1185_v29 = vadd.f32 %v1183_v36, %v1050_v58  ;;  %v1198_v3 = vadd.f32 %v1196_v23, %v1191_v62  ;;  %v1218_v36 = vmul.f32 %v1216_v60, %v2765_v56  ;;  %v1231_v58 = vmul.f32 %v1230_v32, %v2840_v30 }
 0x1cc   : > { %v1091_v22 = vpop.permute.xlu1 %1090  ;;  %v1164_v14 = vpop.permute.xlu0 %1163 }
 0x1cd   : > { %v1192_v11 = vadd.f32 %v1190_v16, %v1185_v29  ;;  %v1095_v28 = vadd.f32 %v1091_v22, %v1080_v43  ;;  %v1169_v18 = vadd.f32 %v1164_v14, %v1154_v17  ;;  %v1205_v35 = vadd.f32 %v1203_v6, %v1198_v3 }
 0x1ce   : > { %v1217_v43 = vmul.f32 %v1216_v60, %v2743_v61  ;;  %v1232_v3 = vmul.f32 %v1230_v32, %v2855_v41 }
 0x1cf   : > { %v1240_v44 = vadd.f32 %v1238_v48, %v1169_v18  ;;  %v1199_v5 = vadd.f32 %v1197_v53, %v1192_v11 }
 0x1d0   : > { %v1166_v45 = vpop.permute.xlu1 %1165  ;;  %v1104_v13 = vpop.permute.xlu0 %1103 }
 0x1d1   : > { %v1247_v21 = vadd.f32 %v1245_v8, %v1240_v44  ;;  %v1170_v25 = vadd.f32 %v1166_v45, %v1155_v7  ;;  %v1109_v4 = vadd.f32 %v1104_v13, %v1094_v33  ;;  %v1206_v31 = vadd.f32 %v1204_v19, %v1199_v5 }
 0x1d2   : > { %v1224_v7 = vmul.f32 %v1223_v63, %v2794_v9  ;;  %v1225_v33 = vmul.f32 %v1223_v63, %v2810_v39 }
 0x1d3   : > { %v1241_v10 = vadd.f32 %v1239_v52, %v1170_v25  ;;  %v1212_v17 = vadd.f32 %v1210_v34, %v1109_v4  ;;  %v1254_v37 = vadd.f32 %v1252_v12, %v1247_v21 }
 0x1d4   : > { %v1106_v54 = vpop.permute.xlu1 %1105  ;;  %v1271_v20 = vpop.permute.xlu0 %1270 }
 0x1d5   : > { %v1248_v55 = vadd.f32 %v1246_v15, %v1241_v10  ;;  %v1219_v40 = vadd.f32 %v1217_v43, %v1212_v17  ;;  %v1110_v27 = vadd.f32 %v1106_v54, %v1095_v28  ;;  %v1276_v57 = vadd.f32 %v1271_v20, %v1205_v35 }
 0x1d6   : > { %v1261_v59 = vadd.f32 %v1259_v26, %v1254_v37 }
 0x1d7   : > { %v1213_v61 = vadd.f32 %v1211_v51, %v1110_v27  ;;  %v1255_v47 = vadd.f32 %v1253_v1, %v1248_v55  ;;  %v1226_v42 = vadd.f32 %v1224_v7, %v1219_v40 }
 0x1d8   : > { %v1273_v49 = vpop.permute.xlu1 %1272  ;;  %v1391_v62 = vpop.permute.xlu0 %1390 }
 0x1d9   : > { %v1220_v23 = vadd.f32 %v1218_v36, %v1213_v61  ;;  %v1277_v9 = vadd.f32 %v1273_v49, %v1206_v31  ;;  %v1396_v38 = vadd.f32 %v1391_v62, %v1261_v59  ;;  %v1262_v16 = vadd.f32 %v1260_v2, %v1255_v47 }
 0x1da   : > { %v1233_v29 = vadd.f32 %v1231_v58, %v1226_v42 }
 0x1db   : > { %v1227_v56 = vadd.f32 %v1225_v33, %v1220_v23  ;;  %v1623_v33 = vld [vmem:[#allocation3] sm:$0xff] }
 0x1dc   : > { %v1393_v6 = vpop.permute.xlu1 %1392  ;;  %v1286_v22 = vpop.permute.xlu0 %1285 }
 0x1dd   : > { %v1397_v48 = vadd.f32 %v1393_v6, %v1262_v16  ;;  %v1234_v14 = vadd.f32 %v1232_v3, %v1227_v56  ;;  %v1291_v51 = vadd.f32 %v1286_v22, %v1276_v57 }
 0x1e0   : > { %v1288_v46 = vpop.permute.xlu1 %1287  ;;  %v1331_v53 = vpop.permute.xlu0 %1330 }
 0x1e1   : > { %v1336_v50 = vadd.f32 %v1331_v53, %v1233_v29  ;;  %v1292_v1 = vadd.f32 %v1288_v46, %v1277_v9 }
 0x1e4   : > { %v1333_v11 = vpop.permute.xlu1 %1332  ;;  %v1406_v28 = vpop.permute.xlu0 %1405 }
 0x1e5   : > { %v1337_v30 = vadd.f32 %v1333_v11, %v1234_v14  ;;  %v1411_v59 = vadd.f32 %v1406_v28, %v1396_v38  ;;  %v1624_v38 = vld [vmem:[#allocation3 + $0x8] sm:$0xff] }
 0x1e8   : > { %v1408_v18 = vpop.permute.xlu1 %1407  ;;  %v1301_v39 = vpop.permute.xlu0 %1300 }
 0x1e9   : > { %v1306_v54 = vadd.f32 %v1301_v39, %v1291_v51  ;;  %v1412_v62 = vadd.f32 %v1408_v18, %v1397_v48 }
 0x1ec   : > { %v1303_v35 = vpop.permute.xlu1 %1302  ;;  %v1346_v60 = vpop.permute.xlu0 %1345 }
 0x1ed   : > { %v1307_v55 = vadd.f32 %v1303_v35, %v1292_v1  ;;  %v1351_v57 = vadd.f32 %v1346_v60, %v1336_v50  ;;  %v1632_v1 = vld [vmem:[#allocation3 + $0x18] sm:$0xff] }
 0x1f0   : > { %v1348_v63 = vpop.permute.xlu1 %1347  ;;  %v1421_v8 = vpop.permute.xlu0 %1420 }
 0x1f1   : > { %v1426_v47 = vadd.f32 %v1421_v8, %v1411_v59  ;;  %v1352_v46 = vadd.f32 %v1348_v63, %v1337_v30 }
 0x1f4   : > { %v1423_v44 = vpop.permute.xlu1 %1422  ;;  %v1316_v19 = vpop.permute.xlu0 %1315 }
 0x1f5   : > { %v1321_v7 = vadd.f32 %v1316_v19, %v1306_v54  ;;  %v1427_v9 = vadd.f32 %v1423_v44, %v1412_v62 }
 0x1f8   : > { %v1318_v41 = vpop.permute.xlu1 %1317  ;;  %v1361_v5 = vpop.permute.xlu0 %1360 }
 0x1f9   : > { %v1322_v61 = vadd.f32 %v1318_v41, %v1307_v55  ;;  %v1366_v56 = vadd.f32 %v1361_v5, %v1351_v57  ;;  %v1638_v41 = vld [vmem:[#allocation3 + $0x20] sm:$0xff] }
 0x1fc   : > { %v1363_v52 = vpop.permute.xlu1 %1362  ;;  %v1436_v45 = vpop.permute.xlu0 %1435 }
 0x1fd   : > { %v1441_v16 = vadd.f32 %v1436_v45, %v1426_v47  ;;  %v1367_v18 = vadd.f32 %v1363_v52, %v1352_v46  ;;  %v1631_v52 = vld [vmem:[#allocation3 + $0x10] sm:$0xff] }
 0x200   : > { %v1438_v34 = vpop.permute.xlu1 %1437  ;;  %v1376_v13 = vpop.permute.xlu0 %1375 }
 0x201   : > { %v1442_v28 = vadd.f32 %v1438_v34, %v1427_v9  ;;  %v1381_v39 = vadd.f32 %v1376_v13, %v1366_v56 }
 0x204   : > { %v1378_v12 = vpop.permute.xlu1 %1377  ;;  %v1451_v24 = vpop.permute.xlu0 %1450 }
 0x205   : > { %v1456_v40 = vadd.f32 %v1451_v24, %v1321_v7  ;;  %v1382_v45 = vadd.f32 %v1378_v12, %v1367_v18  ;;  %v2172_v7 = vmov 1934713408  }
 0x206   : > { %v1687_v55 = vunpack.c.l.s4 %v2172_v7 }
 0x208   : > { %v1453_v21 = vpop.permute.xlu1 %1452  ;;  %v1571_v25 = vpop.permute.xlu0 %1570  ;;  %v1688_v47 = vunpack.c.0.s8 %v1687_v55 }
 0x209   : > { %v1457_v42 = vadd.f32 %v1453_v21, %v1322_v61  ;;  %v1576_v6 = vadd.f32 %v1571_v25, %v1441_v16 }
 0x20c   : > { %v1573_v4 = vpop.permute.xlu1 %1572  ;;  %v1466_v31 = vpop.permute.xlu0 %1465 }
 0x20d   : > { %v1471_v2 = vadd.f32 %v1466_v31, %v1456_v40  ;;  %v1577_v50 = vadd.f32 %v1573_v4, %v1442_v28  ;;  %v1639_v31 = vld [vmem:[#allocation3 + $0x28] sm:$0xff] }
 0x210   : > { %v1468_v15 = vpop.permute.xlu1 %1467  ;;  %v1511_v32 = vpop.permute.xlu0 %1510 }
 0x211   : > { %v1472_v29 = vadd.f32 %v1468_v15, %v1457_v42  ;;  %v1516_v60 = vadd.f32 %v1511_v32, %v1381_v39  ;;  %v2171_v32 = vmov 1983009808  }
 0x214   : > { %v1513_v10 = vpop.permute.xlu1 %1512  ;;  %v1586_v43 = vpop.permute.xlu0 %1585 }
 0x215   : > { %v1591_v35 = vadd.f32 %v1586_v43, %v1576_v6  ;;  %v1517_v34 = vadd.f32 %v1513_v10, %v1382_v45  ;;  %v1656_v43 = vunpack.c.l.s4 %v2171_v32 }
 0x218   : > { %v1588_v17 = vpop.permute.xlu1 %1587  ;;  %v1481_v37 = vpop.permute.xlu0 %1480 }
 0x219   : > { %v1486_v49 = vadd.f32 %v1481_v37, %v1471_v2  ;;  %v1592_v24 = vadd.f32 %v1588_v17, %v1577_v50  ;;  %v1658_v37 = vlaneseq }
 0x21b   : > { %v1659_v59 = vshrl.u32 %v1658_v37, 7 }
 0x21c   : > { %v1483_v20 = vpop.permute.xlu1 %1482  ;;  %v1526_v26 = vpop.permute.xlu0 %1525 }
 0x21d   : > { %v1487_v22 = vadd.f32 %v1483_v20, %v1472_v29  ;;  %v1531_v30 = vadd.f32 %v1526_v26, %v1516_v60 }
 0x220   : > { %v1528_v27 = vpop.permute.xlu1 %1527  ;;  %v1601_v36 = vpop.permute.xlu0 %1600 }
 0x221   : > { %v1606_v8 = vadd.f32 %v1601_v36, %v1591_v35  ;;  %v1532_v51 = vadd.f32 %v1528_v27, %v1517_v34  ;;  %v1657_v36 = vunpack.c.0.s8 %v1656_v43 }
 0x224   : > { %v1603_v58 = vpop.permute.xlu1 %1602  ;;  %v1496_v23 = vpop.permute.xlu0 %1495 }
 0x225   : > { %v1501_v3 = vadd.f32 %v1496_v23, %v1486_v49  ;;  %v1607_v13 = vadd.f32 %v1603_v58, %v1592_v24  ;;  %v1660_v49 = vsub.s32 %v1657_v36, %v1659_v59 }
 0x227   : > { %v1625_v14 = vadd.f32 %v1623_v33, %v1501_v3  ;;  %v1691_v33 = vsub.s32 %v1688_v47, %v1659_v59 }
 0x228   : > { %v1498_v53 = vpop.permute.xlu1 %1497  ;;  %v1541_v11 = vpop.permute.xlu0 %1540 }
 0x229   : > { %1628 = vst.msk [vmem:[#allocation3] sm:$0xff] %vm194_vm3, %v1625_v14  ;;  %v1502_v48 = vadd.f32 %v1498_v53, %v1487_v22  ;;  %v1546_v21 = vadd.f32 %v1541_v11, %v1531_v30 }
 0x22b   : > { %v1626_v19 = vadd.f32 %v1624_v38, %v1502_v48 }
 0x22c   : > { %v1543_v44 = vpop.permute.xlu1 %1542  ;;  %v1616_v5 = vpop.permute.xlu0 %1615 }
 0x22d   : > { %1629 = vst.msk [vmem:[#allocation3 + $0x8] sm:$0xff] %vm194_vm3, %v1626_v19  ;;  %v1621_v63 = vadd.f32 %v1616_v5, %v1606_v8  ;;  %v1547_v54 = vadd.f32 %v1543_v44, %v1532_v51 }
 0x22f   : > { %v1640_v25 = vadd.f32 %v1638_v41, %v1621_v63 }
 0x230   : > { %v1618_v15 = vpop.permute.xlu1 %1617  ;;  %v1556_v4 = vpop.permute.xlu0 %1555  ;;  %v1647_v27 = vld [vmem:[#allocation3] sm:$0xff] }
 0x231   : > { %1642 = vst.msk [vmem:[#allocation3 + $0x20] sm:$0xff] %vm194_vm3, %v1640_v25  ;;  %v1622_v12 = vadd.f32 %v1618_v15, %v1607_v13  ;;  %v1561_v17 = vadd.f32 %v1556_v4, %v1546_v21 }
 0x233   : > { %v1641_v20 = vadd.f32 %v1639_v31, %v1622_v12  ;;  %v1633_v26 = vadd.f32 %v1631_v52, %v1561_v17 }
 0x234   : > { %v1558_v10 = vpop.permute.xlu1 %1557  ;;  %v1648_v23 = vld [vmem:[#allocation3 + $0x8] sm:$0xff] }
 0x235   : > { %1643 = vst.msk [vmem:[#allocation3 + $0x28] sm:$0xff] %vm194_vm3, %v1641_v20  ;;  %1635 = vst.msk [vmem:[#allocation3 + $0x10] sm:$0xff] %vm194_vm3, %v1633_v26  ;;  %v1562_v40 = vadd.f32 %v1558_v10, %v1547_v54 }
 0x237   : > { %v1634_v61 = vadd.f32 %v1632_v1, %v1562_v40 }
 0x238   : > { %v1651_v2 = vld [vmem:[#allocation3 + $0x20] sm:$0xff] }
 0x239   : > { %1636 = vst.msk [vmem:[#allocation3 + $0x18] sm:$0xff] %vm194_vm3, %v1634_v61  ;;  %v1653_v42 = vcombine.low %v1647_v27, %v1651_v2  ;;  %v1654_v62 = vcombine.high %v1647_v27, %v1651_v2 }
 0x23b   : > { %v1661_v16 = vrot.slane %v1653_v42, %v1660_v49  ;;  %v1668_v6 = vrot.slane %v1654_v62, %v1660_v49 }
 0x23c   : > { %v1649_v58 = vld [vmem:[#allocation3 + $0x10] sm:$0xff]  ;;  %v1652_v57 = vld [vmem:[#allocation3 + $0x28] sm:$0xff] }
 0x23d   : > { %v1676_v29 = vrot.slane %v1649_v58, %v1660_v49  ;;  %v1720_v3 = vcombine.low %v1648_v23, %v1652_v57  ;;  %v1669_v9 = vcombine.high %v1649_v58, %v2167_v0  ;;  %v1721_v14 = vcombine.high %v1648_v23, %v1652_v57 }
 0x23f   : > { %v1685_v56 = vcombine.high %v1661_v16, %v1676_v29  ;;  %v1683_v22 = vrot.slane %v1669_v9, %v1660_v49  ;;  %v1728_v38 = vrot.slane %v1720_v3, %v1660_v49  ;;  %v1735_v48 = vrot.slane %v1721_v14, %v1660_v49 }
 0x240   : > { %v1650_v46 = vld [vmem:[#allocation3 + $0x18] sm:$0xff]  ;;  %v1684_v50 = vcombine.low %v1661_v16, %v1676_v29 }
 0x241   : > { %v1699_v53 = vrot.slane %v1685_v56, %v1691_v33  ;;  %v1743_v11 = vrot.slane %v1650_v46, %v1660_v49  ;;  %v1700_v28 = vcombine.low %v1668_v6, %v1683_v22  ;;  %v1736_v39 = vcombine.high %v1650_v46, %v2167_v0 }
 0x242   : > { %v1701_v44 = vcombine.high %v1668_v6, %v1683_v22  ;;  %v1692_v41 = vrot.slane %v1684_v50, %v1691_v33 }
 0x243   : > { %1792 = vrot.lane.b32.xlu0 %v1699_v53, %s2173_s21  ;;  %v1752_v35 = vcombine.high %v1728_v38, %v1743_v11  ;;  %v1750_v18 = vrot.slane %v1736_v39, %v1660_v49  ;;  %v1708_v8 = vrot.slane %v1700_v28, %v1691_v33  ;;  %v1751_v30 = vcombine.low %v1728_v38, %v1743_v11 }
 0x244   : > { %v1715_v45 = vrot.slane %v1701_v44, %v1691_v33  ;;  %v1716_v34 = vcombine.high %v1692_v41, %v2167_v0  ;;  %v1717_v25 = vcombine.high %v1699_v53, %v2167_v0 }
 0x245   : > { %v1766_v60 = vrot.slane %v1752_v35, %v1691_v33  ;;  %v1767_v19 = vcombine.low %v1735_v48, %v1750_v18  ;;  %v1768_v24 = vcombine.high %v1735_v48, %v1750_v18  ;;  %v1759_v13 = vrot.slane %v1751_v30, %v1691_v33 }
 0x246   : > { %v1718_v15 = vcombine.high %v1708_v8, %v2167_v0  ;;  %v1719_v4 = vcombine.high %v1715_v45, %v2167_v0 }
 0x247   : > { %1820 = vrot.lane.b32.xlu1 %v1766_v60, %s2173_s21  ;;  %1800 = vrot.lane.b32.xlu0 %v1708_v8, %s2174_s22  ;;  %v1775_v5 = vrot.slane %v1767_v19, %v1691_v33  ;;  %v1782_v63 = vrot.slane %v1768_v24, %v1691_v33  ;;  %v1783_v21 = vcombine.high %v1759_v13, %v2167_v0 }
 0x248   : > { %v1784_v31 = vcombine.high %v1766_v60, %v2167_v0 }
 0x249   : > { %v1785_v52 = vcombine.high %v1775_v5, %v2167_v0  ;;  %v1786_v32 = vcombine.high %v1782_v63, %v2167_v0 }
 0x24b   : > { %1828 = vrot.lane.b32.xlu1 %v1775_v5, %s2174_s22  ;;  %1808 = vrot.lane.b32.xlu0 %v1715_v45, %s2175_s23 }
 0x24f   : > { %1836 = vrot.lane.b32.xlu1 %v1782_v63, %s2175_s23  ;;  %1788 = vrot.lane.b32.xlu0 %v1716_v34, %s2176_s24 }
 0x253   : > { %1816 = vrot.lane.b32.xlu1 %v1783_v21, %s2176_s24  ;;  %1796 = vrot.lane.b32.xlu0 %v1717_v25, %s2177_s25 }
 0x257   : > { %1824 = vrot.lane.b32.xlu1 %v1784_v31, %s2177_s25  ;;  %1804 = vrot.lane.b32.xlu0 %v1718_v15, %s2178_s4 }
 0x25b   : > { %1832 = vrot.lane.b32.xlu1 %v1785_v52, %s2178_s4  ;;  %1812 = vrot.lane.b32.xlu0 %v1719_v4, %s2179_s26 }
 0x25f   : > { %1840 = vrot.lane.b32.xlu1 %v1786_v32, %s2179_s26 }
 0x2b5   : > { %v1793_v43 = vpop.permute.xlu0 %1792 }
 0x2b9   : > { %v1821_v37 = vpop.permute.xlu1 %1820  ;;  %v1801_v51 = vpop.permute.xlu0 %1800 }
 0x2bd   : > { %v1829_v12 = vpop.permute.xlu1 %1828  ;;  %v1809_v17 = vpop.permute.xlu0 %1808 }
 0x2c1   : > { %v1837_v54 = vpop.permute.xlu1 %1836  ;;  %v1789_v20 = vpop.permute.xlu0 %1788 }
 0x2c2   : > { %v1843_v10 = vsel %vm194_vm3, %v1692_v41, %v1789_v20 }
 0x2c3   : > { %v1845_v55 = vsel %vm1844_vm4, %v1843_v10, %v1793_v43 }
 0x2c5   : > { %v1817_v26 = vpop.permute.xlu1 %1816  ;;  %v1797_v1 = vpop.permute.xlu0 %1796 }
 0x2c6   : > { %v1856_v7 = vsel %vm194_vm3, %v1759_v13, %v1817_v26  ;;  %v1847_v59 = vsel %vm1846_vm5, %v1845_v55, %v1797_v1 }
 0x2c7   : > { %v1857_v40 = vsel %vm1844_vm4, %v1856_v7, %v1821_v37  ;;  %v1849_v27 = vsel %vm1848_vm6, %v1847_v59, %v1801_v51 }
 0x2c9   : > { %v1825_v0 = vpop.permute.xlu1 %1824  ;;  %v1805_v36 = vpop.permute.xlu0 %1804 }
 0x2ca   : > { %v1858_v61 = vsel %vm1846_vm5, %v1857_v40, %v1825_v0  ;;  %v1851_v42 = vsel %vm1850_vm7, %v1849_v27, %v1805_v36 }
 0x2cb   : > { %v1859_v2 = vsel %vm1848_vm6, %v1858_v61, %v1829_v12  ;;  %v1853_v58 = vsel %vm1852_vm8, %v1851_v42, %v1809_v17 }
 0x2cd   : > { %v1833_v47 = vpop.permute.xlu1 %1832  ;;  %v1813_v62 = vpop.permute.xlu0 %1812 }
 0x2ce   : > { %v1860_v49 = vsel %vm1850_vm7, %v1859_v2, %v1833_v47  ;;  %v1855_v57 = vsel %vm1854_vm9, %v1853_v58, %v1813_v62 }
 0x2cf   : > { %v1861_v33 = vsel %vm1852_vm8, %v1860_v49, %v1837_v54 }
 0x2d1   : > { %v1841_v23 = vpop.permute.xlu1 %1840 }
 0x2d2   : > { %v1862_v16 = vsel %vm1854_vm9, %v1861_v33, %v1841_v23 }
 0x2d3   : > { %v1865_v29 = vcombine.low %v1855_v57, %v1862_v16 }
 0x2d5   : > { %1867 = vst [vmem:[%s188_s30] sm:$0x77] %v1865_v29 }
 0x2d6 PF: > { %s13_s11 = sadd.s32 1, %s2164_s11   ;;  %s3092_s9 = smov %s2160_s10 }
 0x2d7   : > { %p10_p2 = scmp.ge.s32.totalorder %s13_s11, 4   ;;  %s3093_s10 = smov %s3095_s13 }
 0x2d9   :  { %12 = sbr.rel (!%p10_p2) target bundleno = 2 (0x2), region = 73 }
 0x2e0   :  { %1889 = vsyncpa [#allocation5], 1 }
 0x2e1   :  { %1891 = vsyncpa [#allocation5 + $0x1], 1 }

</bundles_post_ra>
